<compile_context>
chip_gen: v7x
topology: tpu7x:2x2x1
jax: 0.10.0
libtpu: 0.0.40
codegen_flags: <defaults>
</compile_context>

<pallas_src>
import jax
import jax.numpy as jnp
from jax.experimental import pallas as pl
from jax.experimental.pallas import tpu as pltpu


def _gru_encoder_kernel(x_ref,
                        wih0_ref, whh0_ref, b0_ref, b0hn_ref,
                        wih1_ref, whh1_ref, b1_ref, b1hn_ref,
                        wout_ref, bout_ref,
                        out_ref):
    """x_ref: [B, T, D] (un-reversed, batch-first). out_ref: [B, latent]."""
    B, T, D = x_ref.shape
    H = whh0_ref.shape[-1]
    f32 = jnp.float32

    # ---- Load per-gate weights once (leading-dim index => free address math).
    whh0_r, whh0_z, whh0_n = whh0_ref[0], whh0_ref[1], whh0_ref[2]
    wih1_r, wih1_z, wih1_n = wih1_ref[0], wih1_ref[1], wih1_ref[2]
    whh1_r, whh1_z, whh1_n = whh1_ref[0], whh1_ref[1], whh1_ref[2]

    # ---- Hoisted layer-0 input projection for ALL timesteps (off the serial
    # path).  Biases are folded in here: r/z get (b_ih + b_hh), n gets b_ih.
    x_flat = x_ref[...].reshape(B * T, D)
    gi0_r = (jnp.dot(x_flat, wih0_ref[0], preferred_element_type=f32)
             + b0_ref[0]).reshape(B, T, H)
    gi0_z = (jnp.dot(x_flat, wih0_ref[1], preferred_element_type=f32)
             + b0_ref[1]).reshape(B, T, H)
    gi0_n = (jnp.dot(x_flat, wih0_ref[2], preferred_element_type=f32)
             + b0_ref[2]).reshape(B, T, H)

    # ---- Pre-broadcast remaining biases to [B, H] once (JAX does not CSE
    # broadcast_in_dim, so doing this per step would repeat the broadcast).
    b0_hn = jnp.broadcast_to(b0hn_ref[...], (B, H))
    b1_r = jnp.broadcast_to(b1_ref[0], (B, H))
    b1_z = jnp.broadcast_to(b1_ref[1], (B, H))
    b1_in = jnp.broadcast_to(b1_ref[2], (B, H))
    b1_hn = jnp.broadcast_to(b1hn_ref[...], (B, H))

    h0 = jnp.zeros((B, H), f32)
    h1 = jnp.zeros((B, H), f32)

    # ---- Fully unrolled recurrence.  Time reversal (torch.flip over dim 1)
    # is folded into the static index tr = T - 1 - t.
    for t in range(T):
        tr = T - 1 - t

        # Layer 0: only the hidden-side projections are on the serial path.
        gh0_r = jnp.dot(h0, whh0_r, preferred_element_type=f32)
        gh0_z = jnp.dot(h0, whh0_z, preferred_element_type=f32)
        gh0_n = jnp.dot(h0, whh0_n, preferred_element_type=f32)
        r0 = jax.nn.sigmoid(gi0_r[:, tr, :] + gh0_r)
        z0 = jax.nn.sigmoid(gi0_z[:, tr, :] + gh0_z)
        n0 = jnp.tanh(gi0_n[:, tr, :] + r0 * (gh0_n + b0_hn))
        h0 = (1.0 - z0) * n0 + z0 * h0

        # Layer 1 (input = h0 of this step).
        gi1_r = jnp.dot(h0, wih1_r, preferred_element_type=f32)
        gi1_z = jnp.dot(h0, wih1_z, preferred_element_type=f32)
        gi1_n = jnp.dot(h0, wih1_n, preferred_element_type=f32)
        gh1_r = jnp.dot(h1, whh1_r, preferred_element_type=f32)
        gh1_z = jnp.dot(h1, whh1_z, preferred_element_type=f32)
        gh1_n = jnp.dot(h1, whh1_n, preferred_element_type=f32)
        r1 = jax.nn.sigmoid(gi1_r + gh1_r + b1_r)
        z1 = jax.nn.sigmoid(gi1_z + gh1_z + b1_z)
        n1 = jnp.tanh(gi1_n + b1_in + r1 * (gh1_n + b1_hn))
        h1 = (1.0 - z1) * n1 + z1 * h1

    # ---- linear_out(gru_out[:, -1, :])
    out = jnp.dot(h1, wout_ref[...], preferred_element_type=f32) + bout_ref[...]
    out_ref[...] = out.astype(out_ref.dtype)


def reverse_gru_encoder(x, kparams, latent_dim):
    """x: [B, T, D_in] float32 (unmodified). Returns [B, latent_dim] float32."""
    B, T, D = x.shape
    args = (x,
            kparams["wih0"], kparams["whh0"], kparams["b0"], kparams["b0hn"],
            kparams["wih1"], kparams["whh1"], kparams["b1"], kparams["b1hn"],
            kparams["wout"], kparams["bout"])
    vmem = pl.BlockSpec(memory_space=pltpu.MemorySpace.VMEM)
    return pl.pallas_call(
        _gru_encoder_kernel,
        out_shape=jax.ShapeDtypeStruct((B, latent_dim), jnp.float32),
        in_specs=[vmem] * len(args),
        out_specs=vmem,
    )(*args)


# ----------------------------------------------------------------------------
# Parameter handling: PyTorch-layout params -> kernel layout (one-time setup).
# ----------------------------------------------------------------------------
def make_params(key, dim_in, hidden, latent):
    """Deterministic synthetic parameters in PyTorch nn.GRU / nn.Linear layout."""
    ks = jax.random.split(key, 12)
    u = lambda k, shape, b: jax.random.uniform(k, shape, jnp.float32, -b, b)
    bh = 1.0 / jnp.sqrt(hidden)
    bx = jnp.sqrt(6.0 / (hidden + latent))  # xavier_uniform bound for linear_out
    return dict(
        weight_ih_l0=u(ks[0], (3 * hidden, dim_in), bh),
        weight_hh_l0=u(ks[1], (3 * hidden, hidden), bh),
        bias_ih_l0=u(ks[2], (3 * hidden,), bh),
        bias_hh_l0=u(ks[3], (3 * hidden,), bh),
        weight_ih_l1=u(ks[4], (3 * hidden, hidden), bh),
        weight_hh_l1=u(ks[5], (3 * hidden, hidden), bh),
        bias_ih_l1=u(ks[6], (3 * hidden,), bh),
        bias_hh_l1=u(ks[7], (3 * hidden,), bh),
        linear_w=u(ks[8], (latent, hidden), bx),
        linear_b=u(ks[9], (latent,), bh),
    )


def prepare_params(p):
    """Split per gate (r, z, n), transpose to right-multiply form, fold biases."""
    H = p["weight_hh_l0"].shape[1]

    def split_w(w):          # [3H, K] -> [3, K, H]
        return jnp.stack([w[0:H].T, w[H:2 * H].T, w[2 * H:3 * H].T])

    def split_b(b):          # [3H] -> three [1, H]
        return b[0:H][None, :], b[H:2 * H][None, :], b[2 * H:3 * H][None, :]

    bi0r, bi0z, bi0n = split_b(p["bias_ih_l0"])
    bh0r, bh0z, bh0n = split_b(p["bias_hh_l0"])
    bi1r, bi1z, bi1n = split_b(p["bias_ih_l1"])
    bh1r, bh1z, bh1n = split_b(p["bias_hh_l1"])
    return dict(
        wih0=split_w(p["weight_ih_l0"]), whh0=split_w(p["weight_hh_l0"]),
        b0=jnp.stack([bi0r + bh0r, bi0z + bh0z, bi0n]), b0hn=bh0n,
        wih1=split_w(p["weight_ih_l1"]), whh1=split_w(p["weight_hh_l1"]),
        b1=jnp.stack([bi1r + bh1r, bi1z + bh1z, bi1n]), b1hn=bh1n,
        wout=p["linear_w"].T, bout=p["linear_b"][None, :],
    )


def _reference(x, p):
    """Pure-JAX reference of ReverseGRUEncoder.forward (PyTorch-layout params)."""
    x = jnp.flip(x, axis=1)
    B, T, _ = x.shape
    H = p["weight_hh_l0"].shape[1]

    def cell(x_t, h, wih, whh, bi, bh):
        gi = x_t @ wih.T + bi
        gh = h @ whh.T + bh
        r = jax.nn.sigmoid(gi[:, :H] + gh[:, :H])
        z = jax.nn.sigmoid(gi[:, H:2 * H] + gh[:, H:2 * H])
        n = jnp.tanh(gi[:, 2 * H:] + r * gh[:, 2 * H:])
        return (1.0 - z) * n + z * h

    h0 = jnp.zeros((B, H), jnp.float32)
    h1 = jnp.zeros((B, H), jnp.float32)
    for t in range(T):
        h0 = cell(x[:, t, :], h0, p["weight_ih_l0"], p["weight_hh_l0"],
                  p["bias_ih_l0"], p["bias_hh_l0"])
        h1 = cell(h0, h1, p["weight_ih_l1"], p["weight_hh_l1"],
                  p["bias_ih_l1"], p["bias_hh_l1"])
    return h1 @ p["linear_w"].T + p["linear_b"][None, :]


if __name__ == "__main__":
    # Module config: dimension_in=7, encode_obs_time=True -> GRU input dim 8.
    B, T = 2, 8
    dim_in_effective = 8          # dimension_in + 1 (encode_obs_time)
    hidden = 32
    latent = 16

    key = jax.random.PRNGKey(0)
    kx, kp = jax.random.split(key)
    x = jax.random.normal(kx, (B, T, dim_in_effective), jnp.float32)
    torch_params = make_params(kp, dim_in_effective, hidden, latent)
    kernel_params = jax.tree_util.tree_map(jax.block_until_ready,
                                           prepare_params(torch_params))

    out = reverse_gru_encoder(x, kernel_params, latent)
    out = jax.block_until_ready(out)

    ref = _reference(x, torch_params)
    assert out.shape == (B, latent), out.shape
    assert jnp.allclose(out, ref, atol=1e-4, rtol=1e-4), \
        float(jnp.max(jnp.abs(out - ref)))

    print("KERNEL_OK")
</pallas_src>

<mosaic_0001>
module attributes {stable_mosaic.version = 11 : i64} {
  func.func @_gru_encoder_kernel(%arg0: memref<2x8x8xf32, #tpu.memory_space<vmem>>, %arg1: memref<3x8x32xf32, #tpu.memory_space<vmem>>, %arg2: memref<3x32x32xf32, #tpu.memory_space<vmem>>, %arg3: memref<3x1x32xf32, #tpu.memory_space<vmem>>, %arg4: memref<1x32xf32, #tpu.memory_space<vmem>>, %arg5: memref<3x32x32xf32, #tpu.memory_space<vmem>>, %arg6: memref<3x32x32xf32, #tpu.memory_space<vmem>>, %arg7: memref<3x1x32xf32, #tpu.memory_space<vmem>>, %arg8: memref<1x32xf32, #tpu.memory_space<vmem>>, %arg9: memref<32x16xf32, #tpu.memory_space<vmem>>, %arg10: memref<1x16xf32, #tpu.memory_space<vmem>>, %arg11: memref<2x16xf32, #tpu.memory_space<vmem>>) attributes {dimension_semantics = [], scalar_prefetch = 0 : i64, scratch_operands = 0 : i64, tpu.core_type = #tpu.core_type<tc>} {
    %c0 = arith.constant 0 : index
    %c0_0 = arith.constant 0 : index
    %c0_1 = arith.constant 0 : index
    %0 = vector.load %arg2[%c0, %c0_0, %c0_1] : memref<3x32x32xf32, #tpu.memory_space<vmem>>, vector<1x32x32xf32>
    %1 = vector.shape_cast %0 : vector<1x32x32xf32> to vector<32x32xf32>
    %c1 = arith.constant 1 : index
    %c0_2 = arith.constant 0 : index
    %c0_3 = arith.constant 0 : index
    %2 = vector.load %arg2[%c1, %c0_2, %c0_3] : memref<3x32x32xf32, #tpu.memory_space<vmem>>, vector<1x32x32xf32>
    %3 = vector.shape_cast %2 : vector<1x32x32xf32> to vector<32x32xf32>
    %c2 = arith.constant 2 : index
    %c0_4 = arith.constant 0 : index
    %c0_5 = arith.constant 0 : index
    %4 = vector.load %arg2[%c2, %c0_4, %c0_5] : memref<3x32x32xf32, #tpu.memory_space<vmem>>, vector<1x32x32xf32>
    %5 = vector.shape_cast %4 : vector<1x32x32xf32> to vector<32x32xf32>
    %c0_6 = arith.constant 0 : index
    %c0_7 = arith.constant 0 : index
    %c0_8 = arith.constant 0 : index
    %6 = vector.load %arg5[%c0_6, %c0_7, %c0_8] : memref<3x32x32xf32, #tpu.memory_space<vmem>>, vector<1x32x32xf32>
    %7 = vector.shape_cast %6 : vector<1x32x32xf32> to vector<32x32xf32>
    %c1_9 = arith.constant 1 : index
    %c0_10 = arith.constant 0 : index
    %c0_11 = arith.constant 0 : index
    %8 = vector.load %arg5[%c1_9, %c0_10, %c0_11] : memref<3x32x32xf32, #tpu.memory_space<vmem>>, vector<1x32x32xf32>
    %9 = vector.shape_cast %8 : vector<1x32x32xf32> to vector<32x32xf32>
    %c2_12 = arith.constant 2 : index
    %c0_13 = arith.constant 0 : index
    %c0_14 = arith.constant 0 : index
    %10 = vector.load %arg5[%c2_12, %c0_13, %c0_14] : memref<3x32x32xf32, #tpu.memory_space<vmem>>, vector<1x32x32xf32>
    %11 = vector.shape_cast %10 : vector<1x32x32xf32> to vector<32x32xf32>
    %c0_15 = arith.constant 0 : index
    %c0_16 = arith.constant 0 : index
    %c0_17 = arith.constant 0 : index
    %12 = vector.load %arg6[%c0_15, %c0_16, %c0_17] : memref<3x32x32xf32, #tpu.memory_space<vmem>>, vector<1x32x32xf32>
    %13 = vector.shape_cast %12 : vector<1x32x32xf32> to vector<32x32xf32>
    %c1_18 = arith.constant 1 : index
    %c0_19 = arith.constant 0 : index
    %c0_20 = arith.constant 0 : index
    %14 = vector.load %arg6[%c1_18, %c0_19, %c0_20] : memref<3x32x32xf32, #tpu.memory_space<vmem>>, vector<1x32x32xf32>
    %15 = vector.shape_cast %14 : vector<1x32x32xf32> to vector<32x32xf32>
    %c2_21 = arith.constant 2 : index
    %c0_22 = arith.constant 0 : index
    %c0_23 = arith.constant 0 : index
    %16 = vector.load %arg6[%c2_21, %c0_22, %c0_23] : memref<3x32x32xf32, #tpu.memory_space<vmem>>, vector<1x32x32xf32>
    %17 = vector.shape_cast %16 : vector<1x32x32xf32> to vector<32x32xf32>
    %c0_24 = arith.constant 0 : index
    %c0_25 = arith.constant 0 : index
    %c0_26 = arith.constant 0 : index
    %18 = vector.load %arg0[%c0_24, %c0_25, %c0_26] : memref<2x8x8xf32, #tpu.memory_space<vmem>>, vector<2x8x8xf32>
    %19 = vector.shape_cast %18 : vector<2x8x8xf32> to vector<16x8xf32>
    %c0_27 = arith.constant 0 : index
    %c0_28 = arith.constant 0 : index
    %c0_29 = arith.constant 0 : index
    %20 = vector.load %arg1[%c0_27, %c0_28, %c0_29] : memref<3x8x32xf32, #tpu.memory_space<vmem>>, vector<1x8x32xf32>
    %21 = vector.shape_cast %20 : vector<1x8x32xf32> to vector<8x32xf32>
    %cst = arith.constant dense<0.000000e+00> : vector<16x32xf32>
    %22 = tpu.matmul %19, %21, %cst {dimension_numbers = #tpu.dot_dimension_numbers<[1], [0], [0], [1], [0, 0, 1, 1], [], []>} : vector<16x8xf32>, vector<8x32xf32>, vector<16x32xf32> -> vector<16x32xf32>
    %c0_30 = arith.constant 0 : index
    %c0_31 = arith.constant 0 : index
    %c0_32 = arith.constant 0 : index
    %23 = vector.load %arg3[%c0_30, %c0_31, %c0_32] : memref<3x1x32xf32, #tpu.memory_space<vmem>>, vector<1x1x32xf32>
    %24 = vector.shape_cast %23 : vector<1x1x32xf32> to vector<1x32xf32>
    %25 = vector.broadcast %24 : vector<1x32xf32> to vector<16x32xf32>
    %26 = arith.addf %22, %25 : vector<16x32xf32>
    %27 = vector.shape_cast %26 : vector<16x32xf32> to vector<2x8x32xf32>
    %c1_33 = arith.constant 1 : index
    %c0_34 = arith.constant 0 : index
    %c0_35 = arith.constant 0 : index
    %28 = vector.load %arg1[%c1_33, %c0_34, %c0_35] : memref<3x8x32xf32, #tpu.memory_space<vmem>>, vector<1x8x32xf32>
    %29 = vector.shape_cast %28 : vector<1x8x32xf32> to vector<8x32xf32>
    %cst_36 = arith.constant dense<0.000000e+00> : vector<16x32xf32>
    %30 = tpu.matmul %19, %29, %cst_36 {dimension_numbers = #tpu.dot_dimension_numbers<[1], [0], [0], [1], [0, 0, 1, 1], [], []>} : vector<16x8xf32>, vector<8x32xf32>, vector<16x32xf32> -> vector<16x32xf32>
    %c1_37 = arith.constant 1 : index
    %c0_38 = arith.constant 0 : index
    %c0_39 = arith.constant 0 : index
    %31 = vector.load %arg3[%c1_37, %c0_38, %c0_39] : memref<3x1x32xf32, #tpu.memory_space<vmem>>, vector<1x1x32xf32>
    %32 = vector.shape_cast %31 : vector<1x1x32xf32> to vector<1x32xf32>
    %33 = vector.broadcast %32 : vector<1x32xf32> to vector<16x32xf32>
    %34 = arith.addf %30, %33 : vector<16x32xf32>
    %35 = vector.shape_cast %34 : vector<16x32xf32> to vector<2x8x32xf32>
    %c2_40 = arith.constant 2 : index
    %c0_41 = arith.constant 0 : index
    %c0_42 = arith.constant 0 : index
    %36 = vector.load %arg1[%c2_40, %c0_41, %c0_42] : memref<3x8x32xf32, #tpu.memory_space<vmem>>, vector<1x8x32xf32>
    %37 = vector.shape_cast %36 : vector<1x8x32xf32> to vector<8x32xf32>
    %cst_43 = arith.constant dense<0.000000e+00> : vector<16x32xf32>
    %38 = tpu.matmul %19, %37, %cst_43 {dimension_numbers = #tpu.dot_dimension_numbers<[1], [0], [0], [1], [0, 0, 1, 1], [], []>} : vector<16x8xf32>, vector<8x32xf32>, vector<16x32xf32> -> vector<16x32xf32>
    %c2_44 = arith.constant 2 : index
    %c0_45 = arith.constant 0 : index
    %c0_46 = arith.constant 0 : index
    %39 = vector.load %arg3[%c2_44, %c0_45, %c0_46] : memref<3x1x32xf32, #tpu.memory_space<vmem>>, vector<1x1x32xf32>
    %40 = vector.shape_cast %39 : vector<1x1x32xf32> to vector<1x32xf32>
    %41 = vector.broadcast %40 : vector<1x32xf32> to vector<16x32xf32>
    %42 = arith.addf %38, %41 : vector<16x32xf32>
    %43 = vector.shape_cast %42 : vector<16x32xf32> to vector<2x8x32xf32>
    %c0_47 = arith.constant 0 : index
    %c0_48 = arith.constant 0 : index
    %44 = vector.load %arg4[%c0_47, %c0_48] : memref<1x32xf32, #tpu.memory_space<vmem>>, vector<1x32xf32>
    %45 = vector.shape_cast %44 : vector<1x32xf32> to vector<1x32xf32>
    %46 = vector.broadcast %45 : vector<1x32xf32> to vector<2x32xf32>
    %c0_49 = arith.constant 0 : index
    %c0_50 = arith.constant 0 : index
    %c0_51 = arith.constant 0 : index
    %47 = vector.load %arg7[%c0_49, %c0_50, %c0_51] : memref<3x1x32xf32, #tpu.memory_space<vmem>>, vector<1x1x32xf32>
    %48 = vector.shape_cast %47 : vector<1x1x32xf32> to vector<1x32xf32>
    %49 = vector.shape_cast %48 : vector<1x32xf32> to vector<1x32xf32>
    %50 = vector.broadcast %49 : vector<1x32xf32> to vector<2x32xf32>
    %c1_52 = arith.constant 1 : index
    %c0_53 = arith.constant 0 : index
    %c0_54 = arith.constant 0 : index
    %51 = vector.load %arg7[%c1_52, %c0_53, %c0_54] : memref<3x1x32xf32, #tpu.memory_space<vmem>>, vector<1x1x32xf32>
    %52 = vector.shape_cast %51 : vector<1x1x32xf32> to vector<1x32xf32>
    %53 = vector.shape_cast %52 : vector<1x32xf32> to vector<1x32xf32>
    %54 = vector.broadcast %53 : vector<1x32xf32> to vector<2x32xf32>
    %c2_55 = arith.constant 2 : index
    %c0_56 = arith.constant 0 : index
    %c0_57 = arith.constant 0 : index
    %55 = vector.load %arg7[%c2_55, %c0_56, %c0_57] : memref<3x1x32xf32, #tpu.memory_space<vmem>>, vector<1x1x32xf32>
    %56 = vector.shape_cast %55 : vector<1x1x32xf32> to vector<1x32xf32>
    %57 = vector.shape_cast %56 : vector<1x32xf32> to vector<1x32xf32>
    %58 = vector.broadcast %57 : vector<1x32xf32> to vector<2x32xf32>
    %c0_58 = arith.constant 0 : index
    %c0_59 = arith.constant 0 : index
    %59 = vector.load %arg8[%c0_58, %c0_59] : memref<1x32xf32, #tpu.memory_space<vmem>>, vector<1x32xf32>
    %60 = vector.shape_cast %59 : vector<1x32xf32> to vector<1x32xf32>
    %61 = vector.broadcast %60 : vector<1x32xf32> to vector<2x32xf32>
    %cst_60 = arith.constant 0.000000e+00 : f32
    %62 = vector.broadcast %cst_60 : f32 to vector<2x32xf32>
    %cst_61 = arith.constant 0.000000e+00 : f32
    %63 = vector.broadcast %cst_61 : f32 to vector<2x32xf32>
    %cst_62 = arith.constant dense<0.000000e+00> : vector<2x32xf32>
    %64 = tpu.matmul %62, %1, %cst_62 {dimension_numbers = #tpu.dot_dimension_numbers<[1], [0], [0], [1], [0, 0, 1, 1], [], []>} : vector<2x32xf32>, vector<32x32xf32>, vector<2x32xf32> -> vector<2x32xf32>
    %cst_63 = arith.constant dense<0.000000e+00> : vector<2x32xf32>
    %65 = tpu.matmul %62, %3, %cst_63 {dimension_numbers = #tpu.dot_dimension_numbers<[1], [0], [0], [1], [0, 0, 1, 1], [], []>} : vector<2x32xf32>, vector<32x32xf32>, vector<2x32xf32> -> vector<2x32xf32>
    %cst_64 = arith.constant dense<0.000000e+00> : vector<2x32xf32>
    %66 = tpu.matmul %62, %5, %cst_64 {dimension_numbers = #tpu.dot_dimension_numbers<[1], [0], [0], [1], [0, 0, 1, 1], [], []>} : vector<2x32xf32>, vector<32x32xf32>, vector<2x32xf32> -> vector<2x32xf32>
    %67 = vector.extract_strided_slice %27 {offsets = [0, 7, 0], sizes = [2, 1, 32], strides = [1, 1, 1]} : vector<2x8x32xf32> to vector<2x1x32xf32>
    %68 = vector.shape_cast %67 : vector<2x1x32xf32> to vector<2x32xf32>
    %69 = arith.addf %68, %64 : vector<2x32xf32>
    %70 = arith.negf %69 : vector<2x32xf32>
    %71 = math.exp %70 : vector<2x32xf32>
    %cst_65 = arith.constant 1.000000e+00 : f32
    %72 = vector.broadcast %cst_65 : f32 to vector<2x32xf32>
    %73 = arith.addf %72, %71 : vector<2x32xf32>
    %74 = arith.divf %72, %73 : vector<2x32xf32>
    %75 = vector.extract_strided_slice %35 {offsets = [0, 7, 0], sizes = [2, 1, 32], strides = [1, 1, 1]} : vector<2x8x32xf32> to vector<2x1x32xf32>
    %76 = vector.shape_cast %75 : vector<2x1x32xf32> to vector<2x32xf32>
    %77 = arith.addf %76, %65 : vector<2x32xf32>
    %78 = arith.negf %77 : vector<2x32xf32>
    %79 = math.exp %78 : vector<2x32xf32>
    %cst_66 = arith.constant 1.000000e+00 : f32
    %80 = vector.broadcast %cst_66 : f32 to vector<2x32xf32>
    %81 = arith.addf %80, %79 : vector<2x32xf32>
    %82 = arith.divf %80, %81 : vector<2x32xf32>
    %83 = vector.extract_strided_slice %43 {offsets = [0, 7, 0], sizes = [2, 1, 32], strides = [1, 1, 1]} : vector<2x8x32xf32> to vector<2x1x32xf32>
    %84 = vector.shape_cast %83 : vector<2x1x32xf32> to vector<2x32xf32>
    %85 = arith.addf %66, %46 : vector<2x32xf32>
    %86 = arith.mulf %74, %85 : vector<2x32xf32>
    %87 = arith.addf %84, %86 : vector<2x32xf32>
    %88 = math.tanh %87 : vector<2x32xf32>
    %cst_67 = arith.constant 1.000000e+00 : f32
    %89 = vector.broadcast %cst_67 : f32 to vector<2x32xf32>
    %90 = arith.subf %89, %82 : vector<2x32xf32>
    %91 = arith.mulf %90, %88 : vector<2x32xf32>
    %92 = arith.mulf %82, %62 : vector<2x32xf32>
    %93 = arith.addf %91, %92 : vector<2x32xf32>
    %cst_68 = arith.constant dense<0.000000e+00> : vector<2x32xf32>
    %94 = tpu.matmul %93, %7, %cst_68 {dimension_numbers = #tpu.dot_dimension_numbers<[1], [0], [0], [1], [0, 0, 1, 1], [], []>} : vector<2x32xf32>, vector<32x32xf32>, vector<2x32xf32> -> vector<2x32xf32>
    %cst_69 = arith.constant dense<0.000000e+00> : vector<2x32xf32>
    %95 = tpu.matmul %93, %9, %cst_69 {dimension_numbers = #tpu.dot_dimension_numbers<[1], [0], [0], [1], [0, 0, 1, 1], [], []>} : vector<2x32xf32>, vector<32x32xf32>, vector<2x32xf32> -> vector<2x32xf32>
    %cst_70 = arith.constant dense<0.000000e+00> : vector<2x32xf32>
    %96 = tpu.matmul %93, %11, %cst_70 {dimension_numbers = #tpu.dot_dimension_numbers<[1], [0], [0], [1], [0, 0, 1, 1], [], []>} : vector<2x32xf32>, vector<32x32xf32>, vector<2x32xf32> -> vector<2x32xf32>
    %cst_71 = arith.constant dense<0.000000e+00> : vector<2x32xf32>
    %97 = tpu.matmul %63, %13, %cst_71 {dimension_numbers = #tpu.dot_dimension_numbers<[1], [0], [0], [1], [0, 0, 1, 1], [], []>} : vector<2x32xf32>, vector<32x32xf32>, vector<2x32xf32> -> vector<2x32xf32>
    %cst_72 = arith.constant dense<0.000000e+00> : vector<2x32xf32>
    %98 = tpu.matmul %63, %15, %cst_72 {dimension_numbers = #tpu.dot_dimension_numbers<[1], [0], [0], [1], [0, 0, 1, 1], [], []>} : vector<2x32xf32>, vector<32x32xf32>, vector<2x32xf32> -> vector<2x32xf32>
    %cst_73 = arith.constant dense<0.000000e+00> : vector<2x32xf32>
    %99 = tpu.matmul %63, %17, %cst_73 {dimension_numbers = #tpu.dot_dimension_numbers<[1], [0], [0], [1], [0, 0, 1, 1], [], []>} : vector<2x32xf32>, vector<32x32xf32>, vector<2x32xf32> -> vector<2x32xf32>
    %100 = arith.addf %94, %97 : vector<2x32xf32>
    %101 = arith.addf %100, %50 : vector<2x32xf32>
    %102 = arith.negf %101 : vector<2x32xf32>
    %103 = math.exp %102 : vector<2x32xf32>
    %cst_74 = arith.constant 1.000000e+00 : f32
    %104 = vector.broadcast %cst_74 : f32 to vector<2x32xf32>
    %105 = arith.addf %104, %103 : vector<2x32xf32>
    %106 = arith.divf %104, %105 : vector<2x32xf32>
    %107 = arith.addf %95, %98 : vector<2x32xf32>
    %108 = arith.addf %107, %54 : vector<2x32xf32>
    %109 = arith.negf %108 : vector<2x32xf32>
    %110 = math.exp %109 : vector<2x32xf32>
    %cst_75 = arith.constant 1.000000e+00 : f32
    %111 = vector.broadcast %cst_75 : f32 to vector<2x32xf32>
    %112 = arith.addf %111, %110 : vector<2x32xf32>
    %113 = arith.divf %111, %112 : vector<2x32xf32>
    %114 = arith.addf %96, %58 : vector<2x32xf32>
    %115 = arith.addf %99, %61 : vector<2x32xf32>
    %116 = arith.mulf %106, %115 : vector<2x32xf32>
    %117 = arith.addf %114, %116 : vector<2x32xf32>
    %118 = math.tanh %117 : vector<2x32xf32>
    %cst_76 = arith.constant 1.000000e+00 : f32
    %119 = vector.broadcast %cst_76 : f32 to vector<2x32xf32>
    %120 = arith.subf %119, %113 : vector<2x32xf32>
    %121 = arith.mulf %120, %118 : vector<2x32xf32>
    %122 = arith.mulf %113, %63 : vector<2x32xf32>
    %123 = arith.addf %121, %122 : vector<2x32xf32>
    %cst_77 = arith.constant dense<0.000000e+00> : vector<2x32xf32>
    %124 = tpu.matmul %93, %1, %cst_77 {dimension_numbers = #tpu.dot_dimension_numbers<[1], [0], [0], [1], [0, 0, 1, 1], [], []>} : vector<2x32xf32>, vector<32x32xf32>, vector<2x32xf32> -> vector<2x32xf32>
    %cst_78 = arith.constant dense<0.000000e+00> : vector<2x32xf32>
    %125 = tpu.matmul %93, %3, %cst_78 {dimension_numbers = #tpu.dot_dimension_numbers<[1], [0], [0], [1], [0, 0, 1, 1], [], []>} : vector<2x32xf32>, vector<32x32xf32>, vector<2x32xf32> -> vector<2x32xf32>
    %cst_79 = arith.constant dense<0.000000e+00> : vector<2x32xf32>
    %126 = tpu.matmul %93, %5, %cst_79 {dimension_numbers = #tpu.dot_dimension_numbers<[1], [0], [0], [1], [0, 0, 1, 1], [], []>} : vector<2x32xf32>, vector<32x32xf32>, vector<2x32xf32> -> vector<2x32xf32>
    %127 = vector.extract_strided_slice %27 {offsets = [0, 6, 0], sizes = [2, 1, 32], strides = [1, 1, 1]} : vector<2x8x32xf32> to vector<2x1x32xf32>
    %128 = vector.shape_cast %127 : vector<2x1x32xf32> to vector<2x32xf32>
    %129 = arith.addf %128, %124 : vector<2x32xf32>
    %130 = arith.negf %129 : vector<2x32xf32>
    %131 = math.exp %130 : vector<2x32xf32>
    %cst_80 = arith.constant 1.000000e+00 : f32
    %132 = vector.broadcast %cst_80 : f32 to vector<2x32xf32>
    %133 = arith.addf %132, %131 : vector<2x32xf32>
    %134 = arith.divf %132, %133 : vector<2x32xf32>
    %135 = vector.extract_strided_slice %35 {offsets = [0, 6, 0], sizes = [2, 1, 32], strides = [1, 1, 1]} : vector<2x8x32xf32> to vector<2x1x32xf32>
    %136 = vector.shape_cast %135 : vector<2x1x32xf32> to vector<2x32xf32>
    %137 = arith.addf %136, %125 : vector<2x32xf32>
    %138 = arith.negf %137 : vector<2x32xf32>
    %139 = math.exp %138 : vector<2x32xf32>
    %cst_81 = arith.constant 1.000000e+00 : f32
    %140 = vector.broadcast %cst_81 : f32 to vector<2x32xf32>
    %141 = arith.addf %140, %139 : vector<2x32xf32>
    %142 = arith.divf %140, %141 : vector<2x32xf32>
    %143 = vector.extract_strided_slice %43 {offsets = [0, 6, 0], sizes = [2, 1, 32], strides = [1, 1, 1]} : vector<2x8x32xf32> to vector<2x1x32xf32>
    %144 = vector.shape_cast %143 : vector<2x1x32xf32> to vector<2x32xf32>
    %145 = arith.addf %126, %46 : vector<2x32xf32>
    %146 = arith.mulf %134, %145 : vector<2x32xf32>
    %147 = arith.addf %144, %146 : vector<2x32xf32>
    %148 = math.tanh %147 : vector<2x32xf32>
    %cst_82 = arith.constant 1.000000e+00 : f32
    %149 = vector.broadcast %cst_82 : f32 to vector<2x32xf32>
    %150 = arith.subf %149, %142 : vector<2x32xf32>
    %151 = arith.mulf %150, %148 : vector<2x32xf32>
    %152 = arith.mulf %142, %93 : vector<2x32xf32>
    %153 = arith.addf %151, %152 : vector<2x32xf32>
    %cst_83 = arith.constant dense<0.000000e+00> : vector<2x32xf32>
    %154 = tpu.matmul %153, %7, %cst_83 {dimension_numbers = #tpu.dot_dimension_numbers<[1], [0], [0], [1], [0, 0, 1, 1], [], []>} : vector<2x32xf32>, vector<32x32xf32>, vector<2x32xf32> -> vector<2x32xf32>
    %cst_84 = arith.constant dense<0.000000e+00> : vector<2x32xf32>
    %155 = tpu.matmul %153, %9, %cst_84 {dimension_numbers = #tpu.dot_dimension_numbers<[1], [0], [0], [1], [0, 0, 1, 1], [], []>} : vector<2x32xf32>, vector<32x32xf32>, vector<2x32xf32> -> vector<2x32xf32>
    %cst_85 = arith.constant dense<0.000000e+00> : vector<2x32xf32>
    %156 = tpu.matmul %153, %11, %cst_85 {dimension_numbers = #tpu.dot_dimension_numbers<[1], [0], [0], [1], [0, 0, 1, 1], [], []>} : vector<2x32xf32>, vector<32x32xf32>, vector<2x32xf32> -> vector<2x32xf32>
    %cst_86 = arith.constant dense<0.000000e+00> : vector<2x32xf32>
    %157 = tpu.matmul %123, %13, %cst_86 {dimension_numbers = #tpu.dot_dimension_numbers<[1], [0], [0], [1], [0, 0, 1, 1], [], []>} : vector<2x32xf32>, vector<32x32xf32>, vector<2x32xf32> -> vector<2x32xf32>
    %cst_87 = arith.constant dense<0.000000e+00> : vector<2x32xf32>
    %158 = tpu.matmul %123, %15, %cst_87 {dimension_numbers = #tpu.dot_dimension_numbers<[1], [0], [0], [1], [0, 0, 1, 1], [], []>} : vector<2x32xf32>, vector<32x32xf32>, vector<2x32xf32> -> vector<2x32xf32>
    %cst_88 = arith.constant dense<0.000000e+00> : vector<2x32xf32>
    %159 = tpu.matmul %123, %17, %cst_88 {dimension_numbers = #tpu.dot_dimension_numbers<[1], [0], [0], [1], [0, 0, 1, 1], [], []>} : vector<2x32xf32>, vector<32x32xf32>, vector<2x32xf32> -> vector<2x32xf32>
    %160 = arith.addf %154, %157 : vector<2x32xf32>
    %161 = arith.addf %160, %50 : vector<2x32xf32>
    %162 = arith.negf %161 : vector<2x32xf32>
    %163 = math.exp %162 : vector<2x32xf32>
    %cst_89 = arith.constant 1.000000e+00 : f32
    %164 = vector.broadcast %cst_89 : f32 to vector<2x32xf32>
    %165 = arith.addf %164, %163 : vector<2x32xf32>
    %166 = arith.divf %164, %165 : vector<2x32xf32>
    %167 = arith.addf %155, %158 : vector<2x32xf32>
    %168 = arith.addf %167, %54 : vector<2x32xf32>
    %169 = arith.negf %168 : vector<2x32xf32>
    %170 = math.exp %169 : vector<2x32xf32>
    %cst_90 = arith.constant 1.000000e+00 : f32
    %171 = vector.broadcast %cst_90 : f32 to vector<2x32xf32>
    %172 = arith.addf %171, %170 : vector<2x32xf32>
    %173 = arith.divf %171, %172 : vector<2x32xf32>
    %174 = arith.addf %156, %58 : vector<2x32xf32>
    %175 = arith.addf %159, %61 : vector<2x32xf32>
    %176 = arith.mulf %166, %175 : vector<2x32xf32>
    %177 = arith.addf %174, %176 : vector<2x32xf32>
    %178 = math.tanh %177 : vector<2x32xf32>
    %cst_91 = arith.constant 1.000000e+00 : f32
    %179 = vector.broadcast %cst_91 : f32 to vector<2x32xf32>
    %180 = arith.subf %179, %173 : vector<2x32xf32>
    %181 = arith.mulf %180, %178 : vector<2x32xf32>
    %182 = arith.mulf %173, %123 : vector<2x32xf32>
    %183 = arith.addf %181, %182 : vector<2x32xf32>
    %cst_92 = arith.constant dense<0.000000e+00> : vector<2x32xf32>
    %184 = tpu.matmul %153, %1, %cst_92 {dimension_numbers = #tpu.dot_dimension_numbers<[1], [0], [0], [1], [0, 0, 1, 1], [], []>} : vector<2x32xf32>, vector<32x32xf32>, vector<2x32xf32> -> vector<2x32xf32>
    %cst_93 = arith.constant dense<0.000000e+00> : vector<2x32xf32>
    %185 = tpu.matmul %153, %3, %cst_93 {dimension_numbers = #tpu.dot_dimension_numbers<[1], [0], [0], [1], [0, 0, 1, 1], [], []>} : vector<2x32xf32>, vector<32x32xf32>, vector<2x32xf32> -> vector<2x32xf32>
    %cst_94 = arith.constant dense<0.000000e+00> : vector<2x32xf32>
    %186 = tpu.matmul %153, %5, %cst_94 {dimension_numbers = #tpu.dot_dimension_numbers<[1], [0], [0], [1], [0, 0, 1, 1], [], []>} : vector<2x32xf32>, vector<32x32xf32>, vector<2x32xf32> -> vector<2x32xf32>
    %187 = vector.extract_strided_slice %27 {offsets = [0, 5, 0], sizes = [2, 1, 32], strides = [1, 1, 1]} : vector<2x8x32xf32> to vector<2x1x32xf32>
    %188 = vector.shape_cast %187 : vector<2x1x32xf32> to vector<2x32xf32>
    %189 = arith.addf %188, %184 : vector<2x32xf32>
    %190 = arith.negf %189 : vector<2x32xf32>
    %191 = math.exp %190 : vector<2x32xf32>
    %cst_95 = arith.constant 1.000000e+00 : f32
    %192 = vector.broadcast %cst_95 : f32 to vector<2x32xf32>
    %193 = arith.addf %192, %191 : vector<2x32xf32>
    %194 = arith.divf %192, %193 : vector<2x32xf32>
    %195 = vector.extract_strided_slice %35 {offsets = [0, 5, 0], sizes = [2, 1, 32], strides = [1, 1, 1]} : vector<2x8x32xf32> to vector<2x1x32xf32>
    %196 = vector.shape_cast %195 : vector<2x1x32xf32> to vector<2x32xf32>
    %197 = arith.addf %196, %185 : vector<2x32xf32>
    %198 = arith.negf %197 : vector<2x32xf32>
    %199 = math.exp %198 : vector<2x32xf32>
    %cst_96 = arith.constant 1.000000e+00 : f32
    %200 = vector.broadcast %cst_96 : f32 to vector<2x32xf32>
    %201 = arith.addf %200, %199 : vector<2x32xf32>
    %202 = arith.divf %200, %201 : vector<2x32xf32>
    %203 = vector.extract_strided_slice %43 {offsets = [0, 5, 0], sizes = [2, 1, 32], strides = [1, 1, 1]} : vector<2x8x32xf32> to vector<2x1x32xf32>
    %204 = vector.shape_cast %203 : vector<2x1x32xf32> to vector<2x32xf32>
    %205 = arith.addf %186, %46 : vector<2x32xf32>
    %206 = arith.mulf %194, %205 : vector<2x32xf32>
    %207 = arith.addf %204, %206 : vector<2x32xf32>
    %208 = math.tanh %207 : vector<2x32xf32>
    %cst_97 = arith.constant 1.000000e+00 : f32
    %209 = vector.broadcast %cst_97 : f32 to vector<2x32xf32>
    %210 = arith.subf %209, %202 : vector<2x32xf32>
    %211 = arith.mulf %210, %208 : vector<2x32xf32>
    %212 = arith.mulf %202, %153 : vector<2x32xf32>
    %213 = arith.addf %211, %212 : vector<2x32xf32>
    %cst_98 = arith.constant dense<0.000000e+00> : vector<2x32xf32>
    %214 = tpu.matmul %213, %7, %cst_98 {dimension_numbers = #tpu.dot_dimension_numbers<[1], [0], [0], [1], [0, 0, 1, 1], [], []>} : vector<2x32xf32>, vector<32x32xf32>, vector<2x32xf32> -> vector<2x32xf32>
    %cst_99 = arith.constant dense<0.000000e+00> : vector<2x32xf32>
    %215 = tpu.matmul %213, %9, %cst_99 {dimension_numbers = #tpu.dot_dimension_numbers<[1], [0], [0], [1], [0, 0, 1, 1], [], []>} : vector<2x32xf32>, vector<32x32xf32>, vector<2x32xf32> -> vector<2x32xf32>
    %cst_100 = arith.constant dense<0.000000e+00> : vector<2x32xf32>
    %216 = tpu.matmul %213, %11, %cst_100 {dimension_numbers = #tpu.dot_dimension_numbers<[1], [0], [0], [1], [0, 0, 1, 1], [], []>} : vector<2x32xf32>, vector<32x32xf32>, vector<2x32xf32> -> vector<2x32xf32>
    %cst_101 = arith.constant dense<0.000000e+00> : vector<2x32xf32>
    %217 = tpu.matmul %183, %13, %cst_101 {dimension_numbers = #tpu.dot_dimension_numbers<[1], [0], [0], [1], [0, 0, 1, 1], [], []>} : vector<2x32xf32>, vector<32x32xf32>, vector<2x32xf32> -> vector<2x32xf32>
    %cst_102 = arith.constant dense<0.000000e+00> : vector<2x32xf32>
    %218 = tpu.matmul %183, %15, %cst_102 {dimension_numbers = #tpu.dot_dimension_numbers<[1], [0], [0], [1], [0, 0, 1, 1], [], []>} : vector<2x32xf32>, vector<32x32xf32>, vector<2x32xf32> -> vector<2x32xf32>
    %cst_103 = arith.constant dense<0.000000e+00> : vector<2x32xf32>
    %219 = tpu.matmul %183, %17, %cst_103 {dimension_numbers = #tpu.dot_dimension_numbers<[1], [0], [0], [1], [0, 0, 1, 1], [], []>} : vector<2x32xf32>, vector<32x32xf32>, vector<2x32xf32> -> vector<2x32xf32>
    %220 = arith.addf %214, %217 : vector<2x32xf32>
    %221 = arith.addf %220, %50 : vector<2x32xf32>
    %222 = arith.negf %221 : vector<2x32xf32>
    %223 = math.exp %222 : vector<2x32xf32>
    %cst_104 = arith.constant 1.000000e+00 : f32
    %224 = vector.broadcast %cst_104 : f32 to vector<2x32xf32>
    %225 = arith.addf %224, %223 : vector<2x32xf32>
    %226 = arith.divf %224, %225 : vector<2x32xf32>
    %227 = arith.addf %215, %218 : vector<2x32xf32>
    %228 = arith.addf %227, %54 : vector<2x32xf32>
    %229 = arith.negf %228 : vector<2x32xf32>
    %230 = math.exp %229 : vector<2x32xf32>
    %cst_105 = arith.constant 1.000000e+00 : f32
    %231 = vector.broadcast %cst_105 : f32 to vector<2x32xf32>
    %232 = arith.addf %231, %230 : vector<2x32xf32>
    %233 = arith.divf %231, %232 : vector<2x32xf32>
    %234 = arith.addf %216, %58 : vector<2x32xf32>
    %235 = arith.addf %219, %61 : vector<2x32xf32>
    %236 = arith.mulf %226, %235 : vector<2x32xf32>
    %237 = arith.addf %234, %236 : vector<2x32xf32>
    %238 = math.tanh %237 : vector<2x32xf32>
    %cst_106 = arith.constant 1.000000e+00 : f32
    %239 = vector.broadcast %cst_106 : f32 to vector<2x32xf32>
    %240 = arith.subf %239, %233 : vector<2x32xf32>
    %241 = arith.mulf %240, %238 : vector<2x32xf32>
    %242 = arith.mulf %233, %183 : vector<2x32xf32>
    %243 = arith.addf %241, %242 : vector<2x32xf32>
    %cst_107 = arith.constant dense<0.000000e+00> : vector<2x32xf32>
    %244 = tpu.matmul %213, %1, %cst_107 {dimension_numbers = #tpu.dot_dimension_numbers<[1], [0], [0], [1], [0, 0, 1, 1], [], []>} : vector<2x32xf32>, vector<32x32xf32>, vector<2x32xf32> -> vector<2x32xf32>
    %cst_108 = arith.constant dense<0.000000e+00> : vector<2x32xf32>
    %245 = tpu.matmul %213, %3, %cst_108 {dimension_numbers = #tpu.dot_dimension_numbers<[1], [0], [0], [1], [0, 0, 1, 1], [], []>} : vector<2x32xf32>, vector<32x32xf32>, vector<2x32xf32> -> vector<2x32xf32>
    %cst_109 = arith.constant dense<0.000000e+00> : vector<2x32xf32>
    %246 = tpu.matmul %213, %5, %cst_109 {dimension_numbers = #tpu.dot_dimension_numbers<[1], [0], [0], [1], [0, 0, 1, 1], [], []>} : vector<2x32xf32>, vector<32x32xf32>, vector<2x32xf32> -> vector<2x32xf32>
    %247 = vector.extract_strided_slice %27 {offsets = [0, 4, 0], sizes = [2, 1, 32], strides = [1, 1, 1]} : vector<2x8x32xf32> to vector<2x1x32xf32>
    %248 = vector.shape_cast %247 : vector<2x1x32xf32> to vector<2x32xf32>
    %249 = arith.addf %248, %244 : vector<2x32xf32>
    %250 = arith.negf %249 : vector<2x32xf32>
    %251 = math.exp %250 : vector<2x32xf32>
    %cst_110 = arith.constant 1.000000e+00 : f32
    %252 = vector.broadcast %cst_110 : f32 to vector<2x32xf32>
    %253 = arith.addf %252, %251 : vector<2x32xf32>
    %254 = arith.divf %252, %253 : vector<2x32xf32>
    %255 = vector.extract_strided_slice %35 {offsets = [0, 4, 0], sizes = [2, 1, 32], strides = [1, 1, 1]} : vector<2x8x32xf32> to vector<2x1x32xf32>
    %256 = vector.shape_cast %255 : vector<2x1x32xf32> to vector<2x32xf32>
    %257 = arith.addf %256, %245 : vector<2x32xf32>
    %258 = arith.negf %257 : vector<2x32xf32>
    %259 = math.exp %258 : vector<2x32xf32>
    %cst_111 = arith.constant 1.000000e+00 : f32
    %260 = vector.broadcast %cst_111 : f32 to vector<2x32xf32>
    %261 = arith.addf %260, %259 : vector<2x32xf32>
    %262 = arith.divf %260, %261 : vector<2x32xf32>
    %263 = vector.extract_strided_slice %43 {offsets = [0, 4, 0], sizes = [2, 1, 32], strides = [1, 1, 1]} : vector<2x8x32xf32> to vector<2x1x32xf32>
    %264 = vector.shape_cast %263 : vector<2x1x32xf32> to vector<2x32xf32>
    %265 = arith.addf %246, %46 : vector<2x32xf32>
    %266 = arith.mulf %254, %265 : vector<2x32xf32>
    %267 = arith.addf %264, %266 : vector<2x32xf32>
    %268 = math.tanh %267 : vector<2x32xf32>
    %cst_112 = arith.constant 1.000000e+00 : f32
    %269 = vector.broadcast %cst_112 : f32 to vector<2x32xf32>
    %270 = arith.subf %269, %262 : vector<2x32xf32>
    %271 = arith.mulf %270, %268 : vector<2x32xf32>
    %272 = arith.mulf %262, %213 : vector<2x32xf32>
    %273 = arith.addf %271, %272 : vector<2x32xf32>
    %cst_113 = arith.constant dense<0.000000e+00> : vector<2x32xf32>
    %274 = tpu.matmul %273, %7, %cst_113 {dimension_numbers = #tpu.dot_dimension_numbers<[1], [0], [0], [1], [0, 0, 1, 1], [], []>} : vector<2x32xf32>, vector<32x32xf32>, vector<2x32xf32> -> vector<2x32xf32>
    %cst_114 = arith.constant dense<0.000000e+00> : vector<2x32xf32>
    %275 = tpu.matmul %273, %9, %cst_114 {dimension_numbers = #tpu.dot_dimension_numbers<[1], [0], [0], [1], [0, 0, 1, 1], [], []>} : vector<2x32xf32>, vector<32x32xf32>, vector<2x32xf32> -> vector<2x32xf32>
    %cst_115 = arith.constant dense<0.000000e+00> : vector<2x32xf32>
    %276 = tpu.matmul %273, %11, %cst_115 {dimension_numbers = #tpu.dot_dimension_numbers<[1], [0], [0], [1], [0, 0, 1, 1], [], []>} : vector<2x32xf32>, vector<32x32xf32>, vector<2x32xf32> -> vector<2x32xf32>
    %cst_116 = arith.constant dense<0.000000e+00> : vector<2x32xf32>
    %277 = tpu.matmul %243, %13, %cst_116 {dimension_numbers = #tpu.dot_dimension_numbers<[1], [0], [0], [1], [0, 0, 1, 1], [], []>} : vector<2x32xf32>, vector<32x32xf32>, vector<2x32xf32> -> vector<2x32xf32>
    %cst_117 = arith.constant dense<0.000000e+00> : vector<2x32xf32>
    %278 = tpu.matmul %243, %15, %cst_117 {dimension_numbers = #tpu.dot_dimension_numbers<[1], [0], [0], [1], [0, 0, 1, 1], [], []>} : vector<2x32xf32>, vector<32x32xf32>, vector<2x32xf32> -> vector<2x32xf32>
    %cst_118 = arith.constant dense<0.000000e+00> : vector<2x32xf32>
    %279 = tpu.matmul %243, %17, %cst_118 {dimension_numbers = #tpu.dot_dimension_numbers<[1], [0], [0], [1], [0, 0, 1, 1], [], []>} : vector<2x32xf32>, vector<32x32xf32>, vector<2x32xf32> -> vector<2x32xf32>
    %280 = arith.addf %274, %277 : vector<2x32xf32>
    %281 = arith.addf %280, %50 : vector<2x32xf32>
    %282 = arith.negf %281 : vector<2x32xf32>
    %283 = math.exp %282 : vector<2x32xf32>
    %cst_119 = arith.constant 1.000000e+00 : f32
    %284 = vector.broadcast %cst_119 : f32 to vector<2x32xf32>
    %285 = arith.addf %284, %283 : vector<2x32xf32>
    %286 = arith.divf %284, %285 : vector<2x32xf32>
    %287 = arith.addf %275, %278 : vector<2x32xf32>
    %288 = arith.addf %287, %54 : vector<2x32xf32>
    %289 = arith.negf %288 : vector<2x32xf32>
    %290 = math.exp %289 : vector<2x32xf32>
    %cst_120 = arith.constant 1.000000e+00 : f32
    %291 = vector.broadcast %cst_120 : f32 to vector<2x32xf32>
    %292 = arith.addf %291, %290 : vector<2x32xf32>
    %293 = arith.divf %291, %292 : vector<2x32xf32>
    %294 = arith.addf %276, %58 : vector<2x32xf32>
    %295 = arith.addf %279, %61 : vector<2x32xf32>
    %296 = arith.mulf %286, %295 : vector<2x32xf32>
    %297 = arith.addf %294, %296 : vector<2x32xf32>
    %298 = math.tanh %297 : vector<2x32xf32>
    %cst_121 = arith.constant 1.000000e+00 : f32
    %299 = vector.broadcast %cst_121 : f32 to vector<2x32xf32>
    %300 = arith.subf %299, %293 : vector<2x32xf32>
    %301 = arith.mulf %300, %298 : vector<2x32xf32>
    %302 = arith.mulf %293, %243 : vector<2x32xf32>
    %303 = arith.addf %301, %302 : vector<2x32xf32>
    %cst_122 = arith.constant dense<0.000000e+00> : vector<2x32xf32>
    %304 = tpu.matmul %273, %1, %cst_122 {dimension_numbers = #tpu.dot_dimension_numbers<[1], [0], [0], [1], [0, 0, 1, 1], [], []>} : vector<2x32xf32>, vector<32x32xf32>, vector<2x32xf32> -> vector<2x32xf32>
    %cst_123 = arith.constant dense<0.000000e+00> : vector<2x32xf32>
    %305 = tpu.matmul %273, %3, %cst_123 {dimension_numbers = #tpu.dot_dimension_numbers<[1], [0], [0], [1], [0, 0, 1, 1], [], []>} : vector<2x32xf32>, vector<32x32xf32>, vector<2x32xf32> -> vector<2x32xf32>
    %cst_124 = arith.constant dense<0.000000e+00> : vector<2x32xf32>
    %306 = tpu.matmul %273, %5, %cst_124 {dimension_numbers = #tpu.dot_dimension_numbers<[1], [0], [0], [1], [0, 0, 1, 1], [], []>} : vector<2x32xf32>, vector<32x32xf32>, vector<2x32xf32> -> vector<2x32xf32>
    %307 = vector.extract_strided_slice %27 {offsets = [0, 3, 0], sizes = [2, 1, 32], strides = [1, 1, 1]} : vector<2x8x32xf32> to vector<2x1x32xf32>
    %308 = vector.shape_cast %307 : vector<2x1x32xf32> to vector<2x32xf32>
    %309 = arith.addf %308, %304 : vector<2x32xf32>
    %310 = arith.negf %309 : vector<2x32xf32>
    %311 = math.exp %310 : vector<2x32xf32>
    %cst_125 = arith.constant 1.000000e+00 : f32
    %312 = vector.broadcast %cst_125 : f32 to vector<2x32xf32>
    %313 = arith.addf %312, %311 : vector<2x32xf32>
    %314 = arith.divf %312, %313 : vector<2x32xf32>
    %315 = vector.extract_strided_slice %35 {offsets = [0, 3, 0], sizes = [2, 1, 32], strides = [1, 1, 1]} : vector<2x8x32xf32> to vector<2x1x32xf32>
    %316 = vector.shape_cast %315 : vector<2x1x32xf32> to vector<2x32xf32>
    %317 = arith.addf %316, %305 : vector<2x32xf32>
    %318 = arith.negf %317 : vector<2x32xf32>
    %319 = math.exp %318 : vector<2x32xf32>
    %cst_126 = arith.constant 1.000000e+00 : f32
    %320 = vector.broadcast %cst_126 : f32 to vector<2x32xf32>
    %321 = arith.addf %320, %319 : vector<2x32xf32>
    %322 = arith.divf %320, %321 : vector<2x32xf32>
    %323 = vector.extract_strided_slice %43 {offsets = [0, 3, 0], sizes = [2, 1, 32], strides = [1, 1, 1]} : vector<2x8x32xf32> to vector<2x1x32xf32>
    %324 = vector.shape_cast %323 : vector<2x1x32xf32> to vector<2x32xf32>
    %325 = arith.addf %306, %46 : vector<2x32xf32>
    %326 = arith.mulf %314, %325 : vector<2x32xf32>
    %327 = arith.addf %324, %326 : vector<2x32xf32>
    %328 = math.tanh %327 : vector<2x32xf32>
    %cst_127 = arith.constant 1.000000e+00 : f32
    %329 = vector.broadcast %cst_127 : f32 to vector<2x32xf32>
    %330 = arith.subf %329, %322 : vector<2x32xf32>
    %331 = arith.mulf %330, %328 : vector<2x32xf32>
    %332 = arith.mulf %322, %273 : vector<2x32xf32>
    %333 = arith.addf %331, %332 : vector<2x32xf32>
    %cst_128 = arith.constant dense<0.000000e+00> : vector<2x32xf32>
    %334 = tpu.matmul %333, %7, %cst_128 {dimension_numbers = #tpu.dot_dimension_numbers<[1], [0], [0], [1], [0, 0, 1, 1], [], []>} : vector<2x32xf32>, vector<32x32xf32>, vector<2x32xf32> -> vector<2x32xf32>
    %cst_129 = arith.constant dense<0.000000e+00> : vector<2x32xf32>
    %335 = tpu.matmul %333, %9, %cst_129 {dimension_numbers = #tpu.dot_dimension_numbers<[1], [0], [0], [1], [0, 0, 1, 1], [], []>} : vector<2x32xf32>, vector<32x32xf32>, vector<2x32xf32> -> vector<2x32xf32>
    %cst_130 = arith.constant dense<0.000000e+00> : vector<2x32xf32>
    %336 = tpu.matmul %333, %11, %cst_130 {dimension_numbers = #tpu.dot_dimension_numbers<[1], [0], [0], [1], [0, 0, 1, 1], [], []>} : vector<2x32xf32>, vector<32x32xf32>, vector<2x32xf32> -> vector<2x32xf32>
    %cst_131 = arith.constant dense<0.000000e+00> : vector<2x32xf32>
    %337 = tpu.matmul %303, %13, %cst_131 {dimension_numbers = #tpu.dot_dimension_numbers<[1], [0], [0], [1], [0, 0, 1, 1], [], []>} : vector<2x32xf32>, vector<32x32xf32>, vector<2x32xf32> -> vector<2x32xf32>
    %cst_132 = arith.constant dense<0.000000e+00> : vector<2x32xf32>
    %338 = tpu.matmul %303, %15, %cst_132 {dimension_numbers = #tpu.dot_dimension_numbers<[1], [0], [0], [1], [0, 0, 1, 1], [], []>} : vector<2x32xf32>, vector<32x32xf32>, vector<2x32xf32> -> vector<2x32xf32>
    %cst_133 = arith.constant dense<0.000000e+00> : vector<2x32xf32>
    %339 = tpu.matmul %303, %17, %cst_133 {dimension_numbers = #tpu.dot_dimension_numbers<[1], [0], [0], [1], [0, 0, 1, 1], [], []>} : vector<2x32xf32>, vector<32x32xf32>, vector<2x32xf32> -> vector<2x32xf32>
    %340 = arith.addf %334, %337 : vector<2x32xf32>
    %341 = arith.addf %340, %50 : vector<2x32xf32>
    %342 = arith.negf %341 : vector<2x32xf32>
    %343 = math.exp %342 : vector<2x32xf32>
    %cst_134 = arith.constant 1.000000e+00 : f32
    %344 = vector.broadcast %cst_134 : f32 to vector<2x32xf32>
    %345 = arith.addf %344, %343 : vector<2x32xf32>
    %346 = arith.divf %344, %345 : vector<2x32xf32>
    %347 = arith.addf %335, %338 : vector<2x32xf32>
    %348 = arith.addf %347, %54 : vector<2x32xf32>
    %349 = arith.negf %348 : vector<2x32xf32>
    %350 = math.exp %349 : vector<2x32xf32>
    %cst_135 = arith.constant 1.000000e+00 : f32
    %351 = vector.broadcast %cst_135 : f32 to vector<2x32xf32>
    %352 = arith.addf %351, %350 : vector<2x32xf32>
    %353 = arith.divf %351, %352 : vector<2x32xf32>
    %354 = arith.addf %336, %58 : vector<2x32xf32>
    %355 = arith.addf %339, %61 : vector<2x32xf32>
    %356 = arith.mulf %346, %355 : vector<2x32xf32>
    %357 = arith.addf %354, %356 : vector<2x32xf32>
    %358 = math.tanh %357 : vector<2x32xf32>
    %cst_136 = arith.constant 1.000000e+00 : f32
    %359 = vector.broadcast %cst_136 : f32 to vector<2x32xf32>
    %360 = arith.subf %359, %353 : vector<2x32xf32>
    %361 = arith.mulf %360, %358 : vector<2x32xf32>
    %362 = arith.mulf %353, %303 : vector<2x32xf32>
    %363 = arith.addf %361, %362 : vector<2x32xf32>
    %cst_137 = arith.constant dense<0.000000e+00> : vector<2x32xf32>
    %364 = tpu.matmul %333, %1, %cst_137 {dimension_numbers = #tpu.dot_dimension_numbers<[1], [0], [0], [1], [0, 0, 1, 1], [], []>} : vector<2x32xf32>, vector<32x32xf32>, vector<2x32xf32> -> vector<2x32xf32>
    %cst_138 = arith.constant dense<0.000000e+00> : vector<2x32xf32>
    %365 = tpu.matmul %333, %3, %cst_138 {dimension_numbers = #tpu.dot_dimension_numbers<[1], [0], [0], [1], [0, 0, 1, 1], [], []>} : vector<2x32xf32>, vector<32x32xf32>, vector<2x32xf32> -> vector<2x32xf32>
    %cst_139 = arith.constant dense<0.000000e+00> : vector<2x32xf32>
    %366 = tpu.matmul %333, %5, %cst_139 {dimension_numbers = #tpu.dot_dimension_numbers<[1], [0], [0], [1], [0, 0, 1, 1], [], []>} : vector<2x32xf32>, vector<32x32xf32>, vector<2x32xf32> -> vector<2x32xf32>
    %367 = vector.extract_strided_slice %27 {offsets = [0, 2, 0], sizes = [2, 1, 32], strides = [1, 1, 1]} : vector<2x8x32xf32> to vector<2x1x32xf32>
    %368 = vector.shape_cast %367 : vector<2x1x32xf32> to vector<2x32xf32>
    %369 = arith.addf %368, %364 : vector<2x32xf32>
    %370 = arith.negf %369 : vector<2x32xf32>
    %371 = math.exp %370 : vector<2x32xf32>
    %cst_140 = arith.constant 1.000000e+00 : f32
    %372 = vector.broadcast %cst_140 : f32 to vector<2x32xf32>
    %373 = arith.addf %372, %371 : vector<2x32xf32>
    %374 = arith.divf %372, %373 : vector<2x32xf32>
    %375 = vector.extract_strided_slice %35 {offsets = [0, 2, 0], sizes = [2, 1, 32], strides = [1, 1, 1]} : vector<2x8x32xf32> to vector<2x1x32xf32>
    %376 = vector.shape_cast %375 : vector<2x1x32xf32> to vector<2x32xf32>
    %377 = arith.addf %376, %365 : vector<2x32xf32>
    %378 = arith.negf %377 : vector<2x32xf32>
    %379 = math.exp %378 : vector<2x32xf32>
    %cst_141 = arith.constant 1.000000e+00 : f32
    %380 = vector.broadcast %cst_141 : f32 to vector<2x32xf32>
    %381 = arith.addf %380, %379 : vector<2x32xf32>
    %382 = arith.divf %380, %381 : vector<2x32xf32>
    %383 = vector.extract_strided_slice %43 {offsets = [0, 2, 0], sizes = [2, 1, 32], strides = [1, 1, 1]} : vector<2x8x32xf32> to vector<2x1x32xf32>
    %384 = vector.shape_cast %383 : vector<2x1x32xf32> to vector<2x32xf32>
    %385 = arith.addf %366, %46 : vector<2x32xf32>
    %386 = arith.mulf %374, %385 : vector<2x32xf32>
    %387 = arith.addf %384, %386 : vector<2x32xf32>
    %388 = math.tanh %387 : vector<2x32xf32>
    %cst_142 = arith.constant 1.000000e+00 : f32
    %389 = vector.broadcast %cst_142 : f32 to vector<2x32xf32>
    %390 = arith.subf %389, %382 : vector<2x32xf32>
    %391 = arith.mulf %390, %388 : vector<2x32xf32>
    %392 = arith.mulf %382, %333 : vector<2x32xf32>
    %393 = arith.addf %391, %392 : vector<2x32xf32>
    %cst_143 = arith.constant dense<0.000000e+00> : vector<2x32xf32>
    %394 = tpu.matmul %393, %7, %cst_143 {dimension_numbers = #tpu.dot_dimension_numbers<[1], [0], [0], [1], [0, 0, 1, 1], [], []>} : vector<2x32xf32>, vector<32x32xf32>, vector<2x32xf32> -> vector<2x32xf32>
    %cst_144 = arith.constant dense<0.000000e+00> : vector<2x32xf32>
    %395 = tpu.matmul %393, %9, %cst_144 {dimension_numbers = #tpu.dot_dimension_numbers<[1], [0], [0], [1], [0, 0, 1, 1], [], []>} : vector<2x32xf32>, vector<32x32xf32>, vector<2x32xf32> -> vector<2x32xf32>
    %cst_145 = arith.constant dense<0.000000e+00> : vector<2x32xf32>
    %396 = tpu.matmul %393, %11, %cst_145 {dimension_numbers = #tpu.dot_dimension_numbers<[1], [0], [0], [1], [0, 0, 1, 1], [], []>} : vector<2x32xf32>, vector<32x32xf32>, vector<2x32xf32> -> vector<2x32xf32>
    %cst_146 = arith.constant dense<0.000000e+00> : vector<2x32xf32>
    %397 = tpu.matmul %363, %13, %cst_146 {dimension_numbers = #tpu.dot_dimension_numbers<[1], [0], [0], [1], [0, 0, 1, 1], [], []>} : vector<2x32xf32>, vector<32x32xf32>, vector<2x32xf32> -> vector<2x32xf32>
    %cst_147 = arith.constant dense<0.000000e+00> : vector<2x32xf32>
    %398 = tpu.matmul %363, %15, %cst_147 {dimension_numbers = #tpu.dot_dimension_numbers<[1], [0], [0], [1], [0, 0, 1, 1], [], []>} : vector<2x32xf32>, vector<32x32xf32>, vector<2x32xf32> -> vector<2x32xf32>
    %cst_148 = arith.constant dense<0.000000e+00> : vector<2x32xf32>
    %399 = tpu.matmul %363, %17, %cst_148 {dimension_numbers = #tpu.dot_dimension_numbers<[1], [0], [0], [1], [0, 0, 1, 1], [], []>} : vector<2x32xf32>, vector<32x32xf32>, vector<2x32xf32> -> vector<2x32xf32>
    %400 = arith.addf %394, %397 : vector<2x32xf32>
    %401 = arith.addf %400, %50 : vector<2x32xf32>
    %402 = arith.negf %401 : vector<2x32xf32>
    %403 = math.exp %402 : vector<2x32xf32>
    %cst_149 = arith.constant 1.000000e+00 : f32
    %404 = vector.broadcast %cst_149 : f32 to vector<2x32xf32>
    %405 = arith.addf %404, %403 : vector<2x32xf32>
    %406 = arith.divf %404, %405 : vector<2x32xf32>
    %407 = arith.addf %395, %398 : vector<2x32xf32>
    %408 = arith.addf %407, %54 : vector<2x32xf32>
    %409 = arith.negf %408 : vector<2x32xf32>
    %410 = math.exp %409 : vector<2x32xf32>
    %cst_150 = arith.constant 1.000000e+00 : f32
    %411 = vector.broadcast %cst_150 : f32 to vector<2x32xf32>
    %412 = arith.addf %411, %410 : vector<2x32xf32>
    %413 = arith.divf %411, %412 : vector<2x32xf32>
    %414 = arith.addf %396, %58 : vector<2x32xf32>
    %415 = arith.addf %399, %61 : vector<2x32xf32>
    %416 = arith.mulf %406, %415 : vector<2x32xf32>
    %417 = arith.addf %414, %416 : vector<2x32xf32>
    %418 = math.tanh %417 : vector<2x32xf32>
    %cst_151 = arith.constant 1.000000e+00 : f32
    %419 = vector.broadcast %cst_151 : f32 to vector<2x32xf32>
    %420 = arith.subf %419, %413 : vector<2x32xf32>
    %421 = arith.mulf %420, %418 : vector<2x32xf32>
    %422 = arith.mulf %413, %363 : vector<2x32xf32>
    %423 = arith.addf %421, %422 : vector<2x32xf32>
    %cst_152 = arith.constant dense<0.000000e+00> : vector<2x32xf32>
    %424 = tpu.matmul %393, %1, %cst_152 {dimension_numbers = #tpu.dot_dimension_numbers<[1], [0], [0], [1], [0, 0, 1, 1], [], []>} : vector<2x32xf32>, vector<32x32xf32>, vector<2x32xf32> -> vector<2x32xf32>
    %cst_153 = arith.constant dense<0.000000e+00> : vector<2x32xf32>
    %425 = tpu.matmul %393, %3, %cst_153 {dimension_numbers = #tpu.dot_dimension_numbers<[1], [0], [0], [1], [0, 0, 1, 1], [], []>} : vector<2x32xf32>, vector<32x32xf32>, vector<2x32xf32> -> vector<2x32xf32>
    %cst_154 = arith.constant dense<0.000000e+00> : vector<2x32xf32>
    %426 = tpu.matmul %393, %5, %cst_154 {dimension_numbers = #tpu.dot_dimension_numbers<[1], [0], [0], [1], [0, 0, 1, 1], [], []>} : vector<2x32xf32>, vector<32x32xf32>, vector<2x32xf32> -> vector<2x32xf32>
    %427 = vector.extract_strided_slice %27 {offsets = [0, 1, 0], sizes = [2, 1, 32], strides = [1, 1, 1]} : vector<2x8x32xf32> to vector<2x1x32xf32>
    %428 = vector.shape_cast %427 : vector<2x1x32xf32> to vector<2x32xf32>
    %429 = arith.addf %428, %424 : vector<2x32xf32>
    %430 = arith.negf %429 : vector<2x32xf32>
    %431 = math.exp %430 : vector<2x32xf32>
    %cst_155 = arith.constant 1.000000e+00 : f32
    %432 = vector.broadcast %cst_155 : f32 to vector<2x32xf32>
    %433 = arith.addf %432, %431 : vector<2x32xf32>
    %434 = arith.divf %432, %433 : vector<2x32xf32>
    %435 = vector.extract_strided_slice %35 {offsets = [0, 1, 0], sizes = [2, 1, 32], strides = [1, 1, 1]} : vector<2x8x32xf32> to vector<2x1x32xf32>
    %436 = vector.shape_cast %435 : vector<2x1x32xf32> to vector<2x32xf32>
    %437 = arith.addf %436, %425 : vector<2x32xf32>
    %438 = arith.negf %437 : vector<2x32xf32>
    %439 = math.exp %438 : vector<2x32xf32>
    %cst_156 = arith.constant 1.000000e+00 : f32
    %440 = vector.broadcast %cst_156 : f32 to vector<2x32xf32>
    %441 = arith.addf %440, %439 : vector<2x32xf32>
    %442 = arith.divf %440, %441 : vector<2x32xf32>
    %443 = vector.extract_strided_slice %43 {offsets = [0, 1, 0], sizes = [2, 1, 32], strides = [1, 1, 1]} : vector<2x8x32xf32> to vector<2x1x32xf32>
    %444 = vector.shape_cast %443 : vector<2x1x32xf32> to vector<2x32xf32>
    %445 = arith.addf %426, %46 : vector<2x32xf32>
    %446 = arith.mulf %434, %445 : vector<2x32xf32>
    %447 = arith.addf %444, %446 : vector<2x32xf32>
    %448 = math.tanh %447 : vector<2x32xf32>
    %cst_157 = arith.constant 1.000000e+00 : f32
    %449 = vector.broadcast %cst_157 : f32 to vector<2x32xf32>
    %450 = arith.subf %449, %442 : vector<2x32xf32>
    %451 = arith.mulf %450, %448 : vector<2x32xf32>
    %452 = arith.mulf %442, %393 : vector<2x32xf32>
    %453 = arith.addf %451, %452 : vector<2x32xf32>
    %cst_158 = arith.constant dense<0.000000e+00> : vector<2x32xf32>
    %454 = tpu.matmul %453, %7, %cst_158 {dimension_numbers = #tpu.dot_dimension_numbers<[1], [0], [0], [1], [0, 0, 1, 1], [], []>} : vector<2x32xf32>, vector<32x32xf32>, vector<2x32xf32> -> vector<2x32xf32>
    %cst_159 = arith.constant dense<0.000000e+00> : vector<2x32xf32>
    %455 = tpu.matmul %453, %9, %cst_159 {dimension_numbers = #tpu.dot_dimension_numbers<[1], [0], [0], [1], [0, 0, 1, 1], [], []>} : vector<2x32xf32>, vector<32x32xf32>, vector<2x32xf32> -> vector<2x32xf32>
    %cst_160 = arith.constant dense<0.000000e+00> : vector<2x32xf32>
    %456 = tpu.matmul %453, %11, %cst_160 {dimension_numbers = #tpu.dot_dimension_numbers<[1], [0], [0], [1], [0, 0, 1, 1], [], []>} : vector<2x32xf32>, vector<32x32xf32>, vector<2x32xf32> -> vector<2x32xf32>
    %cst_161 = arith.constant dense<0.000000e+00> : vector<2x32xf32>
    %457 = tpu.matmul %423, %13, %cst_161 {dimension_numbers = #tpu.dot_dimension_numbers<[1], [0], [0], [1], [0, 0, 1, 1], [], []>} : vector<2x32xf32>, vector<32x32xf32>, vector<2x32xf32> -> vector<2x32xf32>
    %cst_162 = arith.constant dense<0.000000e+00> : vector<2x32xf32>
    %458 = tpu.matmul %423, %15, %cst_162 {dimension_numbers = #tpu.dot_dimension_numbers<[1], [0], [0], [1], [0, 0, 1, 1], [], []>} : vector<2x32xf32>, vector<32x32xf32>, vector<2x32xf32> -> vector<2x32xf32>
    %cst_163 = arith.constant dense<0.000000e+00> : vector<2x32xf32>
    %459 = tpu.matmul %423, %17, %cst_163 {dimension_numbers = #tpu.dot_dimension_numbers<[1], [0], [0], [1], [0, 0, 1, 1], [], []>} : vector<2x32xf32>, vector<32x32xf32>, vector<2x32xf32> -> vector<2x32xf32>
    %460 = arith.addf %454, %457 : vector<2x32xf32>
    %461 = arith.addf %460, %50 : vector<2x32xf32>
    %462 = arith.negf %461 : vector<2x32xf32>
    %463 = math.exp %462 : vector<2x32xf32>
    %cst_164 = arith.constant 1.000000e+00 : f32
    %464 = vector.broadcast %cst_164 : f32 to vector<2x32xf32>
    %465 = arith.addf %464, %463 : vector<2x32xf32>
    %466 = arith.divf %464, %465 : vector<2x32xf32>
    %467 = arith.addf %455, %458 : vector<2x32xf32>
    %468 = arith.addf %467, %54 : vector<2x32xf32>
    %469 = arith.negf %468 : vector<2x32xf32>
    %470 = math.exp %469 : vector<2x32xf32>
    %cst_165 = arith.constant 1.000000e+00 : f32
    %471 = vector.broadcast %cst_165 : f32 to vector<2x32xf32>
    %472 = arith.addf %471, %470 : vector<2x32xf32>
    %473 = arith.divf %471, %472 : vector<2x32xf32>
    %474 = arith.addf %456, %58 : vector<2x32xf32>
    %475 = arith.addf %459, %61 : vector<2x32xf32>
    %476 = arith.mulf %466, %475 : vector<2x32xf32>
    %477 = arith.addf %474, %476 : vector<2x32xf32>
    %478 = math.tanh %477 : vector<2x32xf32>
    %cst_166 = arith.constant 1.000000e+00 : f32
    %479 = vector.broadcast %cst_166 : f32 to vector<2x32xf32>
    %480 = arith.subf %479, %473 : vector<2x32xf32>
    %481 = arith.mulf %480, %478 : vector<2x32xf32>
    %482 = arith.mulf %473, %423 : vector<2x32xf32>
    %483 = arith.addf %481, %482 : vector<2x32xf32>
    %cst_167 = arith.constant dense<0.000000e+00> : vector<2x32xf32>
    %484 = tpu.matmul %453, %1, %cst_167 {dimension_numbers = #tpu.dot_dimension_numbers<[1], [0], [0], [1], [0, 0, 1, 1], [], []>} : vector<2x32xf32>, vector<32x32xf32>, vector<2x32xf32> -> vector<2x32xf32>
    %cst_168 = arith.constant dense<0.000000e+00> : vector<2x32xf32>
    %485 = tpu.matmul %453, %3, %cst_168 {dimension_numbers = #tpu.dot_dimension_numbers<[1], [0], [0], [1], [0, 0, 1, 1], [], []>} : vector<2x32xf32>, vector<32x32xf32>, vector<2x32xf32> -> vector<2x32xf32>
    %cst_169 = arith.constant dense<0.000000e+00> : vector<2x32xf32>
    %486 = tpu.matmul %453, %5, %cst_169 {dimension_numbers = #tpu.dot_dimension_numbers<[1], [0], [0], [1], [0, 0, 1, 1], [], []>} : vector<2x32xf32>, vector<32x32xf32>, vector<2x32xf32> -> vector<2x32xf32>
    %487 = vector.extract_strided_slice %27 {offsets = [0, 0, 0], sizes = [2, 1, 32], strides = [1, 1, 1]} : vector<2x8x32xf32> to vector<2x1x32xf32>
    %488 = vector.shape_cast %487 : vector<2x1x32xf32> to vector<2x32xf32>
    %489 = arith.addf %488, %484 : vector<2x32xf32>
    %490 = arith.negf %489 : vector<2x32xf32>
    %491 = math.exp %490 : vector<2x32xf32>
    %cst_170 = arith.constant 1.000000e+00 : f32
    %492 = vector.broadcast %cst_170 : f32 to vector<2x32xf32>
    %493 = arith.addf %492, %491 : vector<2x32xf32>
    %494 = arith.divf %492, %493 : vector<2x32xf32>
    %495 = vector.extract_strided_slice %35 {offsets = [0, 0, 0], sizes = [2, 1, 32], strides = [1, 1, 1]} : vector<2x8x32xf32> to vector<2x1x32xf32>
    %496 = vector.shape_cast %495 : vector<2x1x32xf32> to vector<2x32xf32>
    %497 = arith.addf %496, %485 : vector<2x32xf32>
    %498 = arith.negf %497 : vector<2x32xf32>
    %499 = math.exp %498 : vector<2x32xf32>
    %cst_171 = arith.constant 1.000000e+00 : f32
    %500 = vector.broadcast %cst_171 : f32 to vector<2x32xf32>
    %501 = arith.addf %500, %499 : vector<2x32xf32>
    %502 = arith.divf %500, %501 : vector<2x32xf32>
    %503 = vector.extract_strided_slice %43 {offsets = [0, 0, 0], sizes = [2, 1, 32], strides = [1, 1, 1]} : vector<2x8x32xf32> to vector<2x1x32xf32>
    %504 = vector.shape_cast %503 : vector<2x1x32xf32> to vector<2x32xf32>
    %505 = arith.addf %486, %46 : vector<2x32xf32>
    %506 = arith.mulf %494, %505 : vector<2x32xf32>
    %507 = arith.addf %504, %506 : vector<2x32xf32>
    %508 = math.tanh %507 : vector<2x32xf32>
    %cst_172 = arith.constant 1.000000e+00 : f32
    %509 = vector.broadcast %cst_172 : f32 to vector<2x32xf32>
    %510 = arith.subf %509, %502 : vector<2x32xf32>
    %511 = arith.mulf %510, %508 : vector<2x32xf32>
    %512 = arith.mulf %502, %453 : vector<2x32xf32>
    %513 = arith.addf %511, %512 : vector<2x32xf32>
    %cst_173 = arith.constant dense<0.000000e+00> : vector<2x32xf32>
    %514 = tpu.matmul %513, %7, %cst_173 {dimension_numbers = #tpu.dot_dimension_numbers<[1], [0], [0], [1], [0, 0, 1, 1], [], []>} : vector<2x32xf32>, vector<32x32xf32>, vector<2x32xf32> -> vector<2x32xf32>
    %cst_174 = arith.constant dense<0.000000e+00> : vector<2x32xf32>
    %515 = tpu.matmul %513, %9, %cst_174 {dimension_numbers = #tpu.dot_dimension_numbers<[1], [0], [0], [1], [0, 0, 1, 1], [], []>} : vector<2x32xf32>, vector<32x32xf32>, vector<2x32xf32> -> vector<2x32xf32>
    %cst_175 = arith.constant dense<0.000000e+00> : vector<2x32xf32>
    %516 = tpu.matmul %513, %11, %cst_175 {dimension_numbers = #tpu.dot_dimension_numbers<[1], [0], [0], [1], [0, 0, 1, 1], [], []>} : vector<2x32xf32>, vector<32x32xf32>, vector<2x32xf32> -> vector<2x32xf32>
    %cst_176 = arith.constant dense<0.000000e+00> : vector<2x32xf32>
    %517 = tpu.matmul %483, %13, %cst_176 {dimension_numbers = #tpu.dot_dimension_numbers<[1], [0], [0], [1], [0, 0, 1, 1], [], []>} : vector<2x32xf32>, vector<32x32xf32>, vector<2x32xf32> -> vector<2x32xf32>
    %cst_177 = arith.constant dense<0.000000e+00> : vector<2x32xf32>
    %518 = tpu.matmul %483, %15, %cst_177 {dimension_numbers = #tpu.dot_dimension_numbers<[1], [0], [0], [1], [0, 0, 1, 1], [], []>} : vector<2x32xf32>, vector<32x32xf32>, vector<2x32xf32> -> vector<2x32xf32>
    %cst_178 = arith.constant dense<0.000000e+00> : vector<2x32xf32>
    %519 = tpu.matmul %483, %17, %cst_178 {dimension_numbers = #tpu.dot_dimension_numbers<[1], [0], [0], [1], [0, 0, 1, 1], [], []>} : vector<2x32xf32>, vector<32x32xf32>, vector<2x32xf32> -> vector<2x32xf32>
    %520 = arith.addf %514, %517 : vector<2x32xf32>
    %521 = arith.addf %520, %50 : vector<2x32xf32>
    %522 = arith.negf %521 : vector<2x32xf32>
    %523 = math.exp %522 : vector<2x32xf32>
    %cst_179 = arith.constant 1.000000e+00 : f32
    %524 = vector.broadcast %cst_179 : f32 to vector<2x32xf32>
    %525 = arith.addf %524, %523 : vector<2x32xf32>
    %526 = arith.divf %524, %525 : vector<2x32xf32>
    %527 = arith.addf %515, %518 : vector<2x32xf32>
    %528 = arith.addf %527, %54 : vector<2x32xf32>
    %529 = arith.negf %528 : vector<2x32xf32>
    %530 = math.exp %529 : vector<2x32xf32>
    %cst_180 = arith.constant 1.000000e+00 : f32
    %531 = vector.broadcast %cst_180 : f32 to vector<2x32xf32>
    %532 = arith.addf %531, %530 : vector<2x32xf32>
    %533 = arith.divf %531, %532 : vector<2x32xf32>
    %534 = arith.addf %516, %58 : vector<2x32xf32>
    %535 = arith.addf %519, %61 : vector<2x32xf32>
    %536 = arith.mulf %526, %535 : vector<2x32xf32>
    %537 = arith.addf %534, %536 : vector<2x32xf32>
    %538 = math.tanh %537 : vector<2x32xf32>
    %cst_181 = arith.constant 1.000000e+00 : f32
    %539 = vector.broadcast %cst_181 : f32 to vector<2x32xf32>
    %540 = arith.subf %539, %533 : vector<2x32xf32>
    %541 = arith.mulf %540, %538 : vector<2x32xf32>
    %542 = arith.mulf %533, %483 : vector<2x32xf32>
    %543 = arith.addf %541, %542 : vector<2x32xf32>
    %c0_182 = arith.constant 0 : index
    %c0_183 = arith.constant 0 : index
    %544 = vector.load %arg9[%c0_182, %c0_183] : memref<32x16xf32, #tpu.memory_space<vmem>>, vector<32x16xf32>
    %cst_184 = arith.constant dense<0.000000e+00> : vector<2x16xf32>
    %545 = tpu.matmul %543, %544, %cst_184 {dimension_numbers = #tpu.dot_dimension_numbers<[1], [0], [0], [1], [0, 0, 1, 1], [], []>} : vector<2x32xf32>, vector<32x16xf32>, vector<2x16xf32> -> vector<2x16xf32>
    %c0_185 = arith.constant 0 : index
    %c0_186 = arith.constant 0 : index
    %546 = vector.load %arg10[%c0_185, %c0_186] : memref<1x16xf32, #tpu.memory_space<vmem>>, vector<1x16xf32>
    %547 = vector.broadcast %546 : vector<1x16xf32> to vector<2x16xf32>
    %548 = arith.addf %545, %547 : vector<2x16xf32>
    %c0_187 = arith.constant 0 : index
    %c0_188 = arith.constant 0 : index
    %549 = vector.load %arg11[%c0_187, %c0_188] : memref<2x16xf32, #tpu.memory_space<vmem>>, vector<2x16xf32>
    tpu.vector_store %arg11[%c0_187, %c0_188], %548 {strides = array<i32>} : memref<2x16xf32, #tpu.memory_space<vmem>>, vector<2x16xf32>,
    return
  }
}

</mosaic_0001>

<bundles_post_ra>
// kernel: tpu_custom_call.1
= control target key start
LH: loop header
LB: loop body
LE: loop exit
PB: predicated region body
PF: predicated region fallthrough
CT: control target
= control target key end

     0   :  { %16 = vsyncpa [#allocation3], 0  ;;  %s9386_s0 = inlined_call_operand.vmem [shape: f32[2,8,8], index: 0, kind: input, shape index: {}]   ;;  %s9387_s1 = inlined_call_operand.vmem [shape: f32[3,8,32], index: 1, kind: input, shape index: {}]   ;;  %s9388_s2 = inlined_call_operand.hbm [shape: f32[3,32,32], index: 2, kind: input, shape index: {}]   ;;  %s9389_s3 = inlined_call_operand.vmem [shape: f32[3,1,32], index: 3, kind: input, shape index: {}]   ;;  %s9390_s4 = inlined_call_operand.vmem [shape: f32[1,32], index: 4, kind: input, shape index: {}]   ;;  %s9391_s5 = inlined_call_operand.hbm [shape: f32[3,32,32], index: 5, kind: input, shape index: {}]   ;;  %s9392_s6 = inlined_call_operand.hbm [shape: f32[3,32,32], index: 6, kind: input, shape index: {}]   ;;  %s9393_s7 = inlined_call_operand.vmem [shape: f32[3,1,32], index: 7, kind: input, shape index: {}]   ;;  %s9394_s8 = inlined_call_operand.vmem [shape: f32[1,32], index: 8, kind: input, shape index: {}]   ;;  %s9395_s9 = inlined_call_operand.vmem [shape: f32[32,16], index: 9, kind: input, shape index: {}]   ;;  %s9396_s10 = inlined_call_operand.vmem [shape: f32[1,16], index: 10, kind: input, shape index: {}]   ;;  %s9397_s11 = inlined_call_operand.hbm [shape: f32[2,16], index: 11, kind: output, shape index: {}]  }
   0x1   :  { %17 = vsyncpa [#allocation6], 0 }
   0x2   :  { %18 = vsyncpa [#allocation4], 0  ;;  %s8401_s17 = smov [#allocation5]   ;;  %s8402_s19 = smov [#allocation2]  }
   0x3   :  { %s44_s18 = sshll.u32 %s8401_s17, 4  ;;  %s28_s20 = sshll.u32 %s8402_s19, 4  ;;  %s45_s18 = int_to_ptr.vmem [resolvable:$true] %s44_s18  ;;  %s8470_s20 = int_to_ptr.vmem [resolvable:$true] %s28_s20 }
   0x4   :  { %s8307_s23 = scalar_lea.hbm %s9391_s5, 1536 }
   0x5   :  { %p8308_p0 = scmp.ne.s32.totalorder %s9391_s5, %s8307_s23  ;;  %p8311_p1 = scmp.lt.u32.totalorder %s8307_s23, %s9391_s5 }
   0x7   :  { %p8313_p2 = pnand %p8311_p1, %p8308_p0 }
   0x9   :  { %8316 = shalt.err (!%p8313_p2)
}
   0xa   :  { %s8317_s28 = scalar_lea.vmem %s45_s18, 1536  ;;  %p8322_p4 = scmp.lt.s32.totalorder %s45_s18, %s45_s18 }
   0xb   :  { %p8318_p3 = scmp.ne.s32.totalorder %s45_s18, %s8317_s28  ;;  %p8323_p5 = scmp.lt.s32.totalorder %s8317_s28, %s8317_s28 }
   0xd   :  { %p8324_p6 = por %p8323_p5, %p8322_p4 }
   0xf   :  { %p8325_p7 = pnand %p8324_p6, %p8318_p3 }
  0x11   :  { %8328 = shalt.err (!%p8325_p7)
}
  0x12   :  { %s8403_s29 = smov 128   ;;  %s8404_s30 = smov 8  }
  0x13   :  { %50 = dma.hbm_to_vmem [thread:$0]  %s9391_s5, 1536, %s45_s18, [#allocation6], %s8403_s29, %s8403_s29, %s8404_s30  }
  0x14   :  { %s8329_s16 = scalar_lea.hbm %s9388_s2, 1536 }
  0x15   :  { %p8330_p8 = scmp.ne.s32.totalorder %s9388_s2, %s8329_s16  ;;  %p8333_p9 = scmp.lt.u32.totalorder %s8329_s16, %s9388_s2 }
  0x17   :  { %p8335_p10 = pnand %p8333_p9, %p8330_p8 }
  0x19   :  { %8338 = shalt.err (!%p8335_p10)
}
  0x1a   :  { %s8339_s23 = scalar_lea.vmem %s8470_s20, 1536  ;;  %p8344_p12 = scmp.lt.s32.totalorder %s8470_s20, %s8470_s20 }
  0x1b   :  { %p8340_p11 = scmp.ne.s32.totalorder %s8470_s20, %s8339_s23  ;;  %p8345_p13 = scmp.lt.s32.totalorder %s8339_s23, %s8339_s23 }
  0x1d   :  { %p8346_p0 = por %p8345_p13, %p8344_p12 }
  0x1f   :  { %p8347_p1 = pnand %p8346_p0, %p8340_p11 }
  0x21   :  { %8350 = shalt.err (!%p8347_p1)
}
  0x22   :  { %34 = dma.hbm_to_vmem [thread:$0]  %s9388_s2, 1536, %s8470_s20, [#allocation3], %s8403_s29, %s8403_s29, %s8404_s30  }
  0x23   :  { %s8405_s24 = smov [#allocation7]   ;;  %s8351_s28 = scalar_lea.hbm %s9392_s6, 1536 }
  0x24   :  { %s56_s25 = sshll.u32 %s8405_s24, 4  ;;  %p8352_p2 = scmp.ne.s32.totalorder %s9392_s6, %s8351_s28  ;;  %s57_s25 = int_to_ptr.vmem [resolvable:$true] %s56_s25 }
  0x25   :  { %p8355_p3 = scmp.lt.u32.totalorder %s8351_s28, %s9392_s6 }
  0x27   :  { %p8357_p4 = pnand %p8355_p3, %p8352_p2 }
  0x29   :  { %8360 = shalt.err (!%p8357_p4)
}
  0x2a   :  { %s8361_s16 = scalar_lea.vmem %s57_s25, 1536  ;;  %p8366_p6 = scmp.lt.s32.totalorder %s57_s25, %s57_s25 }
  0x2b   :  { %p8362_p5 = scmp.ne.s32.totalorder %s57_s25, %s8361_s16  ;;  %p8367_p7 = scmp.lt.s32.totalorder %s8361_s16, %s8361_s16 }
  0x2d   :  { %p8368_p8 = por %p8367_p7, %p8366_p6 }
  0x2f   :  { %p8369_p9 = pnand %p8368_p8, %p8362_p5 }
  0x31   :  { %8372 = shalt.err (!%p8369_p9)
}
  0x32   :  { %62 = dma.hbm_to_vmem [thread:$0]  %s9392_s6, 1536, %s57_s25, [#allocation6], %s8403_s29, %s8403_s29, %s8404_s30  }
  0x33   :  { %8395 = dma.done.wait [#allocation3], 1536  }
  0x34   :  { %8396 = vsyncadd [#allocation3], 4294965760 }
  0x35   :  { %8397 = dma.done.wait [#allocation6], 3072  }
  0x36   :  { %8398 = vsyncadd [#allocation6], 4294964224  ;;  %vm132_vm0 = vcmask 64512   ;;  %v124_v0 = vld [vmem:[%s9387_s1] sm:$0xff]  ;;  %v6290_v1 = vld [vmem:[%s9387_s1 + $0x8] sm:$0xff]  ;;  %v8406_v12 = vmov 0.0|0.0  }
  0x37   :  { %v122_v2 = vld [vmem:[%s9386_s0] sm:$0xff]  ;;  %6797 = vmatprep.subr.mxu0 %v124_v0  ;;  %6802 = vmatprep.subr.mxu1 %v6290_v1  ;;  %v123_v3 = vld [vmem:[%s9386_s0 + $0x8] sm:$0xff]  ;;  %v6295_v4 = vld [vmem:[%s9387_s1 + $0x10] sm:$0xff]  ;;  %vm8407_vm1 = vmmov 0   ;;  %v8408_v19 = vmov 0.0   ;;  %vm836_vm2 = vcmask 1041409  }
  0x38   :  { %v80_v5 = vld [vmem:[#allocation2] sm:$0xff]  ;;  %6798 = vmatpush3.msra.mxu0 %v124_v0  ;;  %6799 = vmatprep.mubr.msk.f32.mxu0 %vm132_vm0, %v122_v2  ;;  %v81_v6 = vld [vmem:[#allocation2 + $0x8] sm:$0xff]  ;;  %v82_v10 = vld [vmem:[#allocation2 + $0x10] sm:$0xff]  ;;  %vm421_vm3 = vcmask 261120   ;;  %s8409_s12 = smov [#allocation8]   ;;  %vm6269_vm4 = vcmask 123904  }
  0x39   :  { %v85_v7 = vld [vmem:[#allocation2 + $0x20] sm:$0xff]  ;;  %v86_v8 = vld [vmem:[#allocation2 + $0x28] sm:$0xff]  ;;  %6803 = vmatpush3.msra.mxu1 %v6290_v1  ;;  %6804 = vmatprep.mubr.msk.f32.mxu1 %vm132_vm0, %v122_v2  ;;  %v8539_v9 = vpack.c.bf16 %v81_v6, %v80_v5  ;;  %v83_v11 = vld [vmem:[#allocation2 + $0x18] sm:$0xff] }
  0x3a   :  { %6800 = vmatmul.mubr.msk.f32.vlgmr.msra.gmra.mrb[0].mxu0 %vm132_vm0, %v123_v3  ;;  %6805 = vmatmul.mubr.msk.f32.vlgmr.msra.gmra.mrb[0].mxu1 %vm132_vm0, %v123_v3  ;;  %v8544_v13 = vpack.c.bf16 %v86_v8, %v85_v7  ;;  %v8547_v14 = vpack.c.bf16 %v83_v11, %v82_v10  ;;  %v87_v15 = vld [vmem:[#allocation2 + $0x30] sm:$0xff]  ;;  %v88_v16 = vld [vmem:[#allocation2 + $0x38] sm:$0xff]  ;;  %v90_v17 = vld [vmem:[#allocation2 + $0x40] sm:$0xff] }
  0x3b   :  { %7615 = vmatprep.subr.bf16.mxu1 %v8406_v12  ;;  %6807 = vmatprep.subr.mxu0 %v6295_v4  ;;  %v91_v18 = vld [vmem:[#allocation2 + $0x48] sm:$0xff]  ;;  %v8556_v20 = vpack.c.bf16 %v88_v16, %v87_v15  ;;  %v92_v22 = vld [vmem:[#allocation2 + $0x50] sm:$0xff]  ;;  %v93_v23 = vld [vmem:[#allocation2 + $0x58] sm:$0xff] }
  0x3c   :  { %7617 = vmatpush3.bf16.msra.mxu1 %v8539_v9  ;;  %6808 = vmatpush3.msra.mxu0 %v6295_v4  ;;  %v8560_v21 = vpack.c.bf16 %v91_v18, %v90_v17  ;;  %v8568_v24 = vpack.c.bf16 %v93_v23, %v92_v22  ;;  %v108_v25 = vld [vmem:[#allocation7] sm:$0xff]  ;;  %v109_v26 = vld [vmem:[#allocation7 + $0x8] sm:$0xff]  ;;  %v110_v30 = vld [vmem:[#allocation7 + $0x10] sm:$0xff] }
  0x3d   :  { %6809 = vmatprep.mubr.msk.f32.mxu0 %vm132_vm0, %v122_v2  ;;  %7621 = vmatprep.subr.bf16.mxu0 %v8406_v12  ;;  %v113_v27 = vld [vmem:[#allocation7 + $0x20] sm:$0xff]  ;;  %v8582_v28 = vpack.c.bf16 %v109_v26, %v108_v25  ;;  %v114_v29 = vld [vmem:[#allocation7 + $0x28] sm:$0xff]  ;;  %v111_v31 = vld [vmem:[#allocation7 + $0x18] sm:$0xff] }
  0x3e   :  { %6810 = vmatmul.mubr.msk.f32.vlgmr.msra.gmra.mrb[2].mxu0 %vm132_vm0, %v123_v3  ;;  %7618 = vmatprep.subr.bf16.mxu1 %v8406_v12  ;;  %v8584_v32 = vpack.c.bf16 %v114_v29, %v113_v27  ;;  %v115_v33 = vld [vmem:[#allocation7 + $0x30] sm:$0xff]  ;;  %v116_v34 = vld [vmem:[#allocation7 + $0x38] sm:$0xff]  ;;  %v8587_v35 = vpack.c.bf16 %v111_v31, %v110_v30  ;;  %v94_v37 = vld [vmem:[#allocation5] sm:$0xff] }
  0x3f   :  { %7623 = vmatpush3.bf16.msra.mxu0 %v8544_v13  ;;  %6820 = vmatprep.mubr.msk.f32.mxu1 %vm8407_vm1, %v8408_v19  ;;  %v8591_v36 = vpack.c.bf16 %v116_v34, %v115_v33  ;;  %v95_v38 = vld [vmem:[#allocation5 + $0x8] sm:$0xff]  ;;  %v99_v39 = vld [vmem:[#allocation5 + $0x20] sm:$0xff]  ;;  %v96_v43 = vld [vmem:[#allocation5 + $0x10] sm:$0xff] }
  0x40   :  { %7620 = vmatpush3.bf16.msra.mxu1 %v8547_v14  ;;  %7624 = vmatprep.subr.bf16.mxu0 %v8406_v12  ;;  %v100_v40 = vld [vmem:[#allocation5 + $0x28] sm:$0xff]  ;;  %v8595_v41 = vpack.c.bf16 %v95_v38, %v94_v37  ;;  %v97_v44 = vld [vmem:[#allocation5 + $0x18] sm:$0xff]  ;;  %v101_v45 = vld [vmem:[#allocation5 + $0x30] sm:$0xff] }
  0x41   :  { %6831 = vmatprep.mubr.msk.f32.mxu0 %vm8407_vm1, %v8408_v19  ;;  %7627 = vmatprep.subr.bf16.mxu1 %v8406_v12  ;;  %v8599_v42 = vpack.c.bf16 %v100_v40, %v99_v39  ;;  %v102_v46 = vld [vmem:[#allocation5 + $0x38] sm:$0xff]  ;;  %v8605_v47 = vpack.c.bf16 %v97_v44, %v96_v43  ;;  %v6287_v54 = vld [vmem:[%s9389_s3] ss:$0 sm:$0xff]  ;;  %v6292_v59 = vld [vmem:[%s9389_s3 + $0x1] ss:$0 sm:$0xff] }
  0x42   :  { %v8609_v48 = vpack.c.bf16 %v102_v46, %v101_v45  ;;  %v8641_v27 = vld [vmem:[%s9390_s4] ss:$0 sm:$0xff]  ;;  %v6297_v37 = vld [vmem:[%s9389_s3 + $0x2] ss:$0 sm:$0xff]  ;;  %s6277_s3 = sshll.u32 %s8409_s12, 4  ;;  %s6278_s3 = int_to_ptr.vmem [resolvable:$true] %s6277_s3 }
  0x43   :  { %6821 = vmatmul.mubr.f32.vlgmr.msra.gmra.mrb[2].mxu1 %v8408_v19  ;;  %7626 = vmatpush3.bf16.msra.mxu0 %v8556_v20  ;;  %s8373_s13 = scalar_lea.vmem %s6278_s3, 32  ;;  %p8378_p11 = scmp.lt.s32.totalorder %s6278_s3, %s6278_s3 }
  0x44   :  { %7629 = vmatpush3.bf16.msra.mxu1 %v8560_v21  ;;  %6842 = vmatprep.mubr.msk.f32.mxu1 %vm8407_vm1, %v8408_v19  ;;  %p8374_p10 = scmp.ne.s32.totalorder %s6278_s3, %s8373_s13  ;;  %p8379_p12 = scmp.lt.s32.totalorder %s8373_s13, %s8373_s13 }
  0x45   :  { %7630 = vmatprep.subr.bf16.mxu1 %v8406_v12  ;;  %7633 = vmatprep.subr.bf16.mxu0 %v8406_v12 }
  0x46   :  { %6832 = vmatmul.mubr.f32.vlgmr.msra.gmra.mrb[4].mxu0 %v8408_v19  ;;  %p8380_p13 = por %p8379_p12, %p8378_p11 }
  0x47   :  { %6853 = vmatprep.mubr.msk.f32.mxu0 %vm8407_vm1, %v8408_v19  ;;  %7635 = vmatpush3.bf16.msra.mxu0 %v8582_v28 }
  0x48   :  { %7632 = vmatpush3.bf16.msra.mxu1 %v8568_v24  ;;  %7636 = vmatprep.subr.bf16.mxu0 %v8406_v12  ;;  %p8381_p0 = pnand %p8380_p13, %p8374_p10 }
  0x49   :  { %7639 = vmatprep.subr.bf16.mxu1 %v8406_v12 }
  0x4b   :  { %6843 = vmatmul.mubr.f32.vlgmr.msra.gmra.mrb[4].mxu1 %v8408_v19  ;;  %7638 = vmatpush3.bf16.msra.mxu0 %v8587_v35 }
  0x4c   :  { %6864 = vmatprep.mubr.msk.f32.mxu1 %vm8407_vm1, %v8408_v19  ;;  %7641 = vmatpush3.bf16.msra.mxu1 %v8584_v32 }
  0x4d   :  { %7642 = vmatprep.subr.bf16.mxu1 %v8406_v12  ;;  %7645 = vmatprep.subr.bf16.mxu0 %v8406_v12 }
  0x4e   :  { %6854 = vmatmul.mubr.f32.vlgmr.msra.gmra.mrb[6].mxu0 %v8408_v19 }
  0x4f   :  { %7647 = vmatpush3.bf16.msra.mxu0 %v8595_v41  ;;  %6875 = vmatprep.mubr.msk.f32.mxu0 %vm8407_vm1, %v8408_v19 }
  0x50   :  { %7644 = vmatpush3.bf16.msra.mxu1 %v8591_v36  ;;  %7648 = vmatprep.subr.bf16.mxu0 %v8406_v12 }
  0x51   :  { %7651 = vmatprep.subr.bf16.mxu1 %v8406_v12 }
  0x53   :  { %6865 = vmatmul.mubr.f32.vlgmr.msra.gmra.mrb[6].mxu1 %v8408_v19  ;;  %7650 = vmatpush3.bf16.msra.mxu0 %v8605_v47 }
  0x54   :  { %7653 = vmatpush3.bf16.msra.mxu1 %v8599_v42  ;;  %6886 = vmatprep.mubr.msk.f32.mxu1 %vm8407_vm1, %v8408_v19 }
  0x55   :  { %7654 = vmatprep.subr.bf16.mxu1 %v8406_v12  ;;  %7657 = vmatprep.subr.bf16.mxu0 %v8406_v12 }
  0x58   :  { %7656 = vmatpush3.bf16.msra.mxu1 %v8609_v48 }
  0x59   :  { %7663 = vmatprep.subr.bf16.mxu1 %v8406_v12 }
 0x10d   :  { %v6806_v49 = vpop.f32.mrb[0].mxu1  ;;  %v6801_v50 = vpop.f32.mrb[0].mxu0 }
 0x10e   :  { %v290_v51 = vpop.f32.mrb[1].mxu1  ;;  %v205_v52 = vpop.f32.mrb[1].mxu0  ;;  %v8623_v56 = vadd.f32 %v6801_v50, %v6287_v54  ;;  %v8634_v6 = vadd.f32 %v6806_v49, %v6292_v59 }
 0x10f   :  { %v8625_v57 = vadd.f32 %v6287_v54, %v205_v52  ;;  %v8632_v2 = vadd.f32 %v6292_v59, %v290_v51 }
 0x111   :  { %v6811_v53 = vpop.f32.mrb[2].mxu0 }
 0x112   :  { %v375_v55 = vpop.f32.mrb[3].mxu0  ;;  %v8649_v46 = vadd.f32 %v6811_v53, %v6297_v37  ;;  %v104_v53 = vld [vmem:[#allocation5 + $0x40] sm:$0xff] }
 0x113   :  { %v8647_v44 = vadd.f32 %v6297_v37, %v375_v55 }
 0x116   :  { %v491_v58 = vpop.f32.mrb[2].mxu1 }
 0x117   :  { %v566_v60 = vrot.slane %v491_v58, 1  ;;  %v567_v61 = vrot.slane %v491_v58, 2  ;;  %v6822_v62 = vpop.f32.mrb[3].mxu1 }
 0x119   :  { %v570_v63 = vadd.f32 %v566_v60, %v8625_v57  ;;  %v571_v0 = vadd.f32 %v567_v61, %v8623_v56  ;;  %v561_v1 = vpop.f32.mrb[4].mxu0 }
 0x11a   :  { %v585_v3 = vrot.slane %v561_v1, 1  ;;  %v586_v4 = vrot.slane %v561_v1, 2  ;;  %v6833_v5 = vpop.f32.mrb[5].mxu0 }
 0x11b   :  { %v6307_v7 = vmul.f32 -1.442695, %v570_v63  ;;  %v6308_v8 = vmul.f32 -1.442695, %v571_v0  ;;  %v119_v5 = vld [vmem:[#allocation7 + $0x48] sm:$0xff] }
 0x11c   :  { %v589_v10 = vadd.f32 %v585_v3, %v8632_v2  ;;  %v590_v11 = vadd.f32 %v586_v4, %v8634_v6  ;;  %v105_v3 = vld [vmem:[#allocation5 + $0x48] sm:$0xff]  ;;  %v118_v4 = vld [vmem:[#allocation7 + $0x40] sm:$0xff] }
 0x11d   :  { %8062 = vpow2.f32 %v6307_v7 }
 0x11e   :  { %8064 = vpow2.f32 %v6308_v8  ;;  %v669_v15 = vpop.f32.mrb[4].mxu1  ;;  %v6309_v17 = vmul.f32 -1.442695, %v589_v10  ;;  %v6310_v18 = vmul.f32 -1.442695, %v590_v11  ;;  %v8659_v11 = vpack.c.bf16 %v105_v3, %v104_v53 }
 0x11f   :  { %v6844_v16 = vpop.f32.mrb[5].mxu1  ;;  %v670_v29 = vadd.f32 %v8641_v27, %v669_v15  ;;  %v8661_v15 = vpack.c.bf16 %v119_v5, %v118_v4 }
 0x120   :  { %8066 = vpow2.f32 %v6309_v17  ;;  %v106_v16 = vld [vmem:[#allocation5 + $0x50] sm:$0xff]  ;;  %v107_v17 = vld [vmem:[#allocation5 + $0x58] sm:$0xff] }
 0x121   :  { %8068 = vpow2.f32 %v6310_v18  ;;  %v674_v34 = vrot.slane %v670_v29, 1  ;;  %v675_v39 = vrot.slane %v670_v29, 2  ;;  %v120_v18 = vld [vmem:[#allocation7 + $0x50] sm:$0xff]  ;;  %v758_v29 = vpop.f32.mrb[6].mxu0 }
 0x127   :  { %v8063_v22 = vpop.eup %8062 }
 0x128   :  { %v8065_v23 = vpop.eup %8064  ;;  %v578_v25 = vadd.f32 1.0, %v8063_v22  ;;  %v121_v22 = vld [vmem:[#allocation7 + $0x58] sm:$0xff] }
 0x129   :  { %v579_v26 = vadd.f32 1.0, %v8065_v23 }
 0x12a   :  { %8070 = vrcp.f32 %v578_v25  ;;  %v8067_v30 = vpop.eup %8066  ;;  %v8668_v25 = vpack.c.bf16 %v107_v17, %v106_v16 }
 0x12b   :  { %8072 = vrcp.f32 %v579_v26  ;;  %v8069_v31 = vpop.eup %8068  ;;  %v597_v33 = vadd.f32 1.0, %v8067_v30  ;;  %v8670_v26 = vpack.c.bf16 %v121_v22, %v120_v18  ;;  %v6855_v30 = vpop.f32.mrb[7].mxu0 }
 0x12c   :  { %v598_v38 = vadd.f32 1.0, %v8069_v31  ;;  %v828_v31 = vpop.f32.mrb[6].mxu1 }
 0x12d   :  { %8074 = vrcp.f32 %v597_v33  ;;  %v6866_v33 = vpop.f32.mrb[7].mxu1 }
 0x12e   :  { %8076 = vrcp.f32 %v598_v38 }
 0x134   :  { %v8071_v40 = vpop.eup %8070 }
 0x135   :  { %v8073_v43 = vpop.eup %8072  ;;  %v678_v45 = vmul.f32 %v8071_v40, %v674_v34  ;;  %v8720_v34 = vld [vmem:[%s9393_s7] ss:$0 sm:$0xff] }
 0x136   :  { %v679_v49 = vmul.f32 %v8073_v43, %v675_v39 }
 0x137   :  { %v680_v50 = vadd.f32 %v678_v45, %v8647_v44  ;;  %v8075_v52 = vpop.eup %8074 }
 0x138   :  { %v681_v51 = vadd.f32 %v679_v49, %v8649_v46  ;;  %v8077_v54 = vpop.eup %8076  ;;  %v684_v58 = vsub.f32 1.0, %v8075_v52  ;;  %v688_v62 = vmul.f32 0.0, %v8075_v52 }
 0x139   :  { %8078 = vtanh.f32 %v680_v50  ;;  %v685_v60 = vsub.f32 1.0, %v8077_v54  ;;  %v689_v0 = vmul.f32 0.0, %v8077_v54  ;;  %v8726_v50 = vld [vmem:[%s9393_s7 + $0x1] ss:$0 sm:$0xff] }
 0x13a   :  { %8080 = vtanh.f32 %v681_v51 }
 0x143   :  { %v8079_v59 = vpop.eup %8078 }
 0x144   :  { %v8081_v61 = vpop.eup %8080  ;;  %v686_v55 = vmul.f32 %v8079_v59, %v684_v58 }
 0x145   :  { %v687_v63 = vmul.f32 %v8081_v61, %v685_v60 }
 0x146   :  { %v8653_v1 = vadd.f32 %v688_v62, %v686_v55 }
 0x147   :  { %v8655_v7 = vadd.f32 %v689_v0, %v687_v63 }
 0x148   :  { %v834_v8 = vrot.slane %v8653_v1, 7 }
 0x149   :  { %v835_v10 = vrot.slane %v8655_v7, 6 }
 0x14b   :  { %v837_v23 = vsel %vm836_vm2, %v835_v10, %v834_v8 }
 0x14c   :  { %6876 = vmatmul.mubr.msk.f32.vlgmr.msra.gmra.mrb[8].mxu0 %vm421_vm3, %v837_v23  ;;  %6887 = vmatmul.mubr.msk.f32.vlgmr.msra.gmra.mrb[8].mxu1 %vm421_vm3, %v837_v23 }
 0x14d   :  { %7659 = vmatpush3.bf16.msra.mxu0 %v8659_v11  ;;  %7665 = vmatpush3.bf16.msra.mxu1 %v8661_v15 }
 0x14e   :  { %7660 = vmatprep.subr.bf16.mxu0 %v8406_v12  ;;  %7666 = vmatprep.subr.bf16.mxu1 %v8406_v12 }
 0x14f   :  { %6897 = vmatprep.mubr.msk.f32.mxu0 %vm8407_vm1, %v8408_v19  ;;  %6908 = vmatprep.mubr.msk.f32.mxu1 %vm8407_vm1, %v8408_v19 }
 0x151   :  { %7662 = vmatpush3.bf16.msra.mxu0 %v8668_v25  ;;  %7668 = vmatpush3.bf16.msra.mxu1 %v8670_v26 }
 0x152   :  { %7669 = vmatprep.subr.bf16.mxu0 %v8406_v12  ;;  %7675 = vmatprep.subr.bf16.mxu1 %v8406_v12 }
 0x154   :  { %6898 = vmatmul.mubr.msk.f32.vlgmr.msra.gmra.mrb[10].mxu0 %vm421_vm3, %v837_v23  ;;  %6909 = vmatmul.mubr.f32.vlgmr.msra.gmra.mrb[10].mxu1 %v8408_v19 }
 0x155   :  { %7671 = vmatpush3.bf16.msra.mxu0 %v8539_v9  ;;  %7677 = vmatpush3.bf16.msra.mxu1 %v8544_v13 }
 0x156   :  { %7672 = vmatprep.subr.bf16.mxu0 %v8406_v12  ;;  %7678 = vmatprep.subr.bf16.mxu1 %v8406_v12 }
 0x157   :  { %6919 = vmatprep.mubr.msk.f32.mxu0 %vm8407_vm1, %v8408_v19  ;;  %6930 = vmatprep.mubr.msk.f32.mxu1 %vm8407_vm1, %v8408_v19 }
 0x159   :  { %7674 = vmatpush3.bf16.msra.mxu0 %v8547_v14  ;;  %7680 = vmatpush3.bf16.msra.mxu1 %v8556_v20 }
 0x15a   :  { %7681 = vmatprep.subr.bf16.mxu0 %v8406_v12  ;;  %7687 = vmatprep.subr.bf16.mxu1 %v8406_v12 }
 0x15c   :  { %6920 = vmatmul.mubr.msk.f32.vlgmr.msra.gmra.mrb[12].mxu0 %vm421_vm3, %v837_v23  ;;  %6931 = vmatmul.mubr.msk.f32.vlgmr.msra.gmra.mrb[12].mxu1 %vm421_vm3, %v837_v23 }
 0x15d   :  { %7683 = vmatpush3.bf16.msra.mxu0 %v8560_v21  ;;  %6941 = vmatprep.mubr.msk.f32.mxu0 %vm8407_vm1, %v8408_v19 }
 0x15e   :  { %7684 = vmatprep.subr.bf16.mxu0 %v8406_v12  ;;  %7689 = vmatpush3.bf16.msra.mxu1 %v8582_v28 }
 0x15f   :  { %7690 = vmatprep.subr.bf16.mxu1 %v8406_v12  ;;  %6952 = vmatprep.mubr.msk.f32.mxu1 %vm8407_vm1, %v8408_v19 }
 0x161   :  { %7686 = vmatpush3.bf16.msra.mxu0 %v8568_v24 }
 0x162   :  { %7693 = vmatprep.subr.bf16.mxu0 %v8406_v12  ;;  %7692 = vmatpush3.bf16.msra.mxu1 %v8587_v35 }
 0x163   :  { %7699 = vmatprep.subr.bf16.mxu1 %v8406_v12 }
 0x164   :  { %6942 = vmatmul.mubr.msk.f32.vlgmr.msra.gmra.mrb[14].mxu0 %vm421_vm3, %v837_v23 }
 0x165   :  { %7695 = vmatpush3.bf16.msra.mxu0 %v8584_v32  ;;  %6963 = vmatprep.mubr.msk.f32.mxu0 %vm8407_vm1, %v8408_v19 }
 0x166   :  { %7696 = vmatprep.subr.bf16.mxu0 %v8406_v12 }
 0x169   :  { %7698 = vmatpush3.bf16.msra.mxu0 %v8591_v36 }
 0x16a   :  { %7705 = vmatprep.subr.bf16.mxu0 %v8406_v12 }
 0x21f   :  { %v906_v37 = vpop.f32.mrb[8].mxu0  ;;  %v983_v38 = vpop.f32.mrb[8].mxu1 }
 0x220   :  { %v907_v39 = vadd.f32 %v906_v37, %v758_v29  ;;  %v984_v40 = vadd.f32 %v983_v38, %v828_v31  ;;  %v6877_v43 = vpop.f32.mrb[9].mxu0  ;;  %v6888_v45 = vpop.f32.mrb[9].mxu1 }
 0x221   :  { %v8741_v43 = vld [vmem:[%s9393_s7 + $0x2] ss:$0 sm:$0xff] }
 0x222   :  { %v910_v49 = vadd.f32 %v8720_v34, %v907_v39  ;;  %v987_v52 = vadd.f32 %v8726_v50, %v984_v40  ;;  %v8736_v39 = vld [vmem:[%s9394_s8] ss:$0 sm:$0xff] }
 0x224   :  { %v6312_v51 = vmul.f32 -1.442695, %v910_v49  ;;  %v6314_v61 = vmul.f32 -1.442695, %v987_v52 }
 0x226   :  { %8082 = vpow2.f32 %v6312_v51 }
 0x227   :  { %v1060_v54 = vpop.f32.mrb[10].mxu0  ;;  %v1130_v58 = vpop.f32.mrb[10].mxu1  ;;  %8084 = vpow2.f32 %v6314_v61 }
 0x228   :  { %v6899_v59 = vpop.f32.mrb[11].mxu0  ;;  %v6910_v60 = vpop.f32.mrb[11].mxu1  ;;  %v1131_v45 = vadd.f32 %v8736_v39, %v1130_v58  ;;  %v1061_v51 = vadd.f32 %v8741_v43, %v1060_v54 }
 0x22f   :  { %v1207_v55 = vpop.f32.mrb[12].mxu0  ;;  %v1277_v62 = vpop.f32.mrb[12].mxu1 }
 0x230   :  { %v8083_v63 = vpop.eup %8082  ;;  %v1282_v0 = vrot.slane %v1207_v55, 2  ;;  %v1283_v53 = vrot.slane %v1207_v55, 3  ;;  %v1301_v3 = vrot.slane %v1277_v62, 2  ;;  %v1302_v4 = vrot.slane %v1277_v62, 3  ;;  %v6921_v5 = vpop.f32.mrb[13].mxu0 }
 0x231   :  { %v6932_v8 = vpop.f32.mrb[13].mxu1  ;;  %v914_v10 = vadd.f32 1.0, %v8083_v63  ;;  %v8085_v33 = vpop.eup %8084 }
 0x232   :  { %v1286_v16 = vadd.f32 %v1282_v0, %v8625_v57  ;;  %v1287_v17 = vadd.f32 %v1283_v53, %v8623_v56  ;;  %v1305_v18 = vadd.f32 %v1301_v3, %v8632_v2  ;;  %v1306_v22 = vadd.f32 %v1302_v4, %v8634_v6 }
 0x233   :  { %8086 = vrcp.f32 %v914_v10  ;;  %v991_v40 = vadd.f32 1.0, %v8085_v33 }
 0x234   :  { %v6318_v23 = vmul.f32 -1.442695, %v1286_v16  ;;  %v6319_v29 = vmul.f32 -1.442695, %v1287_v17  ;;  %v6320_v30 = vmul.f32 -1.442695, %v1305_v18 }
 0x235   :  { %v6321_v31 = vmul.f32 -1.442695, %v1306_v22 }
 0x236   :  { %8088 = vpow2.f32 %v6318_v23  ;;  %v1404_v23 = vrot.slane %v8653_v1, 1 }
 0x237   :  { %8090 = vpow2.f32 %v6319_v29  ;;  %v1385_v37 = vpop.f32.mrb[14].mxu0 }
 0x238   :  { %8092 = vpow2.f32 %v6320_v30  ;;  %v6943_v38 = vpop.f32.mrb[15].mxu0  ;;  %v1386_v4 = vadd.f32 %v8641_v27, %v1385_v37 }
 0x239   :  { %8094 = vpow2.f32 %v6321_v31  ;;  %v1405_v31 = vrot.slane %v8655_v7, 1 }
 0x23a   :  { %8096 = vrcp.f32 %v991_v40  ;;  %v1390_v8 = vrot.slane %v1386_v4, 2  ;;  %v1391_v16 = vrot.slane %v1386_v4, 3 }
 0x23d   :  { %v8087_v49 = vpop.eup %8086 }
 0x23e   :  { %v1134_v52 = vmul.f32 %v8087_v49, %v1131_v45 }
 0x240   :  { %v8089_v59 = vpop.eup %8088  ;;  %v1135_v60 = vadd.f32 %v1134_v52, %v1061_v51 }
 0x241   :  { %v8091_v61 = vpop.eup %8090  ;;  %v1294_v55 = vadd.f32 1.0, %v8089_v59 }
 0x242   :  { %v8093_v62 = vpop.eup %8092  ;;  %8098 = vtanh.f32 %v1135_v60  ;;  %v1295_v63 = vadd.f32 1.0, %v8091_v61 }
 0x243   :  { %v8095_v0 = vpop.eup %8094  ;;  %8100 = vrcp.f32 %v1294_v55  ;;  %v1313_v53 = vadd.f32 1.0, %v8093_v62 }
 0x244   :  { %8102 = vrcp.f32 %v1295_v63  ;;  %v1314_v3 = vadd.f32 1.0, %v8095_v0  ;;  %v8097_v58 = vpop.eup %8096 }
 0x245   :  { %8104 = vrcp.f32 %v1313_v53  ;;  %v1137_v5 = vsub.f32 1.0, %v8097_v58  ;;  %v1139_v18 = vmul.f32 0.0, %v8097_v58 }
 0x246   :  { %8106 = vrcp.f32 %v1314_v3 }
 0x24c   :  { %v8099_v54 = vpop.eup %8098 }
 0x24d   :  { %v8101_v10 = vpop.eup %8100  ;;  %v1138_v17 = vmul.f32 %v8099_v54, %v1137_v5 }
 0x24e   :  { %v8103_v22 = vpop.eup %8102  ;;  %v1394_v29 = vmul.f32 %v8101_v10, %v1390_v8 }
 0x24f   :  { %v8105_v30 = vpop.eup %8104  ;;  %v1395_v33 = vmul.f32 %v8103_v22, %v1391_v16  ;;  %v8748_v38 = vadd.f32 %v1139_v18, %v1138_v17 }
 0x250   :  { %v8107_v40 = vpop.eup %8106  ;;  %v1396_v37 = vadd.f32 %v1394_v29, %v8647_v44  ;;  %v1408_v45 = vmul.f32 %v8105_v30, %v1404_v23  ;;  %v1400_v7 = vsub.f32 1.0, %v8105_v30 }
 0x251   :  { %v1397_v49 = vadd.f32 %v1395_v33, %v8649_v46  ;;  %6953 = vmatmul.mubr.msk.f32.vlgmr.msra.gmra.mrb[14].mxu1 %vm421_vm3, %v8748_v38  ;;  %6964 = vmatmul.mubr.msk.f32.vlgmr.msra.gmra.mrb[16].mxu0 %vm421_vm3, %v8748_v38  ;;  %v1409_v1 = vmul.f32 %v8107_v40, %v1405_v31  ;;  %v1401_v52 = vsub.f32 1.0, %v8107_v40 }
 0x252   :  { %8108 = vtanh.f32 %v1396_v37  ;;  %7701 = vmatpush3.bf16.msra.mxu1 %v8595_v41  ;;  %7707 = vmatpush3.bf16.msra.mxu0 %v8599_v42 }
 0x253   :  { %8110 = vtanh.f32 %v1397_v49  ;;  %7702 = vmatprep.subr.bf16.mxu1 %v8406_v12  ;;  %7708 = vmatprep.subr.bf16.mxu0 %v8406_v12 }
 0x254   :  { %6974 = vmatprep.mubr.msk.f32.mxu1 %vm8407_vm1, %v8408_v19  ;;  %6985 = vmatprep.mubr.msk.f32.mxu0 %vm8407_vm1, %v8408_v19 }
 0x256   :  { %7704 = vmatpush3.bf16.msra.mxu1 %v8605_v47  ;;  %7710 = vmatpush3.bf16.msra.mxu0 %v8609_v48 }
 0x257   :  { %7711 = vmatprep.subr.bf16.mxu1 %v8406_v12  ;;  %7717 = vmatprep.subr.bf16.mxu0 %v8406_v12 }
 0x25c   :  { %v8109_v51 = vpop.eup %8108 }
 0x25d   :  { %v8111_v59 = vpop.eup %8110  ;;  %v1402_v60 = vmul.f32 %v8109_v51, %v1400_v7 }
 0x25e   :  { %v1403_v61 = vmul.f32 %v8111_v59, %v1401_v52 }
 0x25f   :  { %v8768_v55 = vadd.f32 %v1408_v45, %v1402_v60 }
 0x260   :  { %v8770_v62 = vadd.f32 %v1409_v1, %v1403_v61 }
 0x261   :  { %v1557_v63 = vrot.slane %v8768_v55, 6 }
 0x262   :  { %v1558_v0 = vrot.slane %v8770_v62, 5 }
 0x264   :  { %v1559_v53 = vsel %vm836_vm2, %v1558_v0, %v1557_v63 }
 0x265   :  { %6975 = vmatmul.mubr.msk.f32.vlgmr.msra.gmra.mrb[16].mxu1 %vm421_vm3, %v1559_v53  ;;  %6986 = vmatmul.mubr.msk.f32.vlgmr.msra.gmra.mrb[18].mxu0 %vm421_vm3, %v1559_v53 }
 0x266   :  { %7713 = vmatpush3.bf16.msra.mxu1 %v8659_v11  ;;  %7719 = vmatpush3.bf16.msra.mxu0 %v8661_v15 }
 0x267   :  { %7714 = vmatprep.subr.bf16.mxu1 %v8406_v12  ;;  %7720 = vmatprep.subr.bf16.mxu0 %v8406_v12 }
 0x268   :  { %6996 = vmatprep.mubr.msk.f32.mxu1 %vm8407_vm1, %v8408_v19  ;;  %7007 = vmatprep.mubr.msk.f32.mxu0 %vm8407_vm1, %v8408_v19 }
 0x26a   :  { %7716 = vmatpush3.bf16.msra.mxu1 %v8668_v25  ;;  %7722 = vmatpush3.bf16.msra.mxu0 %v8670_v26 }
 0x26b   :  { %7723 = vmatprep.subr.bf16.mxu1 %v8406_v12  ;;  %7729 = vmatprep.subr.bf16.mxu0 %v8406_v12 }
 0x26d   :  { %6997 = vmatmul.mubr.msk.f32.vlgmr.msra.gmra.mrb[18].mxu1 %vm421_vm3, %v1559_v53  ;;  %7008 = vmatmul.mubr.msk.f32.vlgmr.msra.gmra.mrb[20].mxu0 %vm421_vm3, %v8748_v38 }
 0x26e   :  { %7725 = vmatpush3.bf16.msra.mxu1 %v8539_v9  ;;  %7731 = vmatpush3.bf16.msra.mxu0 %v8544_v13 }
 0x26f   :  { %7726 = vmatprep.subr.bf16.mxu1 %v8406_v12  ;;  %7732 = vmatprep.subr.bf16.mxu0 %v8406_v12 }
 0x270   :  { %7018 = vmatprep.mubr.msk.f32.mxu1 %vm8407_vm1, %v8408_v19  ;;  %7029 = vmatprep.mubr.msk.f32.mxu0 %vm8407_vm1, %v8408_v19 }
 0x272   :  { %7728 = vmatpush3.bf16.msra.mxu1 %v8547_v14  ;;  %7734 = vmatpush3.bf16.msra.mxu0 %v8556_v20 }
 0x273   :  { %7735 = vmatprep.subr.bf16.mxu1 %v8406_v12  ;;  %7741 = vmatprep.subr.bf16.mxu0 %v8406_v12 }
 0x275   :  { %7019 = vmatmul.mubr.msk.f32.vlgmr.msra.gmra.mrb[20].mxu1 %vm421_vm3, %v1559_v53  ;;  %7030 = vmatmul.mubr.msk.f32.vlgmr.msra.gmra.mrb[22].mxu0 %vm421_vm3, %v1559_v53 }
 0x276   :  { %7737 = vmatpush3.bf16.msra.mxu1 %v8560_v21  ;;  %7040 = vmatprep.mubr.msk.f32.mxu1 %vm8407_vm1, %v8408_v19 }
 0x277   :  { %7738 = vmatprep.subr.bf16.mxu1 %v8406_v12  ;;  %7743 = vmatpush3.bf16.msra.mxu0 %v8582_v28 }
 0x278   :  { %7744 = vmatprep.subr.bf16.mxu0 %v8406_v12  ;;  %7051 = vmatprep.mubr.msk.f32.mxu0 %vm8407_vm1, %v8408_v19 }
 0x27a   :  { %7740 = vmatpush3.bf16.msra.mxu1 %v8568_v24 }
 0x27b   :  { %7747 = vmatprep.subr.bf16.mxu1 %v8406_v12  ;;  %7746 = vmatpush3.bf16.msra.mxu0 %v8587_v35 }
 0x27c   :  { %7753 = vmatprep.subr.bf16.mxu0 %v8406_v12 }
 0x27d   :  { %7041 = vmatmul.mubr.msk.f32.vlgmr.msra.gmra.mrb[22].mxu1 %vm421_vm3, %v1559_v53 }
 0x27e   :  { %7749 = vmatpush3.bf16.msra.mxu1 %v8584_v32  ;;  %7062 = vmatprep.mubr.msk.f32.mxu1 %vm8407_vm1, %v8408_v19 }
 0x27f   :  { %7750 = vmatprep.subr.bf16.mxu1 %v8406_v12 }
 0x282   :  { %7752 = vmatpush3.bf16.msra.mxu1 %v8591_v36 }
 0x283   :  { %7759 = vmatprep.subr.bf16.mxu1 %v8406_v12 }
 0x324   :  { %v1481_v3 = vpop.f32.mrb[14].mxu1  ;;  %v1551_v58 = vpop.f32.mrb[16].mxu0 }
 0x325   :  { %v6954_v4 = vpop.f32.mrb[15].mxu1  ;;  %v6965_v5 = vpop.f32.mrb[17].mxu0 }
 0x338   :  { %v1628_v54 = vpop.f32.mrb[16].mxu1  ;;  %v1705_v8 = vpop.f32.mrb[18].mxu0 }
 0x339   :  { %v1629_v10 = vadd.f32 %v1628_v54, %v1481_v3  ;;  %v1706_v16 = vadd.f32 %v1705_v8, %v1551_v58  ;;  %v6976_v17 = vpop.f32.mrb[17].mxu1  ;;  %v6987_v18 = vpop.f32.mrb[19].mxu0 }
 0x33b   :  { %v1632_v22 = vadd.f32 %v8720_v34, %v1629_v10  ;;  %v1709_v29 = vadd.f32 %v8726_v50, %v1706_v16 }
 0x33d   :  { %v6326_v23 = vmul.f32 -1.442695, %v1632_v22  ;;  %v6328_v37 = vmul.f32 -1.442695, %v1709_v29 }
 0x33f   :  { %8112 = vpow2.f32 %v6326_v23 }
 0x340   :  { %v1782_v30 = vpop.f32.mrb[18].mxu1  ;;  %v1852_v31 = vpop.f32.mrb[20].mxu0  ;;  %8114 = vpow2.f32 %v6328_v37 }
 0x341   :  { %v6998_v33 = vpop.f32.mrb[19].mxu1  ;;  %v7009_v40 = vpop.f32.mrb[21].mxu0  ;;  %v1853_v22 = vadd.f32 %v8736_v39, %v1852_v31  ;;  %v1783_v29 = vadd.f32 %v8741_v43, %v1782_v30 }
 0x348   :  { %v1929_v45 = vpop.f32.mrb[20].mxu1  ;;  %v1999_v49 = vpop.f32.mrb[22].mxu0 }
 0x349   :  { %v8113_v1 = vpop.eup %8112  ;;  %v2004_v7 = vrot.slane %v1929_v45, 3  ;;  %v2005_v51 = vrot.slane %v1929_v45, 4  ;;  %v2023_v52 = vrot.slane %v1999_v49, 3  ;;  %v2024_v59 = vrot.slane %v1999_v49, 4  ;;  %v7020_v60 = vpop.f32.mrb[21].mxu1 }
 0x34a   :  { %v7031_v61 = vpop.f32.mrb[23].mxu0  ;;  %v1636_v63 = vadd.f32 1.0, %v8113_v1  ;;  %v8115_v10 = vpop.eup %8114 }
 0x34b   :  { %v2008_v0 = vadd.f32 %v2004_v7, %v8625_v57  ;;  %v2009_v53 = vadd.f32 %v2005_v51, %v8623_v56  ;;  %v2027_v3 = vadd.f32 %v2023_v52, %v8632_v2  ;;  %v2028_v58 = vadd.f32 %v2024_v59, %v8634_v6 }
 0x34c   :  { %8116 = vrcp.f32 %v1636_v63  ;;  %v1713_v18 = vadd.f32 1.0, %v8115_v10  ;;  %v2127_v10 = vrot.slane %v8770_v62, 1 }
 0x34d   :  { %v6333_v4 = vmul.f32 -1.442695, %v2008_v0  ;;  %v6334_v5 = vmul.f32 -1.442695, %v2009_v53  ;;  %v6335_v54 = vmul.f32 -1.442695, %v2027_v3 }
 0x34e   :  { %v6336_v8 = vmul.f32 -1.442695, %v2028_v58 }
 0x34f   :  { %8118 = vpow2.f32 %v6333_v4 }
 0x350   :  { %8120 = vpow2.f32 %v6334_v5  ;;  %v2107_v16 = vpop.f32.mrb[22].mxu1  ;;  %v2126_v5 = vrot.slane %v8768_v55, 1 }
 0x351   :  { %8122 = vpow2.f32 %v6335_v54  ;;  %v7042_v17 = vpop.f32.mrb[23].mxu1  ;;  %v2108_v60 = vadd.f32 %v8641_v27, %v2107_v16 }
 0x352   :  { %8124 = vpow2.f32 %v6336_v8 }
 0x353   :  { %8126 = vrcp.f32 %v1713_v18  ;;  %v2112_v63 = vrot.slane %v2108_v60, 3  ;;  %v2113_v53 = vrot.slane %v2108_v60, 4 }
 0x356   :  { %v8117_v23 = vpop.eup %8116 }
 0x357   :  { %v1856_v33 = vmul.f32 %v8117_v23, %v1853_v22 }
 0x359   :  { %v8119_v40 = vpop.eup %8118  ;;  %v1857_v37 = vadd.f32 %v1856_v33, %v1783_v29 }
 0x35a   :  { %v8121_v45 = vpop.eup %8120  ;;  %v2016_v49 = vadd.f32 1.0, %v8119_v40 }
 0x35b   :  { %v8123_v1 = vpop.eup %8122  ;;  %8128 = vtanh.f32 %v1857_v37  ;;  %v2017_v7 = vadd.f32 1.0, %v8121_v45 }
 0x35c   :  { %v8125_v51 = vpop.eup %8124  ;;  %8130 = vrcp.f32 %v2016_v49  ;;  %v2035_v52 = vadd.f32 1.0, %v8123_v1 }
 0x35d   :  { %8132 = vrcp.f32 %v2017_v7  ;;  %v2036_v59 = vadd.f32 1.0, %v8125_v51  ;;  %v8127_v31 = vpop.eup %8126 }
 0x35e   :  { %8134 = vrcp.f32 %v2035_v52  ;;  %v1859_v61 = vsub.f32 1.0, %v8127_v31  ;;  %v1861_v58 = vmul.f32 %v8127_v31, %v8748_v38 }
 0x35f   :  { %8136 = vrcp.f32 %v2036_v59 }
 0x365   :  { %v8129_v30 = vpop.eup %8128 }
 0x366   :  { %v8131_v0 = vpop.eup %8130  ;;  %v1860_v3 = vmul.f32 %v8129_v30, %v1859_v61 }
 0x367   :  { %v8133_v4 = vpop.eup %8132  ;;  %v2116_v54 = vmul.f32 %v8131_v0, %v2112_v63 }
 0x368   :  { %v8135_v8 = vpop.eup %8134  ;;  %v2117_v17 = vmul.f32 %v8133_v4, %v2113_v53  ;;  %v8837_v18 = vadd.f32 %v1861_v58, %v1860_v3 }
 0x369   :  { %v8137_v22 = vpop.eup %8136  ;;  %v2118_v16 = vadd.f32 %v2116_v54, %v8647_v44  ;;  %v2130_v23 = vmul.f32 %v8135_v8, %v2126_v5  ;;  %v2122_v55 = vsub.f32 1.0, %v8135_v8 }
 0x36a   :  { %v2119_v29 = vadd.f32 %v2117_v17, %v8649_v46  ;;  %7052 = vmatmul.mubr.msk.f32.vlgmr.msra.gmra.mrb[24].mxu0 %vm421_vm3, %v8837_v18  ;;  %7063 = vmatmul.mubr.msk.f32.vlgmr.msra.gmra.mrb[24].mxu1 %vm421_vm3, %v8837_v18  ;;  %v2131_v38 = vmul.f32 %v8137_v22, %v2127_v10  ;;  %v2123_v33 = vsub.f32 1.0, %v8137_v22 }
 0x36b   :  { %8138 = vtanh.f32 %v2118_v16  ;;  %7755 = vmatpush3.bf16.msra.mxu0 %v8595_v41  ;;  %7761 = vmatpush3.bf16.msra.mxu1 %v8599_v42 }
 0x36c   :  { %8140 = vtanh.f32 %v2119_v29  ;;  %7756 = vmatprep.subr.bf16.mxu0 %v8406_v12  ;;  %7762 = vmatprep.subr.bf16.mxu1 %v8406_v12 }
 0x36d   :  { %7073 = vmatprep.mubr.msk.f32.mxu0 %vm8407_vm1, %v8408_v19  ;;  %7084 = vmatprep.mubr.msk.f32.mxu1 %vm8407_vm1, %v8408_v19 }
 0x36f   :  { %7758 = vmatpush3.bf16.msra.mxu0 %v8605_v47  ;;  %7764 = vmatpush3.bf16.msra.mxu1 %v8609_v48 }
 0x370   :  { %7765 = vmatprep.subr.bf16.mxu0 %v8406_v12  ;;  %7771 = vmatprep.subr.bf16.mxu1 %v8406_v12 }
 0x375   :  { %v8139_v62 = vpop.eup %8138 }
 0x376   :  { %v8141_v40 = vpop.eup %8140  ;;  %v2124_v37 = vmul.f32 %v8139_v62, %v2122_v55 }
 0x377   :  { %v2125_v45 = vmul.f32 %v8141_v40, %v2123_v33 }
 0x378   :  { %v8857_v49 = vadd.f32 %v2130_v23, %v2124_v37 }
 0x379   :  { %v8859_v1 = vadd.f32 %v2131_v38, %v2125_v45 }
 0x37a   :  { %v2279_v7 = vrot.slane %v8857_v49, 5 }
 0x37b   :  { %v2280_v51 = vrot.slane %v8859_v1, 4 }
 0x37d   :  { %v2281_v52 = vsel %vm836_vm2, %v2280_v51, %v2279_v7 }
 0x37e   :  { %7074 = vmatmul.mubr.msk.f32.vlgmr.msra.gmra.mrb[26].mxu0 %vm421_vm3, %v2281_v52  ;;  %7085 = vmatmul.mubr.msk.f32.vlgmr.msra.gmra.mrb[26].mxu1 %vm421_vm3, %v2281_v52 }
 0x37f   :  { %7767 = vmatpush3.bf16.msra.mxu0 %v8659_v11  ;;  %7773 = vmatpush3.bf16.msra.mxu1 %v8661_v15 }
 0x380   :  { %7768 = vmatprep.subr.bf16.mxu0 %v8406_v12  ;;  %7774 = vmatprep.subr.bf16.mxu1 %v8406_v12 }
 0x381   :  { %7095 = vmatprep.mubr.msk.f32.mxu0 %vm8407_vm1, %v8408_v19  ;;  %7106 = vmatprep.mubr.msk.f32.mxu1 %vm8407_vm1, %v8408_v19 }
 0x383   :  { %7770 = vmatpush3.bf16.msra.mxu0 %v8668_v25  ;;  %7776 = vmatpush3.bf16.msra.mxu1 %v8670_v26 }
 0x384   :  { %7777 = vmatprep.subr.bf16.mxu0 %v8406_v12  ;;  %7783 = vmatprep.subr.bf16.mxu1 %v8406_v12 }
 0x386   :  { %7096 = vmatmul.mubr.msk.f32.vlgmr.msra.gmra.mrb[28].mxu0 %vm421_vm3, %v2281_v52  ;;  %7107 = vmatmul.mubr.msk.f32.vlgmr.msra.gmra.mrb[28].mxu1 %vm421_vm3, %v8837_v18 }
 0x387   :  { %7779 = vmatpush3.bf16.msra.mxu0 %v8539_v9  ;;  %7785 = vmatpush3.bf16.msra.mxu1 %v8544_v13 }
 0x388   :  { %7780 = vmatprep.subr.bf16.mxu0 %v8406_v12  ;;  %7786 = vmatprep.subr.bf16.mxu1 %v8406_v12 }
 0x389   :  { %7117 = vmatprep.mubr.msk.f32.mxu0 %vm8407_vm1, %v8408_v19  ;;  %7128 = vmatprep.mubr.msk.f32.mxu1 %vm8407_vm1, %v8408_v19 }
 0x38b   :  { %7782 = vmatpush3.bf16.msra.mxu0 %v8547_v14  ;;  %7788 = vmatpush3.bf16.msra.mxu1 %v8556_v20 }
 0x38c   :  { %7789 = vmatprep.subr.bf16.mxu0 %v8406_v12  ;;  %7795 = vmatprep.subr.bf16.mxu1 %v8406_v12 }
 0x38e   :  { %7118 = vmatmul.mubr.msk.f32.vlgmr.msra.gmra.mrb[30].mxu0 %vm421_vm3, %v2281_v52  ;;  %7129 = vmatmul.mubr.msk.f32.vlgmr.msra.gmra.mrb[30].mxu1 %vm421_vm3, %v2281_v52 }
 0x38f   :  { %7791 = vmatpush3.bf16.msra.mxu0 %v8560_v21  ;;  %7139 = vmatprep.mubr.msk.f32.mxu0 %vm8407_vm1, %v8408_v19 }
 0x390   :  { %7792 = vmatprep.subr.bf16.mxu0 %v8406_v12  ;;  %7797 = vmatpush3.bf16.msra.mxu1 %v8582_v28 }
 0x391   :  { %7798 = vmatprep.subr.bf16.mxu1 %v8406_v12  ;;  %7150 = vmatprep.mubr.msk.f32.mxu1 %vm8407_vm1, %v8408_v19 }
 0x393   :  { %7794 = vmatpush3.bf16.msra.mxu0 %v8568_v24 }
 0x394   :  { %7801 = vmatprep.subr.bf16.mxu0 %v8406_v12  ;;  %7800 = vmatpush3.bf16.msra.mxu1 %v8587_v35 }
 0x395   :  { %7807 = vmatprep.subr.bf16.mxu1 %v8406_v12 }
 0x396   :  { %7140 = vmatmul.mubr.msk.f32.vlgmr.msra.gmra.mrb[32].mxu0 %vm421_vm3, %v2281_v52 }
 0x397   :  { %7803 = vmatpush3.bf16.msra.mxu0 %v8584_v32  ;;  %7161 = vmatprep.mubr.msk.f32.mxu0 %vm8407_vm1, %v8408_v19 }
 0x398   :  { %7804 = vmatprep.subr.bf16.mxu0 %v8406_v12 }
 0x39b   :  { %7806 = vmatpush3.bf16.msra.mxu0 %v8591_v36 }
 0x39c   :  { %7813 = vmatprep.subr.bf16.mxu0 %v8406_v12 }
 0x43d   :  { %v2203_v59 = vpop.f32.mrb[24].mxu0  ;;  %v2273_v31 = vpop.f32.mrb[24].mxu1 }
 0x43e   :  { %v7053_v60 = vpop.f32.mrb[25].mxu0  ;;  %v7064_v61 = vpop.f32.mrb[25].mxu1 }
 0x451   :  { %v2350_v30 = vpop.f32.mrb[26].mxu0  ;;  %v2427_v63 = vpop.f32.mrb[26].mxu1 }
 0x452   :  { %v2351_v0 = vadd.f32 %v2350_v30, %v2203_v59  ;;  %v2428_v53 = vadd.f32 %v2427_v63, %v2273_v31  ;;  %v7075_v3 = vpop.f32.mrb[27].mxu0  ;;  %v7086_v58 = vpop.f32.mrb[27].mxu1 }
 0x454   :  { %v2354_v4 = vadd.f32 %v8720_v34, %v2351_v0  ;;  %v2431_v54 = vadd.f32 %v8726_v50, %v2428_v53 }
 0x456   :  { %v6341_v5 = vmul.f32 -1.442695, %v2354_v4  ;;  %v6343_v16 = vmul.f32 -1.442695, %v2431_v54 }
 0x458   :  { %8142 = vpow2.f32 %v6341_v5 }
 0x459   :  { %v2504_v8 = vpop.f32.mrb[28].mxu0  ;;  %v2574_v10 = vpop.f32.mrb[28].mxu1  ;;  %8144 = vpow2.f32 %v6343_v16 }
 0x45a   :  { %v7097_v17 = vpop.f32.mrb[29].mxu0  ;;  %v7108_v22 = vpop.f32.mrb[29].mxu1  ;;  %v2575_v4 = vadd.f32 %v8736_v39, %v2574_v10  ;;  %v2505_v54 = vadd.f32 %v8741_v43, %v2504_v8 }
 0x461   :  { %v2651_v23 = vpop.f32.mrb[30].mxu0  ;;  %v2721_v29 = vpop.f32.mrb[30].mxu1 }
 0x462   :  { %v8143_v38 = vpop.eup %8142  ;;  %v2726_v55 = vrot.slane %v2651_v23, 4  ;;  %v2727_v62 = vrot.slane %v2651_v23, 5  ;;  %v2745_v33 = vrot.slane %v2721_v29, 4  ;;  %v2746_v40 = vrot.slane %v2721_v29, 5  ;;  %v7119_v37 = vpop.f32.mrb[31].mxu0 }
 0x463   :  { %v7130_v45 = vpop.f32.mrb[31].mxu1  ;;  %v2358_v7 = vadd.f32 1.0, %v8143_v38  ;;  %v8145_v0 = vpop.eup %8144 }
 0x464   :  { %v2730_v51 = vadd.f32 %v2726_v55, %v8625_v57  ;;  %v2731_v52 = vadd.f32 %v2727_v62, %v8623_v56  ;;  %v2749_v59 = vadd.f32 %v2745_v33, %v8632_v2  ;;  %v2750_v31 = vadd.f32 %v2746_v40, %v8634_v6 }
 0x465   :  { %8146 = vrcp.f32 %v2358_v7  ;;  %v2435_v58 = vadd.f32 1.0, %v8145_v0  ;;  %v2849_v0 = vrot.slane %v8859_v1, 1 }
 0x466   :  { %v6348_v60 = vmul.f32 -1.442695, %v2730_v51  ;;  %v6349_v61 = vmul.f32 -1.442695, %v2731_v52  ;;  %v6350_v30 = vmul.f32 -1.442695, %v2749_v59 }
 0x467   :  { %v6351_v63 = vmul.f32 -1.442695, %v2750_v31 }
 0x468   :  { %8148 = vpow2.f32 %v6348_v60 }
 0x469   :  { %8150 = vpow2.f32 %v6349_v61  ;;  %v2829_v53 = vpop.f32.mrb[32].mxu0  ;;  %v2848_v61 = vrot.slane %v8857_v49, 1 }
 0x46a   :  { %8152 = vpow2.f32 %v6350_v30  ;;  %v7141_v3 = vpop.f32.mrb[33].mxu0  ;;  %v2830_v37 = vadd.f32 %v8641_v27, %v2829_v53 }
 0x46b   :  { %8154 = vpow2.f32 %v6351_v63 }
 0x46c   :  { %8156 = vrcp.f32 %v2435_v58  ;;  %v2834_v7 = vrot.slane %v2830_v37, 4  ;;  %v2835_v52 = vrot.slane %v2830_v37, 5 }
 0x46f   :  { %v8147_v5 = vpop.eup %8146 }
 0x470   :  { %v2578_v17 = vmul.f32 %v8147_v5, %v2575_v4 }
 0x472   :  { %v8149_v22 = vpop.eup %8148  ;;  %v2579_v16 = vadd.f32 %v2578_v17, %v2505_v54 }
 0x473   :  { %v8151_v23 = vpop.eup %8150  ;;  %v2738_v29 = vadd.f32 1.0, %v8149_v22 }
 0x474   :  { %v8153_v38 = vpop.eup %8152  ;;  %8158 = vtanh.f32 %v2579_v16  ;;  %v2739_v55 = vadd.f32 1.0, %v8151_v23 }
 0x475   :  { %v8155_v62 = vpop.eup %8154  ;;  %8160 = vrcp.f32 %v2738_v29  ;;  %v2757_v33 = vadd.f32 1.0, %v8153_v38 }
 0x476   :  { %8162 = vrcp.f32 %v2739_v55  ;;  %v2758_v40 = vadd.f32 1.0, %v8155_v62  ;;  %v8157_v10 = vpop.eup %8156 }
 0x477   :  { %8164 = vrcp.f32 %v2757_v33  ;;  %v2581_v45 = vsub.f32 1.0, %v8157_v10  ;;  %v2583_v31 = vmul.f32 %v8157_v10, %v8837_v18 }
 0x478   :  { %8166 = vrcp.f32 %v2758_v40 }
 0x47e   :  { %v8159_v8 = vpop.eup %8158 }
 0x47f   :  { %v8161_v51 = vpop.eup %8160  ;;  %v2582_v59 = vmul.f32 %v8159_v8, %v2581_v45 }
 0x480   :  { %v8163_v60 = vpop.eup %8162  ;;  %v2838_v30 = vmul.f32 %v8161_v51, %v2834_v7 }
 0x481   :  { %v8165_v63 = vpop.eup %8164  ;;  %v2839_v3 = vmul.f32 %v8163_v60, %v2835_v52  ;;  %v8926_v58 = vadd.f32 %v2583_v31, %v2582_v59 }
 0x482   :  { %v8167_v4 = vpop.eup %8166  ;;  %v2840_v27 = vadd.f32 %v2838_v30, %v8647_v44  ;;  %v2852_v53 = vmul.f32 %v8165_v63, %v2848_v61  ;;  %v2844_v49 = vsub.f32 1.0, %v8165_v63 }
 0x483   :  { %v2841_v5 = vadd.f32 %v2839_v3, %v8649_v46  ;;  %7151 = vmatmul.mubr.msk.f32.vlgmr.msra.gmra.mrb[32].mxu1 %vm421_vm3, %v8926_v58  ;;  %7162 = vmatmul.mubr.msk.f32.vlgmr.msra.gmra.mrb[34].mxu0 %vm421_vm3, %v8926_v58  ;;  %v2853_v18 = vmul.f32 %v8167_v4, %v2849_v0  ;;  %v2845_v54 = vsub.f32 1.0, %v8167_v4 }
 0x484   :  { %8168 = vtanh.f32 %v2840_v27  ;;  %7809 = vmatpush3.bf16.msra.mxu1 %v8595_v41  ;;  %7815 = vmatpush3.bf16.msra.mxu0 %v8599_v42 }
 0x485   :  { %8170 = vtanh.f32 %v2841_v5  ;;  %7810 = vmatprep.subr.bf16.mxu1 %v8406_v12  ;;  %7816 = vmatprep.subr.bf16.mxu0 %v8406_v12 }
 0x486   :  { %7172 = vmatprep.mubr.msk.f32.mxu1 %vm8407_vm1, %v8408_v19  ;;  %7183 = vmatprep.mubr.msk.f32.mxu0 %vm8407_vm1, %v8408_v19 }
 0x488   :  { %7812 = vmatpush3.bf16.msra.mxu1 %v8605_v47  ;;  %7818 = vmatpush3.bf16.msra.mxu0 %v8609_v48 }
 0x489   :  { %7819 = vmatprep.subr.bf16.mxu1 %v8406_v12  ;;  %7825 = vmatprep.subr.bf16.mxu0 %v8406_v12 }
 0x48e   :  { %v8169_v1 = vpop.eup %8168 }
 0x48f   :  { %v8171_v17 = vpop.eup %8170  ;;  %v2846_v22 = vmul.f32 %v8169_v1, %v2844_v49 }
 0x490   :  { %v2847_v16 = vmul.f32 %v8171_v17, %v2845_v54 }
 0x491   :  { %v8946_v23 = vadd.f32 %v2852_v53, %v2846_v22 }
 0x492   :  { %v8948_v29 = vadd.f32 %v2853_v18, %v2847_v16 }
 0x493   :  { %v3001_v38 = vrot.slane %v8946_v23, 4 }
 0x494   :  { %v3002_v55 = vrot.slane %v8948_v29, 3 }
 0x496   :  { %v3003_v62 = vsel %vm836_vm2, %v3002_v55, %v3001_v38 }
 0x497   :  { %7173 = vmatmul.mubr.msk.f32.vlgmr.msra.gmra.mrb[34].mxu1 %vm421_vm3, %v3003_v62  ;;  %7184 = vmatmul.mubr.msk.f32.vlgmr.msra.gmra.mrb[36].mxu0 %vm421_vm3, %v3003_v62 }
 0x498   :  { %7821 = vmatpush3.bf16.msra.mxu1 %v8659_v11  ;;  %7827 = vmatpush3.bf16.msra.mxu0 %v8661_v15 }
 0x499   :  { %7822 = vmatprep.subr.bf16.mxu1 %v8406_v12  ;;  %7828 = vmatprep.subr.bf16.mxu0 %v8406_v12 }
 0x49a   :  { %7194 = vmatprep.mubr.msk.f32.mxu1 %vm8407_vm1, %v8408_v19  ;;  %7205 = vmatprep.mubr.msk.f32.mxu0 %vm8407_vm1, %v8408_v19 }
 0x49c   :  { %7824 = vmatpush3.bf16.msra.mxu1 %v8668_v25  ;;  %7830 = vmatpush3.bf16.msra.mxu0 %v8670_v26 }
 0x49d   :  { %7831 = vmatprep.subr.bf16.mxu1 %v8406_v12  ;;  %7837 = vmatprep.subr.bf16.mxu0 %v8406_v12 }
 0x49f   :  { %7195 = vmatmul.mubr.msk.f32.vlgmr.msra.gmra.mrb[36].mxu1 %vm421_vm3, %v3003_v62  ;;  %7206 = vmatmul.mubr.msk.f32.vlgmr.msra.gmra.mrb[38].mxu0 %vm421_vm3, %v8926_v58 }
 0x4a0   :  { %7833 = vmatpush3.bf16.msra.mxu1 %v8539_v9  ;;  %7839 = vmatpush3.bf16.msra.mxu0 %v8544_v13 }
 0x4a1   :  { %7834 = vmatprep.subr.bf16.mxu1 %v8406_v12  ;;  %7840 = vmatprep.subr.bf16.mxu0 %v8406_v12 }
 0x4a2   :  { %7216 = vmatprep.mubr.msk.f32.mxu1 %vm8407_vm1, %v8408_v19  ;;  %7227 = vmatprep.mubr.msk.f32.mxu0 %vm8407_vm1, %v8408_v19 }
 0x4a4   :  { %7836 = vmatpush3.bf16.msra.mxu1 %v8547_v14  ;;  %7842 = vmatpush3.bf16.msra.mxu0 %v8556_v20 }
 0x4a5   :  { %7843 = vmatprep.subr.bf16.mxu1 %v8406_v12  ;;  %7849 = vmatprep.subr.bf16.mxu0 %v8406_v12 }
 0x4a7   :  { %7217 = vmatmul.mubr.msk.f32.vlgmr.msra.gmra.mrb[38].mxu1 %vm421_vm3, %v3003_v62  ;;  %7228 = vmatmul.mubr.msk.f32.vlgmr.msra.gmra.mrb[40].mxu0 %vm421_vm3, %v3003_v62 }
 0x4a8   :  { %7845 = vmatpush3.bf16.msra.mxu1 %v8560_v21  ;;  %7238 = vmatprep.mubr.msk.f32.mxu1 %vm8407_vm1, %v8408_v19 }
 0x4a9   :  { %7846 = vmatprep.subr.bf16.mxu1 %v8406_v12  ;;  %7851 = vmatpush3.bf16.msra.mxu0 %v8582_v28 }
 0x4aa   :  { %7852 = vmatprep.subr.bf16.mxu0 %v8406_v12  ;;  %7249 = vmatprep.mubr.msk.f32.mxu0 %vm8407_vm1, %v8408_v19 }
 0x4ac   :  { %7848 = vmatpush3.bf16.msra.mxu1 %v8568_v24 }
 0x4ad   :  { %7855 = vmatprep.subr.bf16.mxu1 %v8406_v12  ;;  %7854 = vmatpush3.bf16.msra.mxu0 %v8587_v35 }
 0x4ae   :  { %7861 = vmatprep.subr.bf16.mxu0 %v8406_v12 }
 0x4af   :  { %7239 = vmatmul.mubr.msk.f32.vlgmr.msra.gmra.mrb[40].mxu1 %vm421_vm3, %v3003_v62 }
 0x4b0   :  { %7857 = vmatpush3.bf16.msra.mxu1 %v8584_v32  ;;  %7260 = vmatprep.mubr.msk.f32.mxu1 %vm8407_vm1, %v8408_v19 }
 0x4b1   :  { %7858 = vmatprep.subr.bf16.mxu1 %v8406_v12 }
 0x4b4   :  { %7860 = vmatpush3.bf16.msra.mxu1 %v8591_v36 }
 0x4b5   :  { %7867 = vmatprep.subr.bf16.mxu1 %v8406_v12 }
 0x556   :  { %v2925_v33 = vpop.f32.mrb[32].mxu1  ;;  %v2995_v40 = vpop.f32.mrb[34].mxu0 }
 0x557   :  { %v7152_v10 = vpop.f32.mrb[33].mxu1  ;;  %v7163_v37 = vpop.f32.mrb[35].mxu0 }
 0x56a   :  { %v3072_v45 = vpop.f32.mrb[34].mxu1  ;;  %v3149_v8 = vpop.f32.mrb[36].mxu0 }
 0x56b   :  { %v3073_v7 = vadd.f32 %v3072_v45, %v2925_v33  ;;  %v3150_v51 = vadd.f32 %v3149_v8, %v2995_v40  ;;  %v7174_v52 = vpop.f32.mrb[35].mxu1  ;;  %v7185_v59 = vpop.f32.mrb[37].mxu0 }
 0x56d   :  { %v3076_v31 = vadd.f32 %v8720_v34, %v3073_v7  ;;  %v3153_v61 = vadd.f32 %v8726_v50, %v3150_v51 }
 0x56f   :  { %v6356_v60 = vmul.f32 -1.442695, %v3076_v31  ;;  %v6358_v4 = vmul.f32 -1.442695, %v3153_v61 }
 0x571   :  { %8172 = vpow2.f32 %v6356_v60 }
 0x572   :  { %v3226_v30 = vpop.f32.mrb[36].mxu1  ;;  %v3296_v63 = vpop.f32.mrb[38].mxu0  ;;  %8174 = vpow2.f32 %v6358_v4 }
 0x573   :  { %v7196_v0 = vpop.f32.mrb[37].mxu1  ;;  %v7207_v3 = vpop.f32.mrb[39].mxu0  ;;  %v3297_v51 = vadd.f32 %v8736_v39, %v3296_v63  ;;  %v3227_v59 = vadd.f32 %v8741_v43, %v3226_v30  ;;  %v9014_v43 = vld [vmem:[%s9390_s4] ss:$0 sm:$0xff] }
 0x57a   :  { %v3373_v27 = vpop.f32.mrb[38].mxu1  ;;  %v3443_v53 = vpop.f32.mrb[40].mxu0 }
 0x57b   :  { %v8173_v5 = vpop.eup %8172  ;;  %v3448_v18 = vrot.slane %v3373_v27, 5  ;;  %v3449_v49 = vrot.slane %v3373_v27, 6  ;;  %v3467_v1 = vrot.slane %v3443_v53, 5  ;;  %v3468_v54 = vrot.slane %v3443_v53, 6  ;;  %v7218_v17 = vpop.f32.mrb[39].mxu1 }
 0x57c   :  { %v7229_v22 = vpop.f32.mrb[41].mxu0  ;;  %v3080_v34 = vadd.f32 1.0, %v8173_v5  ;;  %v8175_v37 = vpop.eup %8174 }
 0x57d   :  { %v3452_v16 = vadd.f32 %v3448_v18, %v8625_v57  ;;  %v3453_v50 = vadd.f32 %v3449_v49, %v8623_v56  ;;  %v3471_v38 = vadd.f32 %v3467_v1, %v8632_v2  ;;  %v3472_v55 = vadd.f32 %v3468_v54, %v8634_v6 }
 0x57e   :  { %8176 = vrcp.f32 %v3080_v34  ;;  %v3157_v7 = vadd.f32 1.0, %v8175_v37 }
 0x57f   :  { %v6363_v62 = vmul.f32 -1.442695, %v3452_v16  ;;  %v6364_v33 = vmul.f32 -1.442695, %v3453_v50  ;;  %v6365_v40 = vmul.f32 -1.442695, %v3471_v38 }
 0x580   :  { %v6366_v10 = vmul.f32 -1.442695, %v3472_v55  ;;  %v3570_v50 = vrot.slane %v8946_v23, 1 }
 0x581   :  { %8178 = vpow2.f32 %v6363_v62  ;;  %v3571_v62 = vrot.slane %v8948_v29, 1 }
 0x582   :  { %8180 = vpow2.f32 %v6364_v33  ;;  %v3551_v45 = vpop.f32.mrb[40].mxu1 }
 0x583   :  { %8182 = vpow2.f32 %v6365_v40  ;;  %v7240_v8 = vpop.f32.mrb[41].mxu1  ;;  %v3552_v30 = vadd.f32 %v9014_v43, %v3551_v45 }
 0x584   :  { %8184 = vpow2.f32 %v6366_v10 }
 0x585   :  { %8186 = vrcp.f32 %v3157_v7  ;;  %v3556_v1 = vrot.slane %v3552_v30, 5  ;;  %v3557_v17 = vrot.slane %v3552_v30, 6 }
 0x588   :  { %v8177_v52 = vpop.eup %8176 }
 0x589   :  { %v3300_v31 = vmul.f32 %v8177_v52, %v3297_v51 }
 0x58b   :  { %v8179_v60 = vpop.eup %8178  ;;  %v3301_v61 = vadd.f32 %v3300_v31, %v3227_v59 }
 0x58c   :  { %v8181_v0 = vpop.eup %8180  ;;  %v3460_v3 = vadd.f32 1.0, %v8179_v60 }
 0x58d   :  { %v8183_v4 = vpop.eup %8182  ;;  %8188 = vtanh.f32 %v3301_v61  ;;  %v3461_v27 = vadd.f32 1.0, %v8181_v0 }
 0x58e   :  { %v8185_v53 = vpop.eup %8184  ;;  %8190 = vrcp.f32 %v3460_v3  ;;  %v3479_v5 = vadd.f32 1.0, %v8183_v4 }
 0x58f   :  { %8192 = vrcp.f32 %v3461_v27  ;;  %v3480_v18 = vadd.f32 1.0, %v8185_v53  ;;  %v8187_v39 = vpop.eup %8186 }
 0x590   :  { %8194 = vrcp.f32 %v3479_v5  ;;  %v3303_v63 = vsub.f32 1.0, %v8187_v39  ;;  %v3305_v34 = vmul.f32 %v8187_v39, %v8926_v58 }
 0x591   :  { %8196 = vrcp.f32 %v3480_v18 }
 0x597   :  { %v8189_v49 = vpop.eup %8188 }
 0x598   :  { %v8191_v54 = vpop.eup %8190  ;;  %v3304_v22 = vmul.f32 %v8189_v49, %v3303_v63 }
 0x599   :  { %v8193_v16 = vpop.eup %8192  ;;  %v3560_v38 = vmul.f32 %v8191_v54, %v3556_v1  ;;  %v9100_v54 = vld [vmem:[%s9393_s7] ss:$0 sm:$0xff] }
 0x59a   :  { %v8195_v55 = vpop.eup %8194  ;;  %v3561_v33 = vmul.f32 %v8193_v16, %v3557_v17  ;;  %v9020_v40 = vadd.f32 %v3305_v34, %v3304_v22  ;;  %v9106_v34 = vld [vmem:[%s9393_s7 + $0x1] ss:$0 sm:$0xff] }
 0x59b   :  { %v8197_v10 = vpop.eup %8196  ;;  %v3562_v37 = vadd.f32 %v3560_v38, %v8647_v44  ;;  %v3574_v45 = vmul.f32 %v8195_v55, %v3570_v50  ;;  %v3566_v23 = vsub.f32 1.0, %v8195_v55 }
 0x59c   :  { %v3563_v8 = vadd.f32 %v3561_v33, %v8649_v46  ;;  %7250 = vmatmul.mubr.msk.f32.vlgmr.msra.gmra.mrb[42].mxu0 %vm421_vm3, %v9020_v40  ;;  %7261 = vmatmul.mubr.msk.f32.vlgmr.msra.gmra.mrb[42].mxu1 %vm421_vm3, %v9020_v40  ;;  %v3575_v58 = vmul.f32 %v8197_v10, %v3571_v62  ;;  %v3567_v7 = vsub.f32 1.0, %v8197_v10 }
 0x59d   :  { %8198 = vtanh.f32 %v3562_v37  ;;  %7863 = vmatpush3.bf16.msra.mxu0 %v8595_v41  ;;  %7869 = vmatpush3.bf16.msra.mxu1 %v8599_v42 }
 0x59e   :  { %8200 = vtanh.f32 %v3563_v8  ;;  %7864 = vmatprep.subr.bf16.mxu0 %v8406_v12  ;;  %7870 = vmatprep.subr.bf16.mxu1 %v8406_v12 }
 0x59f   :  { %7271 = vmatprep.mubr.msk.f32.mxu0 %vm8407_vm1, %v8408_v19  ;;  %7282 = vmatprep.mubr.msk.f32.mxu1 %vm8407_vm1, %v8408_v19 }
 0x5a1   :  { %7866 = vmatpush3.bf16.msra.mxu0 %v8605_v47  ;;  %7872 = vmatpush3.bf16.msra.mxu1 %v8609_v48 }
 0x5a2   :  { %7873 = vmatprep.subr.bf16.mxu0 %v8406_v12  ;;  %7879 = vmatprep.subr.bf16.mxu1 %v8406_v12 }
 0x5a7   :  { %v8199_v29 = vpop.eup %8198 }
 0x5a8   :  { %v8201_v51 = vpop.eup %8200  ;;  %v3568_v52 = vmul.f32 %v8199_v29, %v3566_v23 }
 0x5a9   :  { %v3569_v59 = vmul.f32 %v8201_v51, %v3567_v7 }
 0x5aa   :  { %v9040_v31 = vadd.f32 %v3574_v45, %v3568_v52 }
 0x5ab   :  { %v9042_v60 = vadd.f32 %v3575_v58, %v3569_v59 }
 0x5ac   :  { %v3723_v61 = vrot.slane %v9040_v31, 3 }
 0x5ad   :  { %v3724_v0 = vrot.slane %v9042_v60, 2 }
 0x5af   :  { %v3725_v3 = vsel %vm836_vm2, %v3724_v0, %v3723_v61 }
 0x5b0   :  { %7272 = vmatmul.mubr.msk.f32.vlgmr.msra.gmra.mrb[44].mxu0 %vm421_vm3, %v3725_v3  ;;  %7283 = vmatmul.mubr.msk.f32.vlgmr.msra.gmra.mrb[44].mxu1 %vm421_vm3, %v3725_v3 }
 0x5b1   :  { %7875 = vmatpush3.bf16.msra.mxu0 %v8659_v11  ;;  %7881 = vmatpush3.bf16.msra.mxu1 %v8661_v15 }
 0x5b2   :  { %7876 = vmatprep.subr.bf16.mxu0 %v8406_v12  ;;  %7882 = vmatprep.subr.bf16.mxu1 %v8406_v12 }
 0x5b3   :  { %7293 = vmatprep.mubr.msk.f32.mxu0 %vm8407_vm1, %v8408_v19  ;;  %7304 = vmatprep.mubr.msk.f32.mxu1 %vm8407_vm1, %v8408_v19 }
 0x5b5   :  { %7878 = vmatpush3.bf16.msra.mxu0 %v8668_v25  ;;  %7884 = vmatpush3.bf16.msra.mxu1 %v8670_v26 }
 0x5b6   :  { %7885 = vmatprep.subr.bf16.mxu0 %v8406_v12  ;;  %7891 = vmatprep.subr.bf16.mxu1 %v8406_v12 }
 0x5b8   :  { %7294 = vmatmul.mubr.msk.f32.vlgmr.msra.gmra.mrb[46].mxu0 %vm421_vm3, %v3725_v3  ;;  %7305 = vmatmul.mubr.msk.f32.vlgmr.msra.gmra.mrb[46].mxu1 %vm421_vm3, %v9020_v40 }
 0x5b9   :  { %7887 = vmatpush3.bf16.msra.mxu0 %v8539_v9  ;;  %7893 = vmatpush3.bf16.msra.mxu1 %v8544_v13 }
 0x5ba   :  { %7888 = vmatprep.subr.bf16.mxu0 %v8406_v12  ;;  %7894 = vmatprep.subr.bf16.mxu1 %v8406_v12 }
 0x5bb   :  { %7315 = vmatprep.mubr.msk.f32.mxu0 %vm8407_vm1, %v8408_v19  ;;  %7326 = vmatprep.mubr.msk.f32.mxu1 %vm8407_vm1, %v8408_v19 }
 0x5bd   :  { %7890 = vmatpush3.bf16.msra.mxu0 %v8547_v14  ;;  %7896 = vmatpush3.bf16.msra.mxu1 %v8556_v20 }
 0x5be   :  { %7897 = vmatprep.subr.bf16.mxu0 %v8406_v12  ;;  %7903 = vmatprep.subr.bf16.mxu1 %v8406_v12 }
 0x5c0   :  { %7316 = vmatmul.mubr.msk.f32.vlgmr.msra.gmra.mrb[48].mxu0 %vm421_vm3, %v3725_v3  ;;  %7327 = vmatmul.mubr.msk.f32.vlgmr.msra.gmra.mrb[48].mxu1 %vm421_vm3, %v3725_v3 }
 0x5c1   :  { %7899 = vmatpush3.bf16.msra.mxu0 %v8560_v21  ;;  %7337 = vmatprep.mubr.msk.f32.mxu0 %vm8407_vm1, %v8408_v19 }
 0x5c2   :  { %7900 = vmatprep.subr.bf16.mxu0 %v8406_v12  ;;  %7905 = vmatpush3.bf16.msra.mxu1 %v8582_v28 }
 0x5c3   :  { %7906 = vmatprep.subr.bf16.mxu1 %v8406_v12  ;;  %7348 = vmatprep.mubr.msk.f32.mxu1 %vm8407_vm1, %v8408_v19 }
 0x5c5   :  { %7902 = vmatpush3.bf16.msra.mxu0 %v8568_v24 }
 0x5c6   :  { %7909 = vmatprep.subr.bf16.mxu0 %v8406_v12  ;;  %7908 = vmatpush3.bf16.msra.mxu1 %v8587_v35 }
 0x5c7   :  { %7915 = vmatprep.subr.bf16.mxu1 %v8406_v12 }
 0x5c8   :  { %7338 = vmatmul.mubr.msk.f32.vlgmr.msra.gmra.mrb[50].mxu0 %vm421_vm3, %v3725_v3 }
 0x5c9   :  { %7911 = vmatpush3.bf16.msra.mxu0 %v8584_v32  ;;  %7359 = vmatprep.mubr.msk.f32.mxu0 %vm8407_vm1, %v8408_v19 }
 0x5ca   :  { %7912 = vmatprep.subr.bf16.mxu0 %v8406_v12 }
 0x5cd   :  { %7914 = vmatpush3.bf16.msra.mxu0 %v8591_v36 }
 0x5ce   :  { %7921 = vmatprep.subr.bf16.mxu0 %v8406_v12 }
 0x66f   :  { %v3647_v4 = vpop.f32.mrb[42].mxu0  ;;  %v3717_v27 = vpop.f32.mrb[42].mxu1 }
 0x670   :  { %v7251_v53 = vpop.f32.mrb[43].mxu0  ;;  %v7262_v5 = vpop.f32.mrb[43].mxu1 }
 0x683   :  { %v3794_v18 = vpop.f32.mrb[44].mxu0  ;;  %v3871_v39 = vpop.f32.mrb[44].mxu1 }
 0x684   :  { %v3795_v30 = vadd.f32 %v3794_v18, %v3647_v4  ;;  %v3872_v63 = vadd.f32 %v3871_v39, %v3717_v27  ;;  %v7273_v49 = vpop.f32.mrb[45].mxu0  ;;  %v7284_v1 = vpop.f32.mrb[45].mxu1 }
 0x685   :  { %v9116_v49 = vld [vmem:[%s9394_s8] ss:$0 sm:$0xff] }
 0x686   :  { %v3798_v17 = vadd.f32 %v9100_v54, %v3795_v30  ;;  %v3875_v16 = vadd.f32 %v9106_v34, %v3872_v63 }
 0x688   :  { %v6371_v22 = vmul.f32 -1.442695, %v3798_v17  ;;  %v6373_v33 = vmul.f32 -1.442695, %v3875_v16 }
 0x68a   :  { %8202 = vpow2.f32 %v6371_v22  ;;  %v9122_v22 = vld [vmem:[%s9393_s7 + $0x2] ss:$0 sm:$0xff] }
 0x68b   :  { %v3948_v50 = vpop.f32.mrb[46].mxu0  ;;  %v4018_v38 = vpop.f32.mrb[46].mxu1  ;;  %8204 = vpow2.f32 %v6373_v33 }
 0x68c   :  { %v7295_v55 = vpop.f32.mrb[47].mxu0  ;;  %v7306_v62 = vpop.f32.mrb[47].mxu1  ;;  %v4019_v1 = vadd.f32 %v9116_v49, %v4018_v38  ;;  %v3949_v16 = vadd.f32 %v9122_v22, %v3948_v50 }
 0x693   :  { %v4095_v10 = vpop.f32.mrb[48].mxu0  ;;  %v4165_v37 = vpop.f32.mrb[48].mxu1 }
 0x694   :  { %v8203_v45 = vpop.eup %8202  ;;  %v4170_v8 = vrot.slane %v4095_v10, 6  ;;  %v4171_v58 = vrot.slane %v4095_v10, 7  ;;  %v4189_v23 = vrot.slane %v4165_v37, 6  ;;  %v4190_v29 = vrot.slane %v4165_v37, 7  ;;  %v7317_v7 = vpop.f32.mrb[49].mxu0 }
 0x695   :  { %v7328_v51 = vpop.f32.mrb[49].mxu1  ;;  %v3802_v52 = vadd.f32 1.0, %v8203_v45  ;;  %v8205_v18 = vpop.eup %8204 }
 0x696   :  { %v4174_v59 = vadd.f32 %v4170_v8, %v8625_v57  ;;  %v4175_v61 = vadd.f32 %v4171_v58, %v8623_v56  ;;  %v4193_v0 = vadd.f32 %v4189_v23, %v8632_v2  ;;  %v4194_v3 = vadd.f32 %v4190_v29, %v8634_v6 }
 0x697   :  { %8206 = vrcp.f32 %v3802_v52  ;;  %v3879_v63 = vadd.f32 1.0, %v8205_v18  ;;  %v4293_v18 = vrot.slane %v9042_v60, 1 }
 0x698   :  { %v6378_v4 = vmul.f32 -1.442695, %v4174_v59  ;;  %v6379_v27 = vmul.f32 -1.442695, %v4175_v61  ;;  %v6380_v53 = vmul.f32 -1.442695, %v4193_v0 }
 0x699   :  { %v6381_v5 = vmul.f32 -1.442695, %v4194_v3 }
 0x69a   :  { %8208 = vpow2.f32 %v6378_v4 }
 0x69b   :  { %8210 = vpow2.f32 %v6379_v27  ;;  %v4273_v39 = vpop.f32.mrb[50].mxu0  ;;  %v4292_v27 = vrot.slane %v9040_v31, 1 }
 0x69c   :  { %8212 = vpow2.f32 %v6380_v53  ;;  %v7339_v30 = vpop.f32.mrb[51].mxu0  ;;  %v4274_v7 = vadd.f32 %v9014_v43, %v4273_v39 }
 0x69d   :  { %8214 = vpow2.f32 %v6381_v5 }
 0x69e   :  { %8216 = vrcp.f32 %v3879_v63  ;;  %v4278_v52 = vrot.slane %v4274_v7, 6  ;;  %v4279_v61 = vrot.slane %v4274_v7, 7 }
 0x6a1   :  { %v8207_v17 = vpop.eup %8206 }
 0x6a2   :  { %v4022_v55 = vmul.f32 %v8207_v17, %v4019_v1 }
 0x6a4   :  { %v8209_v62 = vpop.eup %8208  ;;  %v4023_v33 = vadd.f32 %v4022_v55, %v3949_v16 }
 0x6a5   :  { %v8211_v10 = vpop.eup %8210  ;;  %v4182_v37 = vadd.f32 1.0, %v8209_v62 }
 0x6a6   :  { %v8213_v45 = vpop.eup %8212  ;;  %8218 = vtanh.f32 %v4023_v33  ;;  %v4183_v8 = vadd.f32 1.0, %v8211_v10 }
 0x6a7   :  { %v8215_v58 = vpop.eup %8214  ;;  %8220 = vrcp.f32 %v4182_v37  ;;  %v4201_v38 = vadd.f32 1.0, %v8213_v45 }
 0x6a8   :  { %8222 = vrcp.f32 %v4183_v8  ;;  %v4202_v23 = vadd.f32 1.0, %v8215_v58  ;;  %v8217_v29 = vpop.eup %8216 }
 0x6a9   :  { %8224 = vrcp.f32 %v4201_v38  ;;  %v4025_v51 = vsub.f32 1.0, %v8217_v29  ;;  %v4027_v3 = vmul.f32 %v8217_v29, %v9020_v40 }
 0x6aa   :  { %8226 = vrcp.f32 %v4202_v23 }
 0x6b0   :  { %v8219_v50 = vpop.eup %8218 }
 0x6b1   :  { %v8221_v59 = vpop.eup %8220  ;;  %v4026_v0 = vmul.f32 %v8219_v50, %v4025_v51 }
 0x6b2   :  { %v8223_v4 = vpop.eup %8222  ;;  %v4282_v53 = vmul.f32 %v8221_v59, %v4278_v52 }
 0x6b3   :  { %v8225_v5 = vpop.eup %8224  ;;  %v4283_v30 = vmul.f32 %v8223_v4, %v4279_v61  ;;  %v9129_v63 = vadd.f32 %v4027_v3, %v4026_v0 }
 0x6b4   :  { %v8227_v1 = vpop.eup %8226  ;;  %v4284_v39 = vadd.f32 %v4282_v53, %v8647_v44  ;;  %v4296_v17 = vmul.f32 %v8225_v5, %v4292_v27  ;;  %v4288_v31 = vsub.f32 1.0, %v8225_v5 }
 0x6b5   :  { %v4285_v16 = vadd.f32 %v4283_v30, %v8649_v46  ;;  %7349 = vmatmul.mubr.msk.f32.vlgmr.msra.gmra.mrb[50].mxu1 %vm421_vm3, %v9129_v63  ;;  %7360 = vmatmul.mubr.msk.f32.vlgmr.msra.gmra.mrb[52].mxu0 %vm421_vm3, %v9129_v63  ;;  %v4297_v40 = vmul.f32 %v8227_v1, %v4293_v18  ;;  %v4289_v55 = vsub.f32 1.0, %v8227_v1 }
 0x6b6   :  { %8228 = vtanh.f32 %v4284_v39  ;;  %7917 = vmatpush3.bf16.msra.mxu1 %v8595_v41  ;;  %7923 = vmatpush3.bf16.msra.mxu0 %v8599_v42 }
 0x6b7   :  { %8230 = vtanh.f32 %v4285_v16  ;;  %7918 = vmatprep.subr.bf16.mxu1 %v8406_v12  ;;  %7924 = vmatprep.subr.bf16.mxu0 %v8406_v12 }
 0x6b8   :  { %7370 = vmatprep.mubr.msk.f32.mxu1 %vm8407_vm1, %v8408_v19  ;;  %7381 = vmatprep.mubr.msk.f32.mxu0 %vm8407_vm1, %v8408_v19 }
 0x6ba   :  { %7920 = vmatpush3.bf16.msra.mxu1 %v8605_v47  ;;  %7926 = vmatpush3.bf16.msra.mxu0 %v8609_v48 }
 0x6bb   :  { %7927 = vmatprep.subr.bf16.mxu1 %v8406_v12  ;;  %7933 = vmatprep.subr.bf16.mxu0 %v8406_v12 }
 0x6c0   :  { %v8229_v60 = vpop.eup %8228 }
 0x6c1   :  { %v8231_v62 = vpop.eup %8230  ;;  %v4290_v33 = vmul.f32 %v8229_v60, %v4288_v31 }
 0x6c2   :  { %v4291_v10 = vmul.f32 %v8231_v62, %v4289_v55 }
 0x6c3   :  { %v9149_v37 = vadd.f32 %v4296_v17, %v4290_v33 }
 0x6c4   :  { %v9151_v45 = vadd.f32 %v4297_v40, %v4291_v10 }
 0x6c5   :  { %v4445_v8 = vrot.slane %v9149_v37, 2 }
 0x6c6   :  { %v4446_v58 = vrot.slane %v9151_v45, 1 }
 0x6c8   :  { %v4447_v38 = vsel %vm836_vm2, %v4446_v58, %v4445_v8 }
 0x6c9   :  { %7371 = vmatmul.mubr.msk.f32.vlgmr.msra.gmra.mrb[52].mxu1 %vm421_vm3, %v4447_v38  ;;  %7382 = vmatmul.mubr.msk.f32.vlgmr.msra.gmra.mrb[54].mxu0 %vm421_vm3, %v4447_v38 }
 0x6ca   :  { %7929 = vmatpush3.bf16.msra.mxu1 %v8659_v11  ;;  %7935 = vmatpush3.bf16.msra.mxu0 %v8661_v15 }
 0x6cb   :  { %7930 = vmatprep.subr.bf16.mxu1 %v8406_v12  ;;  %7936 = vmatprep.subr.bf16.mxu0 %v8406_v12 }
 0x6cc   :  { %7392 = vmatprep.mubr.msk.f32.mxu1 %vm8407_vm1, %v8408_v19  ;;  %7403 = vmatprep.mubr.msk.f32.mxu0 %vm8407_vm1, %v8408_v19 }
 0x6ce   :  { %7932 = vmatpush3.bf16.msra.mxu1 %v8668_v25  ;;  %7938 = vmatpush3.bf16.msra.mxu0 %v8670_v26 }
 0x6cf   :  { %7939 = vmatprep.subr.bf16.mxu1 %v8406_v12  ;;  %7945 = vmatprep.subr.bf16.mxu0 %v8406_v12 }
 0x6d1   :  { %7393 = vmatmul.mubr.msk.f32.vlgmr.msra.gmra.mrb[54].mxu1 %vm421_vm3, %v4447_v38  ;;  %7404 = vmatmul.mubr.msk.f32.vlgmr.msra.gmra.mrb[56].mxu0 %vm421_vm3, %v9129_v63 }
 0x6d2   :  { %7941 = vmatpush3.bf16.msra.mxu1 %v8539_v9  ;;  %7947 = vmatpush3.bf16.msra.mxu0 %v8544_v13 }
 0x6d3   :  { %7942 = vmatprep.subr.bf16.mxu1 %v8406_v12  ;;  %7948 = vmatprep.subr.bf16.mxu0 %v8406_v12 }
 0x6d4   :  { %7414 = vmatprep.mubr.msk.f32.mxu1 %vm8407_vm1, %v8408_v19  ;;  %7425 = vmatprep.mubr.msk.f32.mxu0 %vm8407_vm1, %v8408_v19 }
 0x6d6   :  { %7944 = vmatpush3.bf16.msra.mxu1 %v8547_v14  ;;  %7950 = vmatpush3.bf16.msra.mxu0 %v8556_v20 }
 0x6d7   :  { %7951 = vmatprep.subr.bf16.mxu1 %v8406_v12  ;;  %7957 = vmatprep.subr.bf16.mxu0 %v8406_v12 }
 0x6d9   :  { %7415 = vmatmul.mubr.msk.f32.vlgmr.msra.gmra.mrb[56].mxu1 %vm421_vm3, %v4447_v38  ;;  %7426 = vmatmul.mubr.msk.f32.vlgmr.msra.gmra.mrb[58].mxu0 %vm421_vm3, %v4447_v38 }
 0x6da   :  { %7953 = vmatpush3.bf16.msra.mxu1 %v8560_v21  ;;  %7436 = vmatprep.mubr.msk.f32.mxu1 %vm8407_vm1, %v8408_v19 }
 0x6db   :  { %7954 = vmatprep.subr.bf16.mxu1 %v8406_v12  ;;  %7959 = vmatpush3.bf16.msra.mxu0 %v8582_v28 }
 0x6dc   :  { %7960 = vmatprep.subr.bf16.mxu0 %v8406_v12  ;;  %7447 = vmatprep.mubr.msk.f32.mxu0 %vm8407_vm1, %v8408_v19 }
 0x6de   :  { %7956 = vmatpush3.bf16.msra.mxu1 %v8568_v24 }
 0x6df   :  { %7963 = vmatprep.subr.bf16.mxu1 %v8406_v12  ;;  %7962 = vmatpush3.bf16.msra.mxu0 %v8587_v35 }
 0x6e0   :  { %7969 = vmatprep.subr.bf16.mxu0 %v8406_v12 }
 0x6e1   :  { %7437 = vmatmul.mubr.msk.f32.vlgmr.msra.gmra.mrb[58].mxu1 %vm421_vm3, %v4447_v38 }
 0x6e2   :  { %7965 = vmatpush3.bf16.msra.mxu1 %v8584_v32  ;;  %7458 = vmatprep.mubr.msk.f32.mxu1 %vm8407_vm1, %v8408_v19 }
 0x6e3   :  { %7966 = vmatprep.subr.bf16.mxu1 %v8406_v12 }
 0x6e6   :  { %7968 = vmatpush3.bf16.msra.mxu1 %v8591_v36 }
 0x6e7   :  { %7975 = vmatprep.subr.bf16.mxu1 %v8406_v12 }
 0x788   :  { %v4369_v23 = vpop.f32.mrb[50].mxu1  ;;  %v4439_v29 = vpop.f32.mrb[52].mxu0 }
 0x789   :  { %v7350_v7 = vpop.f32.mrb[51].mxu1  ;;  %v7361_v51 = vpop.f32.mrb[53].mxu0 }
 0x79c   :  { %v4516_v50 = vpop.f32.mrb[52].mxu1  ;;  %v4593_v52 = vpop.f32.mrb[54].mxu0 }
 0x79d   :  { %v4517_v59 = vadd.f32 %v4516_v50, %v4369_v23  ;;  %v4594_v61 = vadd.f32 %v4593_v52, %v4439_v29  ;;  %v7372_v0 = vpop.f32.mrb[53].mxu1  ;;  %v7383_v3 = vpop.f32.mrb[55].mxu0 }
 0x79f   :  { %v4520_v4 = vadd.f32 %v9100_v54, %v4517_v59  ;;  %v4597_v53 = vadd.f32 %v9106_v34, %v4594_v61 }
 0x7a1   :  { %v6386_v27 = vmul.f32 -1.442695, %v4520_v4  ;;  %v6388_v30 = vmul.f32 -1.442695, %v4597_v53 }
 0x7a3   :  { %8232 = vpow2.f32 %v6386_v27 }
 0x7a4   :  { %v4670_v5 = vpop.f32.mrb[54].mxu1  ;;  %v4740_v18 = vpop.f32.mrb[56].mxu0  ;;  %8234 = vpow2.f32 %v6388_v30 }
 0x7a5   :  { %v7394_v1 = vpop.f32.mrb[55].mxu1  ;;  %v7405_v39 = vpop.f32.mrb[57].mxu0  ;;  %v4741_v3 = vadd.f32 %v9116_v49, %v4740_v18  ;;  %v4671_v27 = vadd.f32 %v9122_v22, %v4670_v5 }
 0x7ac   :  { %v4817_v17 = vpop.f32.mrb[56].mxu1  ;;  %v4887_v16 = vpop.f32.mrb[58].mxu0 }
 0x7ad   :  { %v8233_v40 = vpop.eup %8232  ;;  %v4892_v31 = vrot.slane %v4817_v17, 7  ;;  %v4896_v60 = vadd.f32 %v4817_v17, %v8623_v56  ;;  %v4910_v55 = vrot.slane %v4887_v16, 7  ;;  %v7416_v62 = vpop.f32.mrb[57].mxu1  ;;  %v4914_v50 = vadd.f32 %v4887_v16, %v8634_v6 }
 0x7ae   :  { %v7427_v33 = vpop.f32.mrb[59].mxu0  ;;  %v4524_v10 = vadd.f32 1.0, %v8233_v40  ;;  %v8235_v51 = vpop.eup %8234 }
 0x7af   :  { %v4895_v8 = vadd.f32 %v4892_v31, %v8625_v57  ;;  %v6394_v38 = vmul.f32 -1.442695, %v4896_v60  ;;  %v4913_v23 = vadd.f32 %v4910_v55, %v8632_v2  ;;  %v4601_v61 = vadd.f32 1.0, %v8235_v51 }
 0x7b0   :  { %8236 = vrcp.f32 %v4524_v10  ;;  %v6396_v0 = vmul.f32 -1.442695, %v4914_v50 }
 0x7b1   :  { %v6393_v29 = vmul.f32 -1.442695, %v4895_v8  ;;  %v6395_v7 = vmul.f32 -1.442695, %v4913_v23  ;;  %8238 = vpow2.f32 %v6394_v38 }
 0x7b3   :  { %8240 = vpow2.f32 %v6393_v29 }
 0x7b4   :  { %8242 = vpow2.f32 %v6395_v7  ;;  %v4993_v52 = vpop.f32.mrb[58].mxu1  ;;  %v5011_v7 = vrot.slane %v9149_v37, 1 }
 0x7b5   :  { %v7438_v59 = vpop.f32.mrb[59].mxu1  ;;  %8244 = vrcp.f32 %v4601_v61  ;;  %v4994_v18 = vadd.f32 %v9014_v43, %v4993_v52 }
 0x7b6   :  { %8246 = vpow2.f32 %v6396_v0 }
 0x7b7   :  { %v4998_v10 = vrot.slane %v4994_v18, 7 }
 0x7ba   :  { %v8237_v4 = vpop.eup %8236 }
 0x7bb   :  { %v4744_v53 = vmul.f32 %v8237_v4, %v4741_v3  ;;  %v8239_v30 = vpop.eup %8238 }
 0x7bc   :  { %v4904_v17 = vadd.f32 1.0, %v8239_v30 }
 0x7bd   :  { %v8241_v1 = vpop.eup %8240  ;;  %v4745_v39 = vadd.f32 %v4744_v53, %v4671_v27 }
 0x7be   :  { %v8243_v40 = vpop.eup %8242  ;;  %v4903_v31 = vadd.f32 1.0, %v8241_v1 }
 0x7bf   :  { %8248 = vtanh.f32 %v4745_v39  ;;  %v4921_v16 = vadd.f32 1.0, %v8243_v40  ;;  %v8245_v60 = vpop.eup %8244 }
 0x7c0   :  { %8250 = vrcp.f32 %v4903_v31  ;;  %v8247_v55 = vpop.eup %8246  ;;  %v4747_v33 = vsub.f32 1.0, %v8245_v60  ;;  %v4749_v23 = vmul.f32 %v8245_v60, %v9129_v63 }
 0x7c1   :  { %8252 = vrcp.f32 %v4904_v17  ;;  %v4922_v62 = vadd.f32 1.0, %v8247_v55 }
 0x7c2   :  { %8254 = vrcp.f32 %v4921_v16 }
 0x7c3   :  { %8256 = vrcp.f32 %v4922_v62 }
 0x7c9   :  { %v8249_v5 = vpop.eup %8248 }
 0x7ca   :  { %v8251_v8 = vpop.eup %8250  ;;  %v4748_v38 = vmul.f32 %v8249_v5, %v4747_v33 }
 0x7cb   :  { %v8253_v29 = vpop.eup %8252  ;;  %v5001_v51 = vmul.f32 %v8251_v8, %v4998_v10 }
 0x7cc   :  { %v8255_v50 = vpop.eup %8254  ;;  %v5002_v59 = vmul.f32 %v8253_v29, %v4994_v18  ;;  %v9219_v61 = vadd.f32 %v4749_v23, %v4748_v38 }
 0x7cd   :  { %v5003_v0 = vadd.f32 %v5001_v51, %v8647_v44  ;;  %v5014_v52 = vmul.f32 %v8255_v50, %v5011_v7  ;;  %v8257_v63 = vpop.eup %8256  ;;  %v5007_v37 = vsub.f32 1.0, %v8255_v50 }
 0x7ce   :  { %v5004_v3 = vadd.f32 %v5002_v59, %v8649_v46  ;;  %7448 = vmatmul.mubr.msk.f32.vlgmr.msra.gmra.mrb[60].mxu0 %vm421_vm3, %v9219_v61  ;;  %7459 = vmatmul.mubr.msk.f32.vlgmr.msra.gmra.mrb[60].mxu1 %vm421_vm3, %v9219_v61  ;;  %v5008_v27 = vsub.f32 1.0, %v8257_v63  ;;  %v5015_v39 = vmul.f32 %v8257_v63, %v4446_v58 }
 0x7cf   :  { %8258 = vtanh.f32 %v5003_v0  ;;  %7971 = vmatpush3.bf16.msra.mxu0 %v8595_v41  ;;  %7977 = vmatpush3.bf16.msra.mxu1 %v8599_v42 }
 0x7d0   :  { %8260 = vtanh.f32 %v5004_v3  ;;  %7972 = vmatprep.subr.bf16.mxu0 %v8406_v12  ;;  %7978 = vmatprep.subr.bf16.mxu1 %v8406_v12 }
 0x7d1   :  { %7469 = vmatprep.mubr.msk.f32.mxu0 %vm8407_vm1, %v8408_v19  ;;  %7480 = vmatprep.mubr.msk.f32.mxu1 %vm8407_vm1, %v8408_v19 }
 0x7d3   :  { %7974 = vmatpush3.bf16.msra.mxu0 %v8605_v47  ;;  %7980 = vmatpush3.bf16.msra.mxu1 %v8609_v48 }
 0x7d4   :  { %7981 = vmatprep.subr.bf16.mxu0 %v8406_v12  ;;  %7987 = vmatprep.subr.bf16.mxu1 %v8406_v12 }
 0x7d9   :  { %v8259_v4 = vpop.eup %8258 }
 0x7da   :  { %v8261_v53 = vpop.eup %8260  ;;  %v5009_v30 = vmul.f32 %v8259_v4, %v5007_v37 }
 0x7db   :  { %v5010_v1 = vmul.f32 %v8261_v53, %v5008_v27 }
 0x7dc   :  { %v9241_v17 = vadd.f32 %v5014_v52, %v5009_v30 }
 0x7dd   :  { %v9243_v40 = vadd.f32 %v5015_v39, %v5010_v1 }
 0x7de   :  { %v5163_v31 = vrot.slane %v9241_v17, 1 }
 0x7e0   :  { %v5164_v16 = vsel %vm836_vm2, %v9243_v40, %v5163_v31 }
 0x7e1   :  { %7470 = vmatmul.mubr.msk.f32.vlgmr.msra.gmra.mrb[62].mxu0 %vm421_vm3, %v5164_v16  ;;  %7481 = vmatmul.mubr.msk.f32.vlgmr.msra.gmra.mrb[62].mxu1 %vm421_vm3, %v5164_v16 }
 0x7e2   :  { %7983 = vmatpush3.bf16.msra.mxu0 %v8659_v11  ;;  %7989 = vmatpush3.bf16.msra.mxu1 %v8661_v15 }
 0x7e3   :  { %7984 = vmatprep.subr.bf16.mxu0 %v8406_v12  ;;  %7990 = vmatprep.subr.bf16.mxu1 %v8406_v12 }
 0x7e4   :  { %7491 = vmatprep.mubr.msk.f32.mxu0 %vm8407_vm1, %v8408_v19  ;;  %7502 = vmatprep.mubr.msk.f32.mxu1 %vm8407_vm1, %v8408_v19 }
 0x7e6   :  { %7986 = vmatpush3.bf16.msra.mxu0 %v8668_v25  ;;  %7992 = vmatpush3.bf16.msra.mxu1 %v8670_v26 }
 0x7e7   :  { %7993 = vmatprep.subr.bf16.mxu0 %v8406_v12  ;;  %7999 = vmatprep.subr.bf16.mxu1 %v8406_v12 }
 0x7e9   :  { %7492 = vmatmul.mubr.msk.f32.vlgmr.msra.gmra.mrb[64].mxu0 %vm421_vm3, %v5164_v16  ;;  %7503 = vmatmul.mubr.msk.f32.vlgmr.msra.gmra.mrb[64].mxu1 %vm421_vm3, %v9219_v61 }
 0x7ea   :  { %7995 = vmatpush3.bf16.msra.mxu0 %v8539_v9  ;;  %8001 = vmatpush3.bf16.msra.mxu1 %v8544_v13 }
 0x7eb   :  { %7996 = vmatprep.subr.bf16.mxu0 %v8406_v12  ;;  %8002 = vmatprep.subr.bf16.mxu1 %v8406_v12 }
 0x7ec   :  { %7513 = vmatprep.mubr.msk.f32.mxu0 %vm8407_vm1, %v8408_v19  ;;  %7524 = vmatprep.mubr.msk.f32.mxu1 %vm8407_vm1, %v8408_v19 }
 0x7ee   :  { %7998 = vmatpush3.bf16.msra.mxu0 %v8547_v14  ;;  %8004 = vmatpush3.bf16.msra.mxu1 %v8556_v20 }
 0x7ef   :  { %8005 = vmatprep.subr.bf16.mxu0 %v8406_v12  ;;  %8011 = vmatprep.subr.bf16.mxu1 %v8406_v12 }
 0x7f1   :  { %7514 = vmatmul.mubr.msk.f32.vlgmr.msra.gmra.mrb[66].mxu0 %vm421_vm3, %v5164_v16  ;;  %7525 = vmatmul.mubr.msk.f32.vlgmr.msra.gmra.mrb[66].mxu1 %vm421_vm3, %v5164_v16 }
 0x7f2   :  { %8007 = vmatpush3.bf16.msra.mxu0 %v8560_v21  ;;  %7535 = vmatprep.mubr.msk.f32.mxu0 %vm8407_vm1, %v8408_v19 }
 0x7f3   :  { %8008 = vmatprep.subr.bf16.mxu0 %v8406_v12  ;;  %8013 = vmatpush3.bf16.msra.mxu1 %v8582_v28 }
 0x7f4   :  { %8014 = vmatprep.subr.bf16.mxu1 %v8406_v12  ;;  %7546 = vmatprep.mubr.msk.f32.mxu1 %vm8407_vm1, %v8408_v19 }
 0x7f6   :  { %8010 = vmatpush3.bf16.msra.mxu0 %v8568_v24 }
 0x7f7   :  { %8017 = vmatprep.subr.bf16.mxu0 %v8406_v12  ;;  %8016 = vmatpush3.bf16.msra.mxu1 %v8587_v35 }
 0x7f8   :  { %8023 = vmatprep.subr.bf16.mxu1 %v8406_v12 }
 0x7f9   :  { %7536 = vmatmul.mubr.msk.f32.vlgmr.msra.gmra.mrb[68].mxu0 %vm421_vm3, %v5164_v16 }
 0x7fa   :  { %8019 = vmatpush3.bf16.msra.mxu0 %v8584_v32  ;;  %7557 = vmatprep.mubr.msk.f32.mxu0 %vm8407_vm1, %v8408_v19 }
 0x7fb   :  { %8020 = vmatprep.subr.bf16.mxu0 %v8406_v12 }
 0x7fe   :  { %8022 = vmatpush3.bf16.msra.mxu0 %v8591_v36 }
 0x7ff   :  { %8029 = vmatprep.subr.bf16.mxu0 %v8406_v12 }
 0x8a1   :  { %v5087_v9 = vpop.f32.mrb[60].mxu0  ;;  %v5157_v13 = vpop.f32.mrb[60].mxu1 }
 0x8a2   :  { %v7449_v14 = vpop.f32.mrb[61].mxu0  ;;  %v7460_v20 = vpop.f32.mrb[61].mxu1 }
 0x8b4   :  { %v5233_v21 = vpop.f32.mrb[62].mxu0  ;;  %v5310_v24 = vpop.f32.mrb[62].mxu1 }
 0x8b5   :  { %v5234_v28 = vadd.f32 %v5233_v21, %v5087_v9  ;;  %v5311_v35 = vadd.f32 %v5310_v24, %v5157_v13  ;;  %v7471_v45 = vpop.f32.mrb[63].mxu0  ;;  %v7482_v58 = vpop.f32.mrb[63].mxu1 }
 0x8b7   :  { %v5237_v32 = vadd.f32 %v9100_v54, %v5234_v28  ;;  %v5314_v55 = vadd.f32 %v9106_v34, %v5311_v35 }
 0x8b9   :  { %v6401_v60 = vmul.f32 -1.442695, %v5237_v32  ;;  %v6403_v5 = vmul.f32 -1.442695, %v5314_v55 }
 0x8bb   :  { %8262 = vpow2.f32 %v6401_v60 }
 0x8bc   :  { %v5387_v18 = vpop.f32.mrb[64].mxu0  ;;  %v5457_v36 = vpop.f32.mrb[64].mxu1  ;;  %8264 = vpow2.f32 %v6403_v5 }
 0x8bd   :  { %v7493_v62 = vpop.f32.mrb[65].mxu0  ;;  %v7504_v33 = vpop.f32.mrb[65].mxu1  ;;  %v5458_v39 = vadd.f32 %v9116_v49, %v5457_v36 }
 0x8c4   :  { %v5534_v10 = vpop.f32.mrb[66].mxu0  ;;  %v5604_v8 = vpop.f32.mrb[66].mxu1 }
 0x8c5   :  { %v8263_v38 = vpop.eup %8262  ;;  %v5609_v23 = vrot.slane %v5534_v10, 1  ;;  %v5612_v29 = vadd.f32 %v5534_v10, %v8625_v57  ;;  %v5627_v7 = vrot.slane %v5604_v8, 1  ;;  %v7515_v51 = vpop.f32.mrb[67].mxu0  ;;  %v5630_v4 = vadd.f32 %v5604_v8, %v8632_v2 }
 0x8c6   :  { %v7526_v50 = vpop.f32.mrb[67].mxu1  ;;  %v5241_v59 = vadd.f32 1.0, %v8263_v38  ;;  %v8265_v27 = vpop.eup %8264  ;;  %v5728_v38 = vrot.slane %v9243_v40, 1 }
 0x8c7   :  { %v5613_v0 = vadd.f32 %v5609_v23, %v8623_v56  ;;  %v6408_v52 = vmul.f32 -1.442695, %v5612_v29  ;;  %v5631_v3 = vadd.f32 %v5627_v7, %v8634_v6  ;;  %v6410_v30 = vmul.f32 -1.442695, %v5630_v4 }
 0x8c8   :  { %8266 = vrcp.f32 %v5241_v59  ;;  %v5318_v1 = vadd.f32 1.0, %v8265_v27  ;;  %v5388_v56 = vadd.f32 %v9122_v22, %v5387_v18 }
 0x8c9   :  { %v6409_v63 = vmul.f32 -1.442695, %v5613_v0  ;;  %v6411_v37 = vmul.f32 -1.442695, %v5631_v3  ;;  %8268 = vpow2.f32 %v6408_v52 }
 0x8cb   :  { %8270 = vpow2.f32 %v6409_v63 }
 0x8cc   :  { %v5710_v53 = vpop.f32.mrb[68].mxu0  ;;  %8272 = vpow2.f32 %v6411_v37 }
 0x8cd   :  { %v7537_v57 = vpop.f32.mrb[69].mxu0  ;;  %8274 = vpow2.f32 %v6410_v30  ;;  %v5711_v45 = vadd.f32 %v9014_v43, %v5710_v53 }
 0x8ce   :  { %8276 = vrcp.f32 %v5318_v1 }
 0x8cf   :  { %v5715_v18 = vrot.slane %v5711_v45, 1 }
 0x8d2   :  { %v8267_v16 = vpop.eup %8266 }
 0x8d3   :  { %v5461_v6 = vmul.f32 %v8267_v16, %v5458_v39  ;;  %v8269_v9 = vpop.eup %8268 }
 0x8d4   :  { %v5620_v20 = vadd.f32 1.0, %v8269_v9 }
 0x8d5   :  { %v8271_v13 = vpop.eup %8270  ;;  %v5462_v14 = vadd.f32 %v5461_v6, %v5388_v56 }
 0x8d6   :  { %v5621_v2 = vadd.f32 1.0, %v8271_v13  ;;  %v8273_v21 = vpop.eup %8272 }
 0x8d7   :  { %8278 = vtanh.f32 %v5462_v14  ;;  %v5639_v24 = vadd.f32 1.0, %v8273_v21  ;;  %v8275_v28 = vpop.eup %8274 }
 0x8d8   :  { %8280 = vrcp.f32 %v5620_v20  ;;  %v8277_v35 = vpop.eup %8276  ;;  %v5638_v58 = vadd.f32 1.0, %v8275_v28 }
 0x8d9   :  { %8282 = vrcp.f32 %v5621_v2  ;;  %v5464_v32 = vsub.f32 1.0, %v8277_v35  ;;  %v5466_v62 = vmul.f32 %v8277_v35, %v9219_v61 }
 0x8da   :  { %8284 = vrcp.f32 %v5639_v24 }
 0x8db   :  { %8286 = vrcp.f32 %v5638_v58 }
 0x8e1   :  { %v8279_v60 = vpop.eup %8278 }
 0x8e2   :  { %v8281_v55 = vpop.eup %8280  ;;  %v5465_v36 = vmul.f32 %v8279_v60, %v5464_v32 }
 0x8e3   :  { %v8283_v33 = vpop.eup %8282  ;;  %v5718_v5 = vmul.f32 %v8281_v55, %v5711_v45 }
 0x8e4   :  { %v5719_v10 = vmul.f32 %v8283_v33, %v5715_v18  ;;  %v9310_v8 = vadd.f32 %v5466_v62, %v5465_v36  ;;  %v8285_v23 = vpop.eup %8284 }
 0x8e5   :  { %v5720_v29 = vadd.f32 %v5718_v5, %v8647_v44  ;;  %v5732_v61 = vmul.f32 %v8285_v23, %v5728_v38 }
 0x8e6   :  { %v5721_v43 = vadd.f32 %v5719_v10, %v8649_v46  ;;  %7547 = vmatmul.mubr.msk.f32.vlgmr.msra.gmra.mrb[68].mxu1 %vm421_vm3, %v9310_v8  ;;  %7558 = vmatmul.mubr.msk.f32.vlgmr.msra.gmra.mrb[70].mxu0 %vm421_vm3, %v9310_v8  ;;  %v5725_v46 = vsub.f32 1.0, %v8285_v23 }
 0x8e7   :  { %8288 = vtanh.f32 %v5720_v29  ;;  %8025 = vmatpush3.bf16.msra.mxu1 %v8595_v41  ;;  %8031 = vmatpush3.bf16.msra.mxu0 %v8599_v42  ;;  %v8287_v41 = vpop.eup %8286 }
 0x8e8   :  { %8290 = vtanh.f32 %v5721_v43  ;;  %8026 = vmatprep.subr.bf16.mxu1 %v8406_v12  ;;  %8032 = vmatprep.subr.bf16.mxu0 %v8406_v12  ;;  %v5724_v42 = vsub.f32 1.0, %v8287_v41  ;;  %v5731_v51 = vmul.f32 %v8287_v41, %v5163_v31 }
 0x8e9   :  { %7568 = vmatprep.mubr.msk.f32.mxu1 %vm8407_vm1, %v8408_v19  ;;  %7579 = vmatprep.mubr.msk.f32.mxu0 %vm8407_vm1, %v8408_v19 }
 0x8eb   :  { %8028 = vmatpush3.bf16.msra.mxu1 %v8605_v47  ;;  %8034 = vmatpush3.bf16.msra.mxu0 %v8609_v48  ;;  %v6185_v48 = vld [vmem:[%s9395_s9] sm:$0xff] }
 0x8ec   :  { %8035 = vmatprep.subr.bf16.mxu1 %v8406_v12  ;;  %8041 = vmatprep.subr.bf16.mxu0 %v8406_v12 }
 0x8f1   :  { %v8289_v44 = vpop.eup %8288 }
 0x8f2   :  { %v8291_v40 = vpop.eup %8290  ;;  %v5726_v7 = vmul.f32 %v8289_v44, %v5724_v42 }
 0x8f3   :  { %v5727_v50 = vmul.f32 %v8291_v40, %v5725_v46 }
 0x8f4   :  { %v5733_v59 = vadd.f32 %v5731_v51, %v5726_v7 }
 0x8f5   :  { %v5734_v0 = vadd.f32 %v5732_v61, %v5727_v50 }
 0x8f7   :  { %v5880_v52 = vrot.slane %v5734_v0, 7 }
 0x8f9   :  { %v5881_v47 = vsel %vm836_vm2, %v5880_v52, %v5733_v59 }
 0x8fa   :  { %7569 = vmatmul.mubr.msk.f32.vlgmr.msra.gmra.mrb[70].mxu1 %vm421_vm3, %v5881_v47  ;;  %7580 = vmatmul.mubr.msk.f32.vlgmr.msra.gmra.mrb[72].mxu0 %vm421_vm3, %v5881_v47 }
 0x8fb   :  { %8037 = vmatpush3.bf16.msra.mxu1 %v8659_v11  ;;  %8043 = vmatpush3.bf16.msra.mxu0 %v8661_v15  ;;  %v6186_v11 = vld [vmem:[%s9395_s9 + $0x8] sm:$0xff]  ;;  %v6187_v15 = vld [vmem:[%s9395_s9 + $0x10] sm:$0xff] }
 0x8fc   :  { %8038 = vmatprep.subr.bf16.mxu1 %v8406_v12  ;;  %8044 = vmatprep.subr.bf16.mxu0 %v8406_v12 }
 0x8fd   :  { %7590 = vmatprep.mubr.msk.f32.mxu1 %vm8407_vm1, %v8408_v19  ;;  %7601 = vmatprep.mubr.msk.f32.mxu0 %vm8407_vm1, %v8408_v19 }
 0x8ff   :  { %8040 = vmatpush3.bf16.msra.mxu1 %v8668_v25  ;;  %8046 = vmatpush3.bf16.msra.mxu0 %v8670_v26  ;;  %v8048_v25 = vpack.c.bf16 %v6186_v11, %v6185_v48  ;;  %v6188_v26 = vld [vmem:[%s9395_s9 + $0x18] sm:$0xff] }
 0x900   :  { %8047 = vmatprep.subr.bf16.mxu1 %v8406_v12  ;;  %v8051_v17 = vpack.c.bf16 %v6188_v26, %v6187_v15 }
 0x902   :  { %7591 = vmatmul.mubr.msk.f32.vlgmr.msra.gmra.mrb[72].mxu1 %vm421_vm3, %v5881_v47  ;;  %7602 = vmatmul.mubr.msk.f32.vlgmr.msra.gmra.mrb[74].mxu0 %vm421_vm3, %v9310_v8 }
 0x903   :  { %7612 = vmatprep.mubr.msk.f32.mxu1 %vm8407_vm1, %v8408_v19  ;;  %8049 = vmatpush3.bf16.msra.mxu1 %v8048_v25 }
 0x904   :  { %8050 = vmatprep.subr.bf16.mxu1 %v8406_v12 }
 0x907   :  { %8052 = vmatpush3.bf16.msra.mxu1 %v8051_v17 }
 0x9b9   :  { %v5804_v19 = vpop.f32.mrb[68].mxu1  ;;  %v5874_v31 = vpop.f32.mrb[70].mxu0 }
 0x9ba   :  { %v7548_v3 = vpop.f32.mrb[69].mxu1  ;;  %v7559_v63 = vpop.f32.mrb[71].mxu0 }
 0x9cd   :  { %v5950_v37 = vpop.f32.mrb[70].mxu1  ;;  %v6027_v4 = vpop.f32.mrb[72].mxu0 }
 0x9ce   :  { %v5951_v27 = vadd.f32 %v5950_v37, %v5804_v19  ;;  %v6028_v53 = vadd.f32 %v6027_v4, %v5874_v31  ;;  %v7570_v57 = vpop.f32.mrb[71].mxu1  ;;  %v7581_v30 = vpop.f32.mrb[73].mxu0 }
 0x9d0   :  { %v5954_v1 = vadd.f32 %v9100_v54, %v5951_v27  ;;  %v6031_v16 = vadd.f32 %v9106_v34, %v6028_v53 }
 0x9d2   :  { %v6416_v39 = vmul.f32 -1.442695, %v5954_v1  ;;  %v6418_v13 = vmul.f32 -1.442695, %v6031_v16 }
 0x9d4   :  { %8292 = vpow2.f32 %v6416_v39 }
 0x9d5   :  { %v6104_v56 = vpop.f32.mrb[72].mxu1  ;;  %v6174_v6 = vpop.f32.mrb[74].mxu0  ;;  %8294 = vpow2.f32 %v6418_v13 }
 0x9d6   :  { %v7592_v12 = vpop.f32.mrb[73].mxu1  ;;  %v7603_v9 = vpop.f32.mrb[75].mxu0  ;;  %v6175_v24 = vadd.f32 %v9116_v49, %v6174_v6  ;;  %v6105_v54 = vadd.f32 %v9122_v22, %v6104_v56  ;;  %v6421_v49 = vld [vmem:[%s9396_s10] ss:$0 sm:$0xff] }
 0x9de   :  { %v8293_v14 = vpop.eup %8292 }
 0x9df   :  { %v5958_v20 = vadd.f32 1.0, %v8293_v14  ;;  %v8295_v2 = vpop.eup %8294 }
 0x9e0   :  { %v6035_v21 = vadd.f32 1.0, %v8295_v2 }
 0x9e1   :  { %8296 = vrcp.f32 %v5958_v20 }
 0x9e2   :  { %8298 = vrcp.f32 %v6035_v21 }
 0x9eb   :  { %v8297_v28 = vpop.eup %8296 }
 0x9ec   :  { %v6178_v35 = vmul.f32 %v8297_v28, %v6175_v24  ;;  %v8299_v45 = vpop.eup %8298 }
 0x9ed   :  { %v6181_v58 = vsub.f32 1.0, %v8299_v45  ;;  %v6183_v55 = vmul.f32 %v8299_v45, %v9310_v8 }
 0x9ee   :  { %v6179_v34 = vadd.f32 %v6178_v35, %v6105_v54 }
 0x9f0   :  { %8300 = vtanh.f32 %v6179_v34 }
 0x9fa   :  { %v8301_v32 = vpop.eup %8300 }
 0x9fb   :  { %v6182_v60 = vmul.f32 %v8301_v32, %v6181_v58 }
 0x9fd   :  { %v6184_v18 = vadd.f32 %v6183_v55, %v6182_v60 }
 0x9ff   :  { %7613 = vmatmul.mubr.msk.f32.vlgmr.msra.gmra.mrb[74].mxu1 %vm421_vm3, %v6184_v18 }
 0xad2   :  { %v6265_v36 = vpop.f32.mrb[74].mxu1 }
 0xad3   :  { %v6266_v22 = vadd.f32 %v6421_v49, %v6265_v36  ;;  %v7614_v62 = vpop.f32.mrb[75].mxu1 }
 0xad5   :  { %6270 = vst.msk [vmem:[#allocation8] sm:$0x3] %vm6269_vm4, %v6266_v22 }
 0xad6   :  { %8384 = shalt.err (!%p8381_p0)
}
 0xad7   :  { %s8385_s16 = scalar_lea.hbm %s9397_s11, 32 }
 0xad8   :  { %p8386_p1 = scmp.ne.s32.totalorder %s9397_s11, %s8385_s16  ;;  %p8389_p2 = scmp.lt.u32.totalorder %s8385_s16, %s9397_s11 }
 0xada   :  { %p8391_p3 = pnand %p8389_p2, %p8386_p1 }
 0xadc   :  { %8394 = shalt.err (!%p8391_p3)
}
 0xadd   :  { %6280 = dma.vmem_to_hbm [thread:$0]  %s6278_s3, 32, %s9397_s11, [#allocation4]  }
 0xade   :  { %8399 = dma.done.wait [#allocation4], 32  }
 0xadf   :  { %8400 = vsyncadd [#allocation4], 4294967264 }
 0xae0   :  { %6284 = vsyncpa [#allocation3], 1 }
 0xae1   :  { %6285 = vsyncpa [#allocation6], 1 }
 0xae2   :  { %6286 = vsyncpa [#allocation4], 1 }

</bundles_post_ra>
